<compile_context>
chip_gen: v7x
topology: tpu7x:2x2x1
jax: 0.10.0
libtpu: 0.0.40
codegen_flags: <defaults>
</compile_context>

<pallas_src>
import numpy as np
import jax
import jax.numpy as jnp
from jax import lax
from jax.experimental import pallas as pl
from jax.experimental.pallas import tpu as pltpu


# ----------------------------- Pallas kernels ------------------------------

def _matmul_relu_kernel(x_ref, w_ref, o_ref):
    acc = jnp.dot(x_ref[...], w_ref[...], preferred_element_type=jnp.float32)
    o_ref[...] = jnp.maximum(acc, 0.0).astype(o_ref.dtype)


def conv1_gemm_relu(xcol, wmat, *, blocks=2):
    """relu(xcol @ wmat); xcol (M, K) bf16, wmat (K, N) bf16, M % blocks == 0."""
    M, K = xcol.shape
    K2, N = wmat.shape
    assert K == K2 and M % blocks == 0
    tm = M // blocks
    return pl.pallas_call(
        _matmul_relu_kernel,
        out_shape=jax.ShapeDtypeStruct((M, N), jnp.bfloat16),
        grid=(blocks,),
        in_specs=[pl.BlockSpec((tm, K), lambda i: (i, 0)),
                  pl.BlockSpec((K, N), lambda i: (0, 0))],
        out_specs=pl.BlockSpec((tm, N), lambda i: (i, 0)),
        compiler_params=pltpu.CompilerParams(
            dimension_semantics=("parallel",)),
    )(xcol, wmat)


def _tail_kernel(xcol2_ref, w2_ref, sel3_ref, w3_ref, self1_ref, wf1_ref,
                 wf2_ref, o_ref):
    """Fused conv2 -> conv3 -> fc1 -> fc2 (+ReLU each), fully VMEM resident."""
    # conv2: one GEMM + ReLU.
    h2 = jnp.dot(xcol2_ref[...], w2_ref[...],
                 preferred_element_type=jnp.float32)
    h2 = jnp.maximum(h2, 0.0).astype(jnp.bfloat16)               # (64, 128)

    # conv3 (1x3x3): accumulate over the 9 taps; the row gather for each tap
    # is a constant 0/1 selection matmul (keeps everything a plain 2-D dot).
    acc3 = jnp.zeros((sel3_ref.shape[1], w3_ref.shape[2]), jnp.float32)
    for k in range(sel3_ref.shape[0]):
        g = jnp.dot(sel3_ref[k], h2, preferred_element_type=jnp.float32)
        acc3 = acc3 + jnp.dot(g.astype(jnp.bfloat16), w3_ref[k],
                              preferred_element_type=jnp.float32)
    h3 = jnp.maximum(acc3, 0.0).astype(jnp.bfloat16)             # (16, 128)

    # fc1 (a 2x2x2 conv): same per-tap accumulation.
    accf = jnp.zeros((self1_ref.shape[1], wf1_ref.shape[2]), jnp.float32)
    for k in range(self1_ref.shape[0]):
        g = jnp.dot(self1_ref[k], h3, preferred_element_type=jnp.float32)
        accf = accf + jnp.dot(g.astype(jnp.bfloat16), wf1_ref[k],
                              preferred_element_type=jnp.float32)
    hf1 = jnp.maximum(accf, 0.0).astype(jnp.bfloat16)            # (N, 256)

    # fc2 (1x1x1 conv) + ReLU; lane-dense (128-wide) f32 store.
    out = jnp.dot(hf1, wf2_ref[...], preferred_element_type=jnp.float32)
    o_ref[...] = jnp.maximum(out, 0.0)                           # (N, 128)


def fused_tail(xcol2, w2, sel3, w3, self1, wf1, wf2, n_batch):
    def full(shape):
        nd = len(shape)
        return pl.BlockSpec(shape, lambda i, nd=nd: (0,) * nd)
    return pl.pallas_call(
        _tail_kernel,
        out_shape=jax.ShapeDtypeStruct((n_batch, 128), jnp.float32),
        grid=(1,),
        in_specs=[full(xcol2.shape), full(w2.shape), full(sel3.shape),
                  full(w3.shape), full(self1.shape), full(wf1.shape),
                  full(wf2.shape)],
        out_specs=full((n_batch, 128)),
    )(xcol2, w2, sel3, w3, self1, wf1, wf2)


# ------------------------------- layer glue --------------------------------

def _im2col(x, kd, kh, kw, pad_k=0):
    """x: (N, D, H, W, C) channels-last -> (N*Do*Ho*Wo, kd*kh*kw*C + pad_k)."""
    n, d, h, w, c = x.shape
    do, ho, wo = d - kd + 1, h - kh + 1, w - kw + 1
    cols = []
    for dz in range(kd):
        for dy in range(kh):
            for dx in range(kw):
                cols.append(x[:, dz:dz + do, dy:dy + ho, dx:dx + wo, :])
    if pad_k:
        cols.append(jnp.zeros((n, do, ho, wo, pad_k), x.dtype))
    xc = jnp.concatenate(cols, axis=-1)
    return xc.reshape(n * do * ho * wo, kd * kh * kw * c + pad_k)


def _weight_stack(w, cin_pad, cout_pad):
    """(Cout, Cin, kd, kh, kw) -> (kd*kh*kw, cin_pad, cout_pad) bf16, 0-padded."""
    cout, cin, kd, kh, kw = w.shape
    wt = jnp.transpose(w, (2, 3, 4, 1, 0)).reshape(kd * kh * kw, cin, cout)
    wt = jnp.pad(wt, ((0, 0), (0, cin_pad - cin), (0, cout_pad - cout)))
    return wt.astype(jnp.bfloat16)


def _conv1_weight_matrix(w, k_pad, cout_pad):
    """(Cout, Cin, kd, kh, kw) -> (k_pad, cout_pad) bf16, flattened K padded."""
    cout, cin, kd, kh, kw = w.shape
    k = kd * kh * kw * cin
    wt = jnp.transpose(w, (2, 3, 4, 1, 0)).reshape(k, cout)
    wt = jnp.pad(wt, ((0, k_pad - k), (0, cout_pad - cout)))
    return wt.astype(jnp.bfloat16)


def _gather_matrices(n, d, h, w, kd, kh, kw):
    """Per-tap 0/1 row-selection matrices: out rows (n,do,ho,wo) <- in rows
    (n,d,h,w), tap-major (dz,dy,dx). Compile-time constants."""
    do, ho, wo = d - kd + 1, h - kh + 1, w - kw + 1
    m = np.zeros((kd * kh * kw, n * do * ho * wo, n * d * h * w), np.float32)
    for dz in range(kd):
        for dy in range(kh):
            for dx in range(kw):
                k = (dz * kh + dy) * kw + dx
                for b in range(n):
                    for od in range(do):
                        for oh in range(ho):
                            for ow in range(wo):
                                r_out = ((b * do + od) * ho + oh) * wo + ow
                                r_in = ((b * d + od + dz) * h + oh + dy) * w \
                                    + ow + dx
                                m[k, r_out, r_in] = 1.0
    return jnp.asarray(m, jnp.bfloat16)


# ------------------------------ model setup --------------------------------

def init_params(key):
    shapes = {
        "conv1": (64, 1, 3, 5, 5),
        "conv2": (64, 64, 3, 3, 3),
        "conv3": (64, 64, 1, 3, 3),
        "fc1":   (150, 64, 2, 2, 2),
        "fc2":   (2, 150, 1, 1, 1),
    }
    params = {}
    for i, (name, shp) in enumerate(shapes.items()):
        k = jax.random.fold_in(key, i)
        fan_in = shp[1] * shp[2] * shp[3] * shp[4]
        params[name] = (jax.random.normal(k, shp, jnp.float32)
                        * np.sqrt(2.0 / fan_in)).astype(jnp.float32)
    return params


@jax.jit
def cnn_forward(x_ncdhw, params):
    # NCDHW (torch) -> NDHWC channels-last, bf16 MXU feeds (f32 accumulate).
    x = jnp.transpose(x_ncdhw, (0, 2, 3, 4, 1)).astype(jnp.bfloat16)
    N, D, H, W, _ = x.shape

    # ---- conv1 + ReLU: im2col GEMM, 2 parallel MXU blocks -----------------
    d1, h1, w1 = D - 2, H - 4, W - 4                   # (8, 12, 12)
    xcol1 = _im2col(x, 3, 5, 5, pad_k=128 - 75)        # (2304, 128) bf16
    wm1 = _conv1_weight_matrix(params["conv1"], 128, 128)
    a1 = conv1_gemm_relu(xcol1, wm1, blocks=2)         # (2304, 128) bf16

    # ---- 2x2x2/2 max-pool: tiny, plain-XLA reshape + max -------------------
    a1 = a1.reshape(N, d1, h1, w1, 128)
    dp, hp, wp = d1 // 2, h1 // 2, w1 // 2             # (4, 6, 6)
    pooled = a1.reshape(N, dp, 2, hp, 2, wp, 2, 128).max(axis=(2, 4, 6))

    # ---- fused tail: conv2 -> conv3 -> fc1 -> fc2 in ONE kernel ------------
    d2, h2, w2d = dp - 2, hp - 2, wp - 2               # (2, 4, 4)
    xcol2 = _im2col(pooled, 3, 3, 3)                   # (64, 3456) bf16
    wm2 = _weight_stack(params["conv2"], 128, 128).reshape(27 * 128, 128)
    sel3 = _gather_matrices(N, d2, h2, w2d, 1, 3, 3)   # (9, 16, 64)
    wm3 = _weight_stack(params["conv3"], 128, 128)     # (9, 128, 128)
    d3, h3, w3d = d2, h2 - 2, w2d - 2                  # (2, 2, 2)
    self1 = _gather_matrices(N, d3, h3, w3d, 2, 2, 2)  # (8, N, 16)
    wmf1 = _weight_stack(params["fc1"], 128, 256)      # (8, 128, 256)
    wmf2 = _weight_stack(params["fc2"], 256, 128).reshape(256, 128)
    out = fused_tail(xcol2, wm2, sel3, wm3, self1, wmf1, wmf2, N)  # (N, 128)

    # back to torch NCDHW: (N, 2, 1, 1, 1); padded channels are exact zeros.
    return out[:, :2].reshape(N, 2, 1, 1, 1)
# TODO(synk): the torch forward's print() shape logging is a side effect only
# and is intentionally omitted.


@jax.jit
def ref_forward(x, params):
    """Matched-precision reference (bf16 operands, f32 accumulation) so the
    check isolates kernel-implementation error from the bf16 MXU choice."""
    def conv(h, w):
        out = lax.conv_general_dilated(
            h.astype(jnp.bfloat16), w.astype(jnp.bfloat16),
            window_strides=(1, 1, 1), padding="VALID",
            dimension_numbers=("NCDHW", "OIDHW", "NCDHW"),
            preferred_element_type=jnp.float32)
        return jax.nn.relu(out)

    h = conv(x, params["conv1"]).astype(jnp.bfloat16)
    h = lax.reduce_window(h, jnp.array(-jnp.inf, h.dtype), lax.max,
                          (1, 1, 2, 2, 2), (1, 1, 2, 2, 2), "VALID")
    h = conv(h, params["conv2"]).astype(jnp.bfloat16)
    h = conv(h, params["conv3"]).astype(jnp.bfloat16)
    h = conv(h, params["fc1"]).astype(jnp.bfloat16)
    h = conv(h, params["fc2"])
    return h


if __name__ == "__main__":
    key = jax.random.PRNGKey(0)
    kx, kp = jax.random.split(key)
    # NCDHW input (matches nn.Conv3d): batch=2, C=1, D=10, H=16, W=16 —
    # smallest spatial size that survives all the VALID convs and the pool.
    x = jax.random.normal(kx, (2, 1, 10, 16, 16), jnp.float32)
    params = init_params(kp)

    out = jax.block_until_ready(cnn_forward(x, params))
    assert out.shape == (2, 2, 1, 1, 1), out.shape

    ref = jax.block_until_ready(ref_forward(x, params))
    np.testing.assert_allclose(np.asarray(out), np.asarray(ref),
                               rtol=1e-2, atol=1e-2)
    print("KERNEL_OK")
</pallas_src>

<mosaic_0001>
module attributes {stable_mosaic.version = 11 : i64} {
  func.func @_matmul_relu_kernel(%arg0: i32, %arg1: memref<1152x128xbf16, #tpu.memory_space<vmem>>, %arg2: memref<128x128xbf16, #tpu.memory_space<vmem>>, %arg3: memref<1152x128xbf16, #tpu.memory_space<vmem>>) attributes {dimension_semantics = [#tpu.dimension_semantics<parallel>], iteration_bounds = array<i64: 2>, scalar_prefetch = 0 : i64, scratch_operands = 0 : i64, tpu.core_type = #tpu.core_type<tc>, window_params = [{transform_indices = @transform_0, window_bounds = array<i64: 1152, 128>}, {pipeline_mode = #tpu.pipeline_mode<synchronous>, transform_indices = @transform_1, window_bounds = array<i64: 128, 128>}, {transform_indices = @transform_2, window_bounds = array<i64: 1152, 128>}]} {
    %c0 = arith.constant 0 : index
    %c0_0 = arith.constant 0 : index
    %0 = vector.load %arg1[%c0, %c0_0] : memref<1152x128xbf16, #tpu.memory_space<vmem>>, vector<1152x128xbf16>
    %c0_1 = arith.constant 0 : index
    %c0_2 = arith.constant 0 : index
    %1 = vector.load %arg2[%c0_1, %c0_2] : memref<128x128xbf16, #tpu.memory_space<vmem>>, vector<128x128xbf16>
    %cst = arith.constant dense<0.000000e+00> : vector<1152x128xf32>
    %2 = tpu.matmul %0, %1, %cst {dimension_numbers = #tpu.dot_dimension_numbers<[1], [0], [0], [1], [0, 0, 1, 1], [], []>} : vector<1152x128xbf16>, vector<128x128xbf16>, vector<1152x128xf32> -> vector<1152x128xf32>
    %cst_3 = arith.constant 0.000000e+00 : f32
    %3 = vector.broadcast %cst_3 : f32 to vector<1152x128xf32>
    %4 = arith.maximumf %2, %3 : vector<1152x128xf32>
    %5 = arith.truncf %4 : vector<1152x128xf32> to vector<1152x128xbf16>
    %c0_4 = arith.constant 0 : index
    %c0_5 = arith.constant 0 : index
    %6 = vector.load %arg3[%c0_4, %c0_5] : memref<1152x128xbf16, #tpu.memory_space<vmem>>, vector<1152x128xbf16>
    tpu.vector_store %arg3[%c0_4, %c0_5], %5 {strides = array<i32>} : memref<1152x128xbf16, #tpu.memory_space<vmem>>, vector<1152x128xbf16>,
    return
  }
  func.func @transform_0(%arg0: i32) -> (i32, i32) {
    %c0_i32 = arith.constant 0 : i32
    %c0_i32_0 = arith.constant 0 : i32
    return %arg0, %c0_i32 : i32, i32
  }
  func.func @transform_1(%arg0: i32) -> (i32, i32) {
    %c0_i32 = arith.constant 0 : i32
    %c0_i32_0 = arith.constant 0 : i32
    %c0_i32_1 = arith.constant 0 : i32
    return %c0_i32, %c0_i32_0 : i32, i32
  }
  func.func @transform_2(%arg0: i32) -> (i32, i32) {
    %c0_i32 = arith.constant 0 : i32
    %c0_i32_0 = arith.constant 0 : i32
    return %arg0, %c0_i32 : i32, i32
  }
}

module attributes {stable_mosaic.version = 11 : i64} {
  func.func @_tail_kernel(%arg0: i32, %arg1: memref<64x3456xbf16, #tpu.memory_space<vmem>>, %arg2: memref<3456x128xbf16, #tpu.memory_space<vmem>>, %arg3: memref<9x16x64xbf16, #tpu.memory_space<vmem>>, %arg4: memref<9x128x128xbf16, #tpu.memory_space<vmem>>, %arg5: memref<8x2x16xbf16, #tpu.memory_space<vmem>>, %arg6: memref<8x128x256xbf16, #tpu.memory_space<vmem>>, %arg7: memref<256x128xbf16, #tpu.memory_space<vmem>>, %arg8: memref<2x128xf32, #tpu.memory_space<vmem>>) attributes {dimension_semantics = [#tpu.dimension_semantics<arbitrary>], iteration_bounds = array<i64: 1>, scalar_prefetch = 0 : i64, scratch_operands = 0 : i64, tpu.core_type = #tpu.core_type<tc>, window_params = [{pipeline_mode = #tpu.pipeline_mode<synchronous>, transform_indices = @transform_0, window_bounds = array<i64: 64, 3456>}, {pipeline_mode = #tpu.pipeline_mode<synchronous>, transform_indices = @transform_1, window_bounds = array<i64: 3456, 128>}, {pipeline_mode = #tpu.pipeline_mode<synchronous>, transform_indices = @transform_2, window_bounds = array<i64: 9, 16, 64>}, {pipeline_mode = #tpu.pipeline_mode<synchronous>, transform_indices = @transform_3, window_bounds = array<i64: 9, 128, 128>}, {pipeline_mode = #tpu.pipeline_mode<synchronous>, transform_indices = @transform_4, window_bounds = array<i64: 8, 2, 16>}, {pipeline_mode = #tpu.pipeline_mode<synchronous>, transform_indices = @transform_5, window_bounds = array<i64: 8, 128, 256>}, {pipeline_mode = #tpu.pipeline_mode<synchronous>, transform_indices = @transform_6, window_bounds = array<i64: 256, 128>}, {pipeline_mode = #tpu.pipeline_mode<synchronous>, transform_indices = @transform_7, window_bounds = array<i64: 2, 128>}]} {
    %c0 = arith.constant 0 : index
    %c0_0 = arith.constant 0 : index
    %0 = vector.load %arg1[%c0, %c0_0] : memref<64x3456xbf16, #tpu.memory_space<vmem>>, vector<64x3456xbf16>
    %c0_1 = arith.constant 0 : index
    %c0_2 = arith.constant 0 : index
    %1 = vector.load %arg2[%c0_1, %c0_2] : memref<3456x128xbf16, #tpu.memory_space<vmem>>, vector<3456x128xbf16>
    %cst = arith.constant dense<0.000000e+00> : vector<64x128xf32>
    %2 = tpu.matmul %0, %1, %cst {dimension_numbers = #tpu.dot_dimension_numbers<[1], [0], [0], [1], [0, 0, 1, 1], [], []>} : vector<64x3456xbf16>, vector<3456x128xbf16>, vector<64x128xf32> -> vector<64x128xf32>
    %cst_3 = arith.constant 0.000000e+00 : f32
    %3 = vector.broadcast %cst_3 : f32 to vector<64x128xf32>
    %4 = arith.maximumf %2, %3 : vector<64x128xf32>
    %5 = arith.truncf %4 : vector<64x128xf32> to vector<64x128xbf16>
    %cst_4 = arith.constant 0.000000e+00 : f32
    %6 = vector.broadcast %cst_4 : f32 to vector<16x128xf32>
    %c0_5 = arith.constant 0 : index
    %c0_6 = arith.constant 0 : index
    %c0_7 = arith.constant 0 : index
    %7 = vector.load %arg3[%c0_5, %c0_6, %c0_7] : memref<9x16x64xbf16, #tpu.memory_space<vmem>>, vector<1x16x64xbf16>
    %8 = vector.shape_cast %7 : vector<1x16x64xbf16> to vector<16x64xbf16>
    %cst_8 = arith.constant dense<0.000000e+00> : vector<16x128xf32>
    %9 = tpu.matmul %8, %5, %cst_8 {dimension_numbers = #tpu.dot_dimension_numbers<[1], [0], [0], [1], [0, 0, 1, 1], [], []>} : vector<16x64xbf16>, vector<64x128xbf16>, vector<16x128xf32> -> vector<16x128xf32>
    %10 = arith.truncf %9 : vector<16x128xf32> to vector<16x128xbf16>
    %c0_9 = arith.constant 0 : index
    %c0_10 = arith.constant 0 : index
    %c0_11 = arith.constant 0 : index
    %11 = vector.load %arg4[%c0_9, %c0_10, %c0_11] : memref<9x128x128xbf16, #tpu.memory_space<vmem>>, vector<1x128x128xbf16>
    %12 = vector.shape_cast %11 : vector<1x128x128xbf16> to vector<128x128xbf16>
    %cst_12 = arith.constant dense<0.000000e+00> : vector<16x128xf32>
    %13 = tpu.matmul %10, %12, %cst_12 {dimension_numbers = #tpu.dot_dimension_numbers<[1], [0], [0], [1], [0, 0, 1, 1], [], []>} : vector<16x128xbf16>, vector<128x128xbf16>, vector<16x128xf32> -> vector<16x128xf32>
    %14 = arith.addf %6, %13 : vector<16x128xf32>
    %c1 = arith.constant 1 : index
    %c0_13 = arith.constant 0 : index
    %c0_14 = arith.constant 0 : index
    %15 = vector.load %arg3[%c1, %c0_13, %c0_14] : memref<9x16x64xbf16, #tpu.memory_space<vmem>>, vector<1x16x64xbf16>
    %16 = vector.shape_cast %15 : vector<1x16x64xbf16> to vector<16x64xbf16>
    %cst_15 = arith.constant dense<0.000000e+00> : vector<16x128xf32>
    %17 = tpu.matmul %16, %5, %cst_15 {dimension_numbers = #tpu.dot_dimension_numbers<[1], [0], [0], [1], [0, 0, 1, 1], [], []>} : vector<16x64xbf16>, vector<64x128xbf16>, vector<16x128xf32> -> vector<16x128xf32>
    %18 = arith.truncf %17 : vector<16x128xf32> to vector<16x128xbf16>
    %c1_16 = arith.constant 1 : index
    %c0_17 = arith.constant 0 : index
    %c0_18 = arith.constant 0 : index
    %19 = vector.load %arg4[%c1_16, %c0_17, %c0_18] : memref<9x128x128xbf16, #tpu.memory_space<vmem>>, vector<1x128x128xbf16>
    %20 = vector.shape_cast %19 : vector<1x128x128xbf16> to vector<128x128xbf16>
    %cst_19 = arith.constant dense<0.000000e+00> : vector<16x128xf32>
    %21 = tpu.matmul %18, %20, %cst_19 {dimension_numbers = #tpu.dot_dimension_numbers<[1], [0], [0], [1], [0, 0, 1, 1], [], []>} : vector<16x128xbf16>, vector<128x128xbf16>, vector<16x128xf32> -> vector<16x128xf32>
    %22 = arith.addf %14, %21 : vector<16x128xf32>
    %c2 = arith.constant 2 : index
    %c0_20 = arith.constant 0 : index
    %c0_21 = arith.constant 0 : index
    %23 = vector.load %arg3[%c2, %c0_20, %c0_21] : memref<9x16x64xbf16, #tpu.memory_space<vmem>>, vector<1x16x64xbf16>
    %24 = vector.shape_cast %23 : vector<1x16x64xbf16> to vector<16x64xbf16>
    %cst_22 = arith.constant dense<0.000000e+00> : vector<16x128xf32>
    %25 = tpu.matmul %24, %5, %cst_22 {dimension_numbers = #tpu.dot_dimension_numbers<[1], [0], [0], [1], [0, 0, 1, 1], [], []>} : vector<16x64xbf16>, vector<64x128xbf16>, vector<16x128xf32> -> vector<16x128xf32>
    %26 = arith.truncf %25 : vector<16x128xf32> to vector<16x128xbf16>
    %c2_23 = arith.constant 2 : index
    %c0_24 = arith.constant 0 : index
    %c0_25 = arith.constant 0 : index
    %27 = vector.load %arg4[%c2_23, %c0_24, %c0_25] : memref<9x128x128xbf16, #tpu.memory_space<vmem>>, vector<1x128x128xbf16>
    %28 = vector.shape_cast %27 : vector<1x128x128xbf16> to vector<128x128xbf16>
    %cst_26 = arith.constant dense<0.000000e+00> : vector<16x128xf32>
    %29 = tpu.matmul %26, %28, %cst_26 {dimension_numbers = #tpu.dot_dimension_numbers<[1], [0], [0], [1], [0, 0, 1, 1], [], []>} : vector<16x128xbf16>, vector<128x128xbf16>, vector<16x128xf32> -> vector<16x128xf32>
    %30 = arith.addf %22, %29 : vector<16x128xf32>
    %c3 = arith.constant 3 : index
    %c0_27 = arith.constant 0 : index
    %c0_28 = arith.constant 0 : index
    %31 = vector.load %arg3[%c3, %c0_27, %c0_28] : memref<9x16x64xbf16, #tpu.memory_space<vmem>>, vector<1x16x64xbf16>
    %32 = vector.shape_cast %31 : vector<1x16x64xbf16> to vector<16x64xbf16>
    %cst_29 = arith.constant dense<0.000000e+00> : vector<16x128xf32>
    %33 = tpu.matmul %32, %5, %cst_29 {dimension_numbers = #tpu.dot_dimension_numbers<[1], [0], [0], [1], [0, 0, 1, 1], [], []>} : vector<16x64xbf16>, vector<64x128xbf16>, vector<16x128xf32> -> vector<16x128xf32>
    %34 = arith.truncf %33 : vector<16x128xf32> to vector<16x128xbf16>
    %c3_30 = arith.constant 3 : index
    %c0_31 = arith.constant 0 : index
    %c0_32 = arith.constant 0 : index
    %35 = vector.load %arg4[%c3_30, %c0_31, %c0_32] : memref<9x128x128xbf16, #tpu.memory_space<vmem>>, vector<1x128x128xbf16>
    %36 = vector.shape_cast %35 : vector<1x128x128xbf16> to vector<128x128xbf16>
    %cst_33 = arith.constant dense<0.000000e+00> : vector<16x128xf32>
    %37 = tpu.matmul %34, %36, %cst_33 {dimension_numbers = #tpu.dot_dimension_numbers<[1], [0], [0], [1], [0, 0, 1, 1], [], []>} : vector<16x128xbf16>, vector<128x128xbf16>, vector<16x128xf32> -> vector<16x128xf32>
    %38 = arith.addf %30, %37 : vector<16x128xf32>
    %c4 = arith.constant 4 : index
    %c0_34 = arith.constant 0 : index
    %c0_35 = arith.constant 0 : index
    %39 = vector.load %arg3[%c4, %c0_34, %c0_35] : memref<9x16x64xbf16, #tpu.memory_space<vmem>>, vector<1x16x64xbf16>
    %40 = vector.shape_cast %39 : vector<1x16x64xbf16> to vector<16x64xbf16>
    %cst_36 = arith.constant dense<0.000000e+00> : vector<16x128xf32>
    %41 = tpu.matmul %40, %5, %cst_36 {dimension_numbers = #tpu.dot_dimension_numbers<[1], [0], [0], [1], [0, 0, 1, 1], [], []>} : vector<16x64xbf16>, vector<64x128xbf16>, vector<16x128xf32> -> vector<16x128xf32>
    %42 = arith.truncf %41 : vector<16x128xf32> to vector<16x128xbf16>
    %c4_37 = arith.constant 4 : index
    %c0_38 = arith.constant 0 : index
    %c0_39 = arith.constant 0 : index
    %43 = vector.load %arg4[%c4_37, %c0_38, %c0_39] : memref<9x128x128xbf16, #tpu.memory_space<vmem>>, vector<1x128x128xbf16>
    %44 = vector.shape_cast %43 : vector<1x128x128xbf16> to vector<128x128xbf16>
    %cst_40 = arith.constant dense<0.000000e+00> : vector<16x128xf32>
    %45 = tpu.matmul %42, %44, %cst_40 {dimension_numbers = #tpu.dot_dimension_numbers<[1], [0], [0], [1], [0, 0, 1, 1], [], []>} : vector<16x128xbf16>, vector<128x128xbf16>, vector<16x128xf32> -> vector<16x128xf32>
    %46 = arith.addf %38, %45 : vector<16x128xf32>
    %c5 = arith.constant 5 : index
    %c0_41 = arith.constant 0 : index
    %c0_42 = arith.constant 0 : index
    %47 = vector.load %arg3[%c5, %c0_41, %c0_42] : memref<9x16x64xbf16, #tpu.memory_space<vmem>>, vector<1x16x64xbf16>
    %48 = vector.shape_cast %47 : vector<1x16x64xbf16> to vector<16x64xbf16>
    %cst_43 = arith.constant dense<0.000000e+00> : vector<16x128xf32>
    %49 = tpu.matmul %48, %5, %cst_43 {dimension_numbers = #tpu.dot_dimension_numbers<[1], [0], [0], [1], [0, 0, 1, 1], [], []>} : vector<16x64xbf16>, vector<64x128xbf16>, vector<16x128xf32> -> vector<16x128xf32>
    %50 = arith.truncf %49 : vector<16x128xf32> to vector<16x128xbf16>
    %c5_44 = arith.constant 5 : index
    %c0_45 = arith.constant 0 : index
    %c0_46 = arith.constant 0 : index
    %51 = vector.load %arg4[%c5_44, %c0_45, %c0_46] : memref<9x128x128xbf16, #tpu.memory_space<vmem>>, vector<1x128x128xbf16>
    %52 = vector.shape_cast %51 : vector<1x128x128xbf16> to vector<128x128xbf16>
    %cst_47 = arith.constant dense<0.000000e+00> : vector<16x128xf32>
    %53 = tpu.matmul %50, %52, %cst_47 {dimension_numbers = #tpu.dot_dimension_numbers<[1], [0], [0], [1], [0, 0, 1, 1], [], []>} : vector<16x128xbf16>, vector<128x128xbf16>, vector<16x128xf32> -> vector<16x128xf32>
    %54 = arith.addf %46, %53 : vector<16x128xf32>
    %c6 = arith.constant 6 : index
    %c0_48 = arith.constant 0 : index
    %c0_49 = arith.constant 0 : index
    %55 = vector.load %arg3[%c6, %c0_48, %c0_49] : memref<9x16x64xbf16, #tpu.memory_space<vmem>>, vector<1x16x64xbf16>
    %56 = vector.shape_cast %55 : vector<1x16x64xbf16> to vector<16x64xbf16>
    %cst_50 = arith.constant dense<0.000000e+00> : vector<16x128xf32>
    %57 = tpu.matmul %56, %5, %cst_50 {dimension_numbers = #tpu.dot_dimension_numbers<[1], [0], [0], [1], [0, 0, 1, 1], [], []>} : vector<16x64xbf16>, vector<64x128xbf16>, vector<16x128xf32> -> vector<16x128xf32>
    %58 = arith.truncf %57 : vector<16x128xf32> to vector<16x128xbf16>
    %c6_51 = arith.constant 6 : index
    %c0_52 = arith.constant 0 : index
    %c0_53 = arith.constant 0 : index
    %59 = vector.load %arg4[%c6_51, %c0_52, %c0_53] : memref<9x128x128xbf16, #tpu.memory_space<vmem>>, vector<1x128x128xbf16>
    %60 = vector.shape_cast %59 : vector<1x128x128xbf16> to vector<128x128xbf16>
    %cst_54 = arith.constant dense<0.000000e+00> : vector<16x128xf32>
    %61 = tpu.matmul %58, %60, %cst_54 {dimension_numbers = #tpu.dot_dimension_numbers<[1], [0], [0], [1], [0, 0, 1, 1], [], []>} : vector<16x128xbf16>, vector<128x128xbf16>, vector<16x128xf32> -> vector<16x128xf32>
    %62 = arith.addf %54, %61 : vector<16x128xf32>
    %c7 = arith.constant 7 : index
    %c0_55 = arith.constant 0 : index
    %c0_56 = arith.constant 0 : index
    %63 = vector.load %arg3[%c7, %c0_55, %c0_56] : memref<9x16x64xbf16, #tpu.memory_space<vmem>>, vector<1x16x64xbf16>
    %64 = vector.shape_cast %63 : vector<1x16x64xbf16> to vector<16x64xbf16>
    %cst_57 = arith.constant dense<0.000000e+00> : vector<16x128xf32>
    %65 = tpu.matmul %64, %5, %cst_57 {dimension_numbers = #tpu.dot_dimension_numbers<[1], [0], [0], [1], [0, 0, 1, 1], [], []>} : vector<16x64xbf16>, vector<64x128xbf16>, vector<16x128xf32> -> vector<16x128xf32>
    %66 = arith.truncf %65 : vector<16x128xf32> to vector<16x128xbf16>
    %c7_58 = arith.constant 7 : index
    %c0_59 = arith.constant 0 : index
    %c0_60 = arith.constant 0 : index
    %67 = vector.load %arg4[%c7_58, %c0_59, %c0_60] : memref<9x128x128xbf16, #tpu.memory_space<vmem>>, vector<1x128x128xbf16>
    %68 = vector.shape_cast %67 : vector<1x128x128xbf16> to vector<128x128xbf16>
    %cst_61 = arith.constant dense<0.000000e+00> : vector<16x128xf32>
    %69 = tpu.matmul %66, %68, %cst_61 {dimension_numbers = #tpu.dot_dimension_numbers<[1], [0], [0], [1], [0, 0, 1, 1], [], []>} : vector<16x128xbf16>, vector<128x128xbf16>, vector<16x128xf32> -> vector<16x128xf32>
    %70 = arith.addf %62, %69 : vector<16x128xf32>
    %c8 = arith.constant 8 : index
    %c0_62 = arith.constant 0 : index
    %c0_63 = arith.constant 0 : index
    %71 = vector.load %arg3[%c8, %c0_62, %c0_63] : memref<9x16x64xbf16, #tpu.memory_space<vmem>>, vector<1x16x64xbf16>
    %72 = vector.shape_cast %71 : vector<1x16x64xbf16> to vector<16x64xbf16>
    %cst_64 = arith.constant dense<0.000000e+00> : vector<16x128xf32>
    %73 = tpu.matmul %72, %5, %cst_64 {dimension_numbers = #tpu.dot_dimension_numbers<[1], [0], [0], [1], [0, 0, 1, 1], [], []>} : vector<16x64xbf16>, vector<64x128xbf16>, vector<16x128xf32> -> vector<16x128xf32>
    %74 = arith.truncf %73 : vector<16x128xf32> to vector<16x128xbf16>
    %c8_65 = arith.constant 8 : index
    %c0_66 = arith.constant 0 : index
    %c0_67 = arith.constant 0 : index
    %75 = vector.load %arg4[%c8_65, %c0_66, %c0_67] : memref<9x128x128xbf16, #tpu.memory_space<vmem>>, vector<1x128x128xbf16>
    %76 = vector.shape_cast %75 : vector<1x128x128xbf16> to vector<128x128xbf16>
    %cst_68 = arith.constant dense<0.000000e+00> : vector<16x128xf32>
    %77 = tpu.matmul %74, %76, %cst_68 {dimension_numbers = #tpu.dot_dimension_numbers<[1], [0], [0], [1], [0, 0, 1, 1], [], []>} : vector<16x128xbf16>, vector<128x128xbf16>, vector<16x128xf32> -> vector<16x128xf32>
    %78 = arith.addf %70, %77 : vector<16x128xf32>
    %cst_69 = arith.constant 0.000000e+00 : f32
    %79 = vector.broadcast %cst_69 : f32 to vector<16x128xf32>
    %80 = arith.maximumf %78, %79 : vector<16x128xf32>
    %81 = arith.truncf %80 : vector<16x128xf32> to vector<16x128xbf16>
    %cst_70 = arith.constant 0.000000e+00 : f32
    %82 = vector.broadcast %cst_70 : f32 to vector<2x256xf32>
    %c0_71 = arith.constant 0 : index
    %c0_72 = arith.constant 0 : index
    %c0_73 = arith.constant 0 : index
    %83 = vector.load %arg5[%c0_71, %c0_72, %c0_73] : memref<8x2x16xbf16, #tpu.memory_space<vmem>>, vector<1x2x16xbf16>
    %84 = vector.shape_cast %83 : vector<1x2x16xbf16> to vector<2x16xbf16>
    %cst_74 = arith.constant dense<0.000000e+00> : vector<2x128xf32>
    %85 = tpu.matmul %84, %81, %cst_74 {dimension_numbers = #tpu.dot_dimension_numbers<[1], [0], [0], [1], [0, 0, 1, 1], [], []>} : vector<2x16xbf16>, vector<16x128xbf16>, vector<2x128xf32> -> vector<2x128xf32>
    %86 = arith.truncf %85 : vector<2x128xf32> to vector<2x128xbf16>
    %c0_75 = arith.constant 0 : index
    %c0_76 = arith.constant 0 : index
    %c0_77 = arith.constant 0 : index
    %87 = vector.load %arg6[%c0_75, %c0_76, %c0_77] : memref<8x128x256xbf16, #tpu.memory_space<vmem>>, vector<1x128x256xbf16>
    %88 = vector.shape_cast %87 : vector<1x128x256xbf16> to vector<128x256xbf16>
    %cst_78 = arith.constant dense<0.000000e+00> : vector<2x256xf32>
    %89 = tpu.matmul %86, %88, %cst_78 {dimension_numbers = #tpu.dot_dimension_numbers<[1], [0], [0], [1], [0, 0, 1, 1], [], []>} : vector<2x128xbf16>, vector<128x256xbf16>, vector<2x256xf32> -> vector<2x256xf32>
    %90 = arith.addf %82, %89 : vector<2x256xf32>
    %c1_79 = arith.constant 1 : index
    %c0_80 = arith.constant 0 : index
    %c0_81 = arith.constant 0 : index
    %91 = vector.load %arg5[%c1_79, %c0_80, %c0_81] : memref<8x2x16xbf16, #tpu.memory_space<vmem>>, vector<1x2x16xbf16>
    %92 = vector.shape_cast %91 : vector<1x2x16xbf16> to vector<2x16xbf16>
    %cst_82 = arith.constant dense<0.000000e+00> : vector<2x128xf32>
    %93 = tpu.matmul %92, %81, %cst_82 {dimension_numbers = #tpu.dot_dimension_numbers<[1], [0], [0], [1], [0, 0, 1, 1], [], []>} : vector<2x16xbf16>, vector<16x128xbf16>, vector<2x128xf32> -> vector<2x128xf32>
    %94 = arith.truncf %93 : vector<2x128xf32> to vector<2x128xbf16>
    %c1_83 = arith.constant 1 : index
    %c0_84 = arith.constant 0 : index
    %c0_85 = arith.constant 0 : index
    %95 = vector.load %arg6[%c1_83, %c0_84, %c0_85] : memref<8x128x256xbf16, #tpu.memory_space<vmem>>, vector<1x128x256xbf16>
    %96 = vector.shape_cast %95 : vector<1x128x256xbf16> to vector<128x256xbf16>
    %cst_86 = arith.constant dense<0.000000e+00> : vector<2x256xf32>
    %97 = tpu.matmul %94, %96, %cst_86 {dimension_numbers = #tpu.dot_dimension_numbers<[1], [0], [0], [1], [0, 0, 1, 1], [], []>} : vector<2x128xbf16>, vector<128x256xbf16>, vector<2x256xf32> -> vector<2x256xf32>
    %98 = arith.addf %90, %97 : vector<2x256xf32>
    %c2_87 = arith.constant 2 : index
    %c0_88 = arith.constant 0 : index
    %c0_89 = arith.constant 0 : index
    %99 = vector.load %arg5[%c2_87, %c0_88, %c0_89] : memref<8x2x16xbf16, #tpu.memory_space<vmem>>, vector<1x2x16xbf16>
    %100 = vector.shape_cast %99 : vector<1x2x16xbf16> to vector<2x16xbf16>
    %cst_90 = arith.constant dense<0.000000e+00> : vector<2x128xf32>
    %101 = tpu.matmul %100, %81, %cst_90 {dimension_numbers = #tpu.dot_dimension_numbers<[1], [0], [0], [1], [0, 0, 1, 1], [], []>} : vector<2x16xbf16>, vector<16x128xbf16>, vector<2x128xf32> -> vector<2x128xf32>
    %102 = arith.truncf %101 : vector<2x128xf32> to vector<2x128xbf16>
    %c2_91 = arith.constant 2 : index
    %c0_92 = arith.constant 0 : index
    %c0_93 = arith.constant 0 : index
    %103 = vector.load %arg6[%c2_91, %c0_92, %c0_93] : memref<8x128x256xbf16, #tpu.memory_space<vmem>>, vector<1x128x256xbf16>
    %104 = vector.shape_cast %103 : vector<1x128x256xbf16> to vector<128x256xbf16>
    %cst_94 = arith.constant dense<0.000000e+00> : vector<2x256xf32>
    %105 = tpu.matmul %102, %104, %cst_94 {dimension_numbers = #tpu.dot_dimension_numbers<[1], [0], [0], [1], [0, 0, 1, 1], [], []>} : vector<2x128xbf16>, vector<128x256xbf16>, vector<2x256xf32> -> vector<2x256xf32>
    %106 = arith.addf %98, %105 : vector<2x256xf32>
    %c3_95 = arith.constant 3 : index
    %c0_96 = arith.constant 0 : index
    %c0_97 = arith.constant 0 : index
    %107 = vector.load %arg5[%c3_95, %c0_96, %c0_97] : memref<8x2x16xbf16, #tpu.memory_space<vmem>>, vector<1x2x16xbf16>
    %108 = vector.shape_cast %107 : vector<1x2x16xbf16> to vector<2x16xbf16>
    %cst_98 = arith.constant dense<0.000000e+00> : vector<2x128xf32>
    %109 = tpu.matmul %108, %81, %cst_98 {dimension_numbers = #tpu.dot_dimension_numbers<[1], [0], [0], [1], [0, 0, 1, 1], [], []>} : vector<2x16xbf16>, vector<16x128xbf16>, vector<2x128xf32> -> vector<2x128xf32>
    %110 = arith.truncf %109 : vector<2x128xf32> to vector<2x128xbf16>
    %c3_99 = arith.constant 3 : index
    %c0_100 = arith.constant 0 : index
    %c0_101 = arith.constant 0 : index
    %111 = vector.load %arg6[%c3_99, %c0_100, %c0_101] : memref<8x128x256xbf16, #tpu.memory_space<vmem>>, vector<1x128x256xbf16>
    %112 = vector.shape_cast %111 : vector<1x128x256xbf16> to vector<128x256xbf16>
    %cst_102 = arith.constant dense<0.000000e+00> : vector<2x256xf32>
    %113 = tpu.matmul %110, %112, %cst_102 {dimension_numbers = #tpu.dot_dimension_numbers<[1], [0], [0], [1], [0, 0, 1, 1], [], []>} : vector<2x128xbf16>, vector<128x256xbf16>, vector<2x256xf32> -> vector<2x256xf32>
    %114 = arith.addf %106, %113 : vector<2x256xf32>
    %c4_103 = arith.constant 4 : index
    %c0_104 = arith.constant 0 : index
    %c0_105 = arith.constant 0 : index
    %115 = vector.load %arg5[%c4_103, %c0_104, %c0_105] : memref<8x2x16xbf16, #tpu.memory_space<vmem>>, vector<1x2x16xbf16>
    %116 = vector.shape_cast %115 : vector<1x2x16xbf16> to vector<2x16xbf16>
    %cst_106 = arith.constant dense<0.000000e+00> : vector<2x128xf32>
    %117 = tpu.matmul %116, %81, %cst_106 {dimension_numbers = #tpu.dot_dimension_numbers<[1], [0], [0], [1], [0, 0, 1, 1], [], []>} : vector<2x16xbf16>, vector<16x128xbf16>, vector<2x128xf32> -> vector<2x128xf32>
    %118 = arith.truncf %117 : vector<2x128xf32> to vector<2x128xbf16>
    %c4_107 = arith.constant 4 : index
    %c0_108 = arith.constant 0 : index
    %c0_109 = arith.constant 0 : index
    %119 = vector.load %arg6[%c4_107, %c0_108, %c0_109] : memref<8x128x256xbf16, #tpu.memory_space<vmem>>, vector<1x128x256xbf16>
    %120 = vector.shape_cast %119 : vector<1x128x256xbf16> to vector<128x256xbf16>
    %cst_110 = arith.constant dense<0.000000e+00> : vector<2x256xf32>
    %121 = tpu.matmul %118, %120, %cst_110 {dimension_numbers = #tpu.dot_dimension_numbers<[1], [0], [0], [1], [0, 0, 1, 1], [], []>} : vector<2x128xbf16>, vector<128x256xbf16>, vector<2x256xf32> -> vector<2x256xf32>
    %122 = arith.addf %114, %121 : vector<2x256xf32>
    %c5_111 = arith.constant 5 : index
    %c0_112 = arith.constant 0 : index
    %c0_113 = arith.constant 0 : index
    %123 = vector.load %arg5[%c5_111, %c0_112, %c0_113] : memref<8x2x16xbf16, #tpu.memory_space<vmem>>, vector<1x2x16xbf16>
    %124 = vector.shape_cast %123 : vector<1x2x16xbf16> to vector<2x16xbf16>
    %cst_114 = arith.constant dense<0.000000e+00> : vector<2x128xf32>
    %125 = tpu.matmul %124, %81, %cst_114 {dimension_numbers = #tpu.dot_dimension_numbers<[1], [0], [0], [1], [0, 0, 1, 1], [], []>} : vector<2x16xbf16>, vector<16x128xbf16>, vector<2x128xf32> -> vector<2x128xf32>
    %126 = arith.truncf %125 : vector<2x128xf32> to vector<2x128xbf16>
    %c5_115 = arith.constant 5 : index
    %c0_116 = arith.constant 0 : index
    %c0_117 = arith.constant 0 : index
    %127 = vector.load %arg6[%c5_115, %c0_116, %c0_117] : memref<8x128x256xbf16, #tpu.memory_space<vmem>>, vector<1x128x256xbf16>
    %128 = vector.shape_cast %127 : vector<1x128x256xbf16> to vector<128x256xbf16>
    %cst_118 = arith.constant dense<0.000000e+00> : vector<2x256xf32>
    %129 = tpu.matmul %126, %128, %cst_118 {dimension_numbers = #tpu.dot_dimension_numbers<[1], [0], [0], [1], [0, 0, 1, 1], [], []>} : vector<2x128xbf16>, vector<128x256xbf16>, vector<2x256xf32> -> vector<2x256xf32>
    %130 = arith.addf %122, %129 : vector<2x256xf32>
    %c6_119 = arith.constant 6 : index
    %c0_120 = arith.constant 0 : index
    %c0_121 = arith.constant 0 : index
    %131 = vector.load %arg5[%c6_119, %c0_120, %c0_121] : memref<8x2x16xbf16, #tpu.memory_space<vmem>>, vector<1x2x16xbf16>
    %132 = vector.shape_cast %131 : vector<1x2x16xbf16> to vector<2x16xbf16>
    %cst_122 = arith.constant dense<0.000000e+00> : vector<2x128xf32>
    %133 = tpu.matmul %132, %81, %cst_122 {dimension_numbers = #tpu.dot_dimension_numbers<[1], [0], [0], [1], [0, 0, 1, 1], [], []>} : vector<2x16xbf16>, vector<16x128xbf16>, vector<2x128xf32> -> vector<2x128xf32>
    %134 = arith.truncf %133 : vector<2x128xf32> to vector<2x128xbf16>
    %c6_123 = arith.constant 6 : index
    %c0_124 = arith.constant 0 : index
    %c0_125 = arith.constant 0 : index
    %135 = vector.load %arg6[%c6_123, %c0_124, %c0_125] : memref<8x128x256xbf16, #tpu.memory_space<vmem>>, vector<1x128x256xbf16>
    %136 = vector.shape_cast %135 : vector<1x128x256xbf16> to vector<128x256xbf16>
    %cst_126 = arith.constant dense<0.000000e+00> : vector<2x256xf32>
    %137 = tpu.matmul %134, %136, %cst_126 {dimension_numbers = #tpu.dot_dimension_numbers<[1], [0], [0], [1], [0, 0, 1, 1], [], []>} : vector<2x128xbf16>, vector<128x256xbf16>, vector<2x256xf32> -> vector<2x256xf32>
    %138 = arith.addf %130, %137 : vector<2x256xf32>
    %c7_127 = arith.constant 7 : index
    %c0_128 = arith.constant 0 : index
    %c0_129 = arith.constant 0 : index
    %139 = vector.load %arg5[%c7_127, %c0_128, %c0_129] : memref<8x2x16xbf16, #tpu.memory_space<vmem>>, vector<1x2x16xbf16>
    %140 = vector.shape_cast %139 : vector<1x2x16xbf16> to vector<2x16xbf16>
    %cst_130 = arith.constant dense<0.000000e+00> : vector<2x128xf32>
    %141 = tpu.matmul %140, %81, %cst_130 {dimension_numbers = #tpu.dot_dimension_numbers<[1], [0], [0], [1], [0, 0, 1, 1], [], []>} : vector<2x16xbf16>, vector<16x128xbf16>, vector<2x128xf32> -> vector<2x128xf32>
    %142 = arith.truncf %141 : vector<2x128xf32> to vector<2x128xbf16>
    %c7_131 = arith.constant 7 : index
    %c0_132 = arith.constant 0 : index
    %c0_133 = arith.constant 0 : index
    %143 = vector.load %arg6[%c7_131, %c0_132, %c0_133] : memref<8x128x256xbf16, #tpu.memory_space<vmem>>, vector<1x128x256xbf16>
    %144 = vector.shape_cast %143 : vector<1x128x256xbf16> to vector<128x256xbf16>
    %cst_134 = arith.constant dense<0.000000e+00> : vector<2x256xf32>
    %145 = tpu.matmul %142, %144, %cst_134 {dimension_numbers = #tpu.dot_dimension_numbers<[1], [0], [0], [1], [0, 0, 1, 1], [], []>} : vector<2x128xbf16>, vector<128x256xbf16>, vector<2x256xf32> -> vector<2x256xf32>
    %146 = arith.addf %138, %145 : vector<2x256xf32>
    %cst_135 = arith.constant 0.000000e+00 : f32
    %147 = vector.broadcast %cst_135 : f32 to vector<2x256xf32>
    %148 = arith.maximumf %146, %147 : vector<2x256xf32>
    %149 = arith.truncf %148 : vector<2x256xf32> to vector<2x256xbf16>
    %c0_136 = arith.constant 0 : index
    %c0_137 = arith.constant 0 : index
    %150 = vector.load %arg7[%c0_136, %c0_137] : memref<256x128xbf16, #tpu.memory_space<vmem>>, vector<256x128xbf16>
    %cst_138 = arith.constant dense<0.000000e+00> : vector<2x128xf32>
    %151 = tpu.matmul %149, %150, %cst_138 {dimension_numbers = #tpu.dot_dimension_numbers<[1], [0], [0], [1], [0, 0, 1, 1], [], []>} : vector<2x256xbf16>, vector<256x128xbf16>, vector<2x128xf32> -> vector<2x128xf32>
    %cst_139 = arith.constant 0.000000e+00 : f32
    %152 = vector.broadcast %cst_139 : f32 to vector<2x128xf32>
    %153 = arith.maximumf %151, %152 : vector<2x128xf32>
    %c0_140 = arith.constant 0 : index
    %c0_141 = arith.constant 0 : index
    %154 = vector.load %arg8[%c0_140, %c0_141] : memref<2x128xf32, #tpu.memory_space<vmem>>, vector<2x128xf32>
    tpu.vector_store %arg8[%c0_140, %c0_141], %153 {strides = array<i32>} : memref<2x128xf32, #tpu.memory_space<vmem>>, vector<2x128xf32>,
    return
  }
  func.func @transform_0(%arg0: i32) -> (i32, i32) {
    %c0_i32 = arith.constant 0 : i32
    %c0_i32_0 = arith.constant 0 : i32
    %c0_i32_1 = arith.constant 0 : i32
    return %c0_i32, %c0_i32_0 : i32, i32
  }
  func.func @transform_1(%arg0: i32) -> (i32, i32) {
    %c0_i32 = arith.constant 0 : i32
    %c0_i32_0 = arith.constant 0 : i32
    %c0_i32_1 = arith.constant 0 : i32
    return %c0_i32, %c0_i32_0 : i32, i32
  }
  func.func @transform_2(%arg0: i32) -> (i32, i32, i32) {
    %c0_i32 = arith.constant 0 : i32
    %c0_i32_0 = arith.constant 0 : i32
    %c0_i32_1 = arith.constant 0 : i32
    %c0_i32_2 = arith.constant 0 : i32
    return %c0_i32, %c0_i32_0, %c0_i32_1 : i32, i32, i32
  }
  func.func @transform_3(%arg0: i32) -> (i32, i32, i32) {
    %c0_i32 = arith.constant 0 : i32
    %c0_i32_0 = arith.constant 0 : i32
    %c0_i32_1 = arith.constant 0 : i32
    %c0_i32_2 = arith.constant 0 : i32
    return %c0_i32, %c0_i32_0, %c0_i32_1 : i32, i32, i32
  }
  func.func @transform_4(%arg0: i32) -> (i32, i32, i32) {
    %c0_i32 = arith.constant 0 : i32
    %c0_i32_0 = arith.constant 0 : i32
    %c0_i32_1 = arith.constant 0 : i32
    %c0_i32_2 = arith.constant 0 : i32
    return %c0_i32, %c0_i32_0, %c0_i32_1 : i32, i32, i32
  }
  func.func @transform_5(%arg0: i32) -> (i32, i32, i32) {
    %c0_i32 = arith.constant 0 : i32
    %c0_i32_0 = arith.constant 0 : i32
    %c0_i32_1 = arith.constant 0 : i32
    %c0_i32_2 = arith.constant 0 : i32
    return %c0_i32, %c0_i32_0, %c0_i32_1 : i32, i32, i32
  }
  func.func @transform_6(%arg0: i32) -> (i32, i32) {
    %c0_i32 = arith.constant 0 : i32
    %c0_i32_0 = arith.constant 0 : i32
    %c0_i32_1 = arith.constant 0 : i32
    return %c0_i32, %c0_i32_0 : i32, i32
  }
  func.func @transform_7(%arg0: i32) -> (i32, i32) {
    %c0_i32 = arith.constant 0 : i32
    %c0_i32_0 = arith.constant 0 : i32
    %c0_i32_1 = arith.constant 0 : i32
    return %c0_i32, %c0_i32_0 : i32, i32
  }
}

</mosaic_0001>

<bundles_post_ra>
// kernel: cnn_forward.2
= control target key start
LH: loop header
LB: loop body
LE: loop exit
PB: predicated region body
PF: predicated region fallthrough
CT: control target
= control target key end

     0   :  { %s3492_s9 = smov 0   ;;  %s3688_s0 = inlined_call_operand.vmem [shape: bf16[2304,128], index: 0, kind: input, shape index: {}]   ;;  %s3689_s1 = inlined_call_operand.vmem [shape: bf16[128,128], index: 1, kind: input, shape index: {}]   ;;  %s3690_s2 = inlined_call_operand.vmem [shape: bf16[2304,128], index: 2, kind: output, shape index: {}]  }
   0x1 LB: > { %s2317_s10 = sadd.s32 4294967295, %s3475_s9   ;;  %p2321_p0 = scmp.ge.s32.totalorder %s3475_s9, 1  ;;  %s3475_s9 = sphi %s3492_s9, %s12_s9  }
   0x2   : > { %p113_p1 = scmp.lt.s32.totalorder %s3475_s9, 3 }
   0x4   : > { %p114_p2 = pnand %p2321_p0, %p113_p1 }
   0x5   : > { %v3389_v0 = vld [vmem:[%s3689_s1] sm:$0xff] (!%p114_p2)   ;;  %s135_s13 = smul.u32 (!%p114_p2), 144, %s2317_s10  ;;  %v3390_v1 = vld [vmem:[%s3689_s1 + $0x8] sm:$0xff] (!%p114_p2)   ;;  %v3391_v2 = vld [vmem:[%s3689_s1 + $0x10] sm:$0xff] (!%p114_p2)  }
   0x6   : > { %117 = sbr.rel (%p114_p2) target bundleno = 394 (0x18a), region = 28  ;;  %3205 = vmatprep.subr.bf16.mxu0 (!%p114_p2), %v3389_v0  ;;  %3365 = vmatprep.subr.bf16.mxu1 (!%p114_p2), %v3389_v0  ;;  %v3392_v3 = vld [vmem:[%s3689_s1 + $0x18] sm:$0xff] (!%p114_p2)   ;;  %v3393_v6 = vld [vmem:[%s3689_s1 + $0x20] sm:$0xff] (!%p114_p2)   ;;  %v3394_v7 = vld [vmem:[%s3689_s1 + $0x28] sm:$0xff] (!%p114_p2)  }
   0x7   : > { %p136_p3 = scmp.lt.s32.totalorder (!%p114_p2), %s135_s13, 287  ;;  %3206 = vmatpush3.bf16.msra.mxu0 (!%p114_p2), %v3389_v0  ;;  %3373 = vmatpush3.bf16.msra.mxu1 (!%p114_p2), %v3389_v0  ;;  %v3395_v8 = vld [vmem:[%s3689_s1 + $0x30] sm:$0xff] (!%p114_p2)   ;;  %v3396_v9 = vld [vmem:[%s3689_s1 + $0x38] sm:$0xff] (!%p114_p2)  }
   0x8   : > { %3207 = vmatprep.subr.bf16.mxu0 (!%p114_p2), %v3390_v1  ;;  %3366 = vmatprep.subr.bf16.mxu1 (!%p114_p2), %v3390_v1 }
   0xb   : > { %3208 = vmatpush3.bf16.msra.mxu0 (!%p114_p2), %v3390_v1  ;;  %3374 = vmatpush3.bf16.msra.mxu1 (!%p114_p2), %v3390_v1 }
   0xc   : > { %3209 = vmatprep.subr.bf16.mxu0 (!%p114_p2), %v3391_v2  ;;  %3367 = vmatprep.subr.bf16.mxu1 (!%p114_p2), %v3391_v2 }
   0xd   : > { %s3692_s13 = smov (!%p136_p3, %s135_s13), 287 }
   0xe   : > { %s2322_s18 = sshll.u32 %s3692_s13, 2 }
   0xf   : > { %s3520_s23 = scalar_lea.vmem %s3688_s0, %s2322_s18  ;;  %3210 = vmatpush3.bf16.msra.mxu0 %v3391_v2  ;;  %3375 = vmatpush3.bf16.msra.mxu1 %v3391_v2  ;;  %s3611_s6 = scalar_lea.vmem %s3690_s2, %s2322_s18 }
  0x10   : > { %v3397_v4 = vld [vmem:[%s3520_s23] sm:$0xff]   ;;  %3211 = vmatprep.subr.bf16.mxu0 %v3392_v3  ;;  %3368 = vmatprep.subr.bf16.mxu1 %v3392_v3  ;;  %v3399_v10 = vld [vmem:[%s3520_s23 + $0x8] sm:$0xff]   ;;  %v3401_v12 = vld [vmem:[%s3520_s23 + $0x10] sm:$0xff]  }
  0x11   : > { %v3398_v5 = vld [vmem:[%s3520_s23 + $0x120] sm:$0xff]   ;;  %3221 = vmatprep.mubr.bf16.mxu0 %v3397_v4  ;;  %v3400_v11 = vld [vmem:[%s3520_s23 + $0x128] sm:$0xff]   ;;  %v3402_v13 = vld [vmem:[%s3520_s23 + $0x130] sm:$0xff]  }
  0x12   : > { %3293 = vmatprep.mubr.bf16.mxu1 %v3398_v5  ;;  %v3403_v14 = vld [vmem:[%s3520_s23 + $0x18] sm:$0xff]   ;;  %v3405_v16 = vld [vmem:[%s3520_s23 + $0x20] sm:$0xff]   ;;  %v3407_v18 = vld [vmem:[%s3520_s23 + $0x28] sm:$0xff]  }
  0x13   : > { %3212 = vmatpush3.bf16.msra.mxu0 %v3392_v3  ;;  %3376 = vmatpush3.bf16.msra.mxu1 %v3392_v3  ;;  %v3404_v15 = vld [vmem:[%s3520_s23 + $0x138] sm:$0xff]   ;;  %v3406_v17 = vld [vmem:[%s3520_s23 + $0x140] sm:$0xff]   ;;  %v3408_v19 = vld [vmem:[%s3520_s23 + $0x148] sm:$0xff]  }
  0x14   : > { %3213 = vmatprep.subr.bf16.mxu0 %v3393_v6  ;;  %3369 = vmatprep.subr.bf16.mxu1 %v3393_v6  ;;  %v3409_v20 = vld [vmem:[%s3520_s23 + $0x30] sm:$0xff]   ;;  %v3411_v22 = vld [vmem:[%s3520_s23 + $0x38] sm:$0xff]   ;;  %v3413_v24 = vld [vmem:[%s3520_s23 + $0x40] sm:$0xff]  }
  0x15   : > { %v3410_v21 = vld [vmem:[%s3520_s23 + $0x150] sm:$0xff]   ;;  %v3412_v23 = vld [vmem:[%s3520_s23 + $0x158] sm:$0xff]   ;;  %v3414_v25 = vld [vmem:[%s3520_s23 + $0x160] sm:$0xff]  }
  0x16   : > { %v3415_v26 = vld [vmem:[%s3520_s23 + $0x48] sm:$0xff]   ;;  %v3417_v28 = vld [vmem:[%s3520_s23 + $0x50] sm:$0xff]   ;;  %v3419_v30 = vld [vmem:[%s3520_s23 + $0x58] sm:$0xff]  }
  0x17   : > { %3214 = vmatpush3.bf16.msra.mxu0 %v3393_v6  ;;  %3377 = vmatpush3.bf16.msra.mxu1 %v3393_v6  ;;  %v3416_v27 = vld [vmem:[%s3520_s23 + $0x168] sm:$0xff]   ;;  %v3418_v29 = vld [vmem:[%s3520_s23 + $0x170] sm:$0xff]   ;;  %v3420_v31 = vld [vmem:[%s3520_s23 + $0x178] sm:$0xff]  }
  0x18   : > { %3215 = vmatprep.subr.bf16.mxu0 %v3394_v7  ;;  %3370 = vmatprep.subr.bf16.mxu1 %v3394_v7  ;;  %v3421_v32 = vld [vmem:[%s3520_s23 + $0x60] sm:$0xff]   ;;  %v3423_v34 = vld [vmem:[%s3520_s23 + $0x68] sm:$0xff]   ;;  %v3425_v36 = vld [vmem:[%s3520_s23 + $0x70] sm:$0xff]  }
  0x19   : > { %v3422_v33 = vld [vmem:[%s3520_s23 + $0x180] sm:$0xff]   ;;  %v3424_v35 = vld [vmem:[%s3520_s23 + $0x188] sm:$0xff]   ;;  %v3426_v37 = vld [vmem:[%s3520_s23 + $0x190] sm:$0xff]  }
  0x1a   : > { %v3427_v38 = vld [vmem:[%s3520_s23 + $0x78] sm:$0xff]   ;;  %v3429_v40 = vld [vmem:[%s3520_s23 + $0x80] sm:$0xff]   ;;  %v3431_v42 = vld [vmem:[%s3520_s23 + $0x88] sm:$0xff]  }
  0x1b   : > { %3216 = vmatpush3.bf16.msra.mxu0 %v3394_v7  ;;  %3378 = vmatpush3.bf16.msra.mxu1 %v3394_v7  ;;  %v3428_v39 = vld [vmem:[%s3520_s23 + $0x198] sm:$0xff]   ;;  %v3430_v41 = vld [vmem:[%s3520_s23 + $0x1a0] sm:$0xff]   ;;  %v3432_v43 = vld [vmem:[%s3520_s23 + $0x1a8] sm:$0xff]  }
  0x1c   : > { %3217 = vmatprep.subr.bf16.mxu0 %v3395_v8  ;;  %3371 = vmatprep.subr.bf16.mxu1 %v3395_v8  ;;  %v3433_v44 = vld [vmem:[%s3520_s23 + $0x90] sm:$0xff]   ;;  %v3435_v46 = vld [vmem:[%s3520_s23 + $0x98] sm:$0xff]   ;;  %v3437_v48 = vld [vmem:[%s3520_s23 + $0xa0] sm:$0xff]  }
  0x1d   : > { %v3434_v45 = vld [vmem:[%s3520_s23 + $0x1b0] sm:$0xff]   ;;  %v3436_v47 = vld [vmem:[%s3520_s23 + $0x1b8] sm:$0xff]   ;;  %v3438_v49 = vld [vmem:[%s3520_s23 + $0x1c0] sm:$0xff]  }
  0x1e   : > { %v3439_v50 = vld [vmem:[%s3520_s23 + $0xa8] sm:$0xff]   ;;  %v3441_v52 = vld [vmem:[%s3520_s23 + $0xb0] sm:$0xff]   ;;  %v3443_v54 = vld [vmem:[%s3520_s23 + $0xb8] sm:$0xff]  }
  0x1f   : > { %3218 = vmatpush3.bf16.msra.mxu0 %v3395_v8  ;;  %3379 = vmatpush3.bf16.msra.mxu1 %v3395_v8  ;;  %v3440_v51 = vld [vmem:[%s3520_s23 + $0x1c8] sm:$0xff]   ;;  %v3442_v53 = vld [vmem:[%s3520_s23 + $0x1d0] sm:$0xff]   ;;  %v3444_v55 = vld [vmem:[%s3520_s23 + $0x1d8] sm:$0xff]  }
  0x20   : > { %3219 = vmatprep.subr.bf16.mxu0 %v3396_v9  ;;  %3372 = vmatprep.subr.bf16.mxu1 %v3396_v9  ;;  %v3445_v56 = vld [vmem:[%s3520_s23 + $0xc0] sm:$0xff]   ;;  %v3447_v58 = vld [vmem:[%s3520_s23 + $0xc8] sm:$0xff]   ;;  %v3449_v60 = vld [vmem:[%s3520_s23 + $0xd0] sm:$0xff]  }
  0x21   : > { %v3446_v57 = vld [vmem:[%s3520_s23 + $0x1e0] sm:$0xff]   ;;  %v3448_v59 = vld [vmem:[%s3520_s23 + $0x1e8] sm:$0xff]   ;;  %v3450_v61 = vld [vmem:[%s3520_s23 + $0x1f0] sm:$0xff]  }
  0x22   : > { %v3451_v62 = vld [vmem:[%s3520_s23 + $0xd8] sm:$0xff]   ;;  %v3453_v0 = vld [vmem:[%s3520_s23 + $0xe0] sm:$0xff]   ;;  %v3455_v2 = vld [vmem:[%s3520_s23 + $0xe8] sm:$0xff]  }
  0x23   : > { %3220 = vmatpush3.bf16.msra.mxu0 %v3396_v9  ;;  %3380 = vmatpush3.bf16.msra.mxu1 %v3396_v9  ;;  %v3452_v63 = vld [vmem:[%s3520_s23 + $0x1f8] sm:$0xff]   ;;  %v3454_v1 = vld [vmem:[%s3520_s23 + $0x200] sm:$0xff]   ;;  %v3456_v3 = vld [vmem:[%s3520_s23 + $0x208] sm:$0xff]  }
  0x24   : > { %v3457_v4 = vld [vmem:[%s3520_s23 + $0xf0] sm:$0xff]   ;;  %v3459_v6 = vld [vmem:[%s3520_s23 + $0xf8] sm:$0xff]   ;;  %v3461_v8 = vld [vmem:[%s3520_s23 + $0x100] sm:$0xff]  }
  0x25   : > { %v3458_v5 = vld [vmem:[%s3520_s23 + $0x210] sm:$0xff]   ;;  %v3460_v7 = vld [vmem:[%s3520_s23 + $0x218] sm:$0xff]   ;;  %v3462_v9 = vld [vmem:[%s3520_s23 + $0x220] sm:$0xff]  }
  0x26   : > { %3222 = vmatmul.mubr.bf16.vlgmr.msra.gmra.mrb[0].mxu0 %v3399_v10  ;;  %3294 = vmatmul.mubr.bf16.vlgmr.msra.gmra.mrb[0].mxu1 %v3400_v11  ;;  %v3463_v10 = vld [vmem:[%s3520_s23 + $0x108] sm:$0xff]  }
  0x27   : > { %3225 = vmatprep.mubr.bf16.mxu0 %v3401_v12  ;;  %3297 = vmatprep.mubr.bf16.mxu1 %v3402_v13  ;;  %v3464_v11 = vld [vmem:[%s3520_s23 + $0x228] sm:$0xff]   ;;  %v3465_v12 = vld [vmem:[%s3520_s23 + $0x110] sm:$0xff]  }
  0x28   : > { %v3466_v13 = vld [vmem:[%s3520_s23 + $0x230] sm:$0xff]  }
  0x2e   : > { %3226 = vmatmul.mubr.bf16.gmra.mrb[4].mxu0 %v3403_v14  ;;  %3298 = vmatmul.mubr.bf16.gmra.mrb[4].mxu1 %v3404_v15  ;;  %v3467_v14 = vld [vmem:[%s3520_s23 + $0x118] sm:$0xff]  }
  0x2f   : > { %3229 = vmatprep.mubr.bf16.mxu0 %v3405_v16  ;;  %3301 = vmatprep.mubr.bf16.mxu1 %v3406_v17  ;;  %v3468_v15 = vld [vmem:[%s3520_s23 + $0x238] sm:$0xff]  }
  0x36   : > { %3230 = vmatmul.mubr.bf16.gmra.mrb[8].mxu0 %v3407_v18  ;;  %3302 = vmatmul.mubr.bf16.gmra.mrb[8].mxu1 %v3408_v19 }
  0x37   : > { %3233 = vmatprep.mubr.bf16.mxu0 %v3409_v20  ;;  %3305 = vmatprep.mubr.bf16.mxu1 %v3410_v21 }
  0x3e   : > { %3234 = vmatmul.mubr.bf16.gmra.mrb[12].mxu0 %v3411_v22  ;;  %3306 = vmatmul.mubr.bf16.gmra.mrb[12].mxu1 %v3412_v23 }
  0x3f   : > { %3237 = vmatprep.mubr.bf16.mxu0 %v3413_v24  ;;  %3309 = vmatprep.mubr.bf16.mxu1 %v3414_v25 }
  0x46   : > { %3238 = vmatmul.mubr.bf16.gmra.mrb[16].mxu0 %v3415_v26  ;;  %3310 = vmatmul.mubr.bf16.gmra.mrb[16].mxu1 %v3416_v27 }
  0x47   : > { %3241 = vmatprep.mubr.bf16.mxu0 %v3417_v28  ;;  %3313 = vmatprep.mubr.bf16.mxu1 %v3418_v29 }
  0x4e   : > { %3242 = vmatmul.mubr.bf16.gmra.mrb[20].mxu0 %v3419_v30  ;;  %3314 = vmatmul.mubr.bf16.gmra.mrb[20].mxu1 %v3420_v31 }
  0x4f   : > { %3245 = vmatprep.mubr.bf16.mxu0 %v3421_v32  ;;  %3317 = vmatprep.mubr.bf16.mxu1 %v3422_v33 }
  0x56   : > { %3246 = vmatmul.mubr.bf16.gmra.mrb[24].mxu0 %v3423_v34  ;;  %3318 = vmatmul.mubr.bf16.gmra.mrb[24].mxu1 %v3424_v35 }
  0x57   : > { %3249 = vmatprep.mubr.bf16.mxu0 %v3425_v36  ;;  %3321 = vmatprep.mubr.bf16.mxu1 %v3426_v37 }
  0x5e   : > { %3250 = vmatmul.mubr.bf16.gmra.mrb[28].mxu0 %v3427_v38  ;;  %3322 = vmatmul.mubr.bf16.gmra.mrb[28].mxu1 %v3428_v39 }
  0x5f   : > { %3253 = vmatprep.mubr.bf16.mxu0 %v3429_v40  ;;  %3325 = vmatprep.mubr.bf16.mxu1 %v3430_v41 }
  0x66   : > { %3254 = vmatmul.mubr.bf16.gmra.mrb[32].mxu0 %v3431_v42  ;;  %3326 = vmatmul.mubr.bf16.gmra.mrb[32].mxu1 %v3432_v43 }
  0x67   : > { %3257 = vmatprep.mubr.bf16.mxu0 %v3433_v44  ;;  %3329 = vmatprep.mubr.bf16.mxu1 %v3434_v45 }
  0x6e   : > { %3258 = vmatmul.mubr.bf16.gmra.mrb[36].mxu0 %v3435_v46  ;;  %3330 = vmatmul.mubr.bf16.gmra.mrb[36].mxu1 %v3436_v47 }
  0x6f   : > { %3261 = vmatprep.mubr.bf16.mxu0 %v3437_v48  ;;  %3333 = vmatprep.mubr.bf16.mxu1 %v3438_v49 }
  0x76   : > { %3262 = vmatmul.mubr.bf16.gmra.mrb[40].mxu0 %v3439_v50  ;;  %3334 = vmatmul.mubr.bf16.gmra.mrb[40].mxu1 %v3440_v51 }
  0x77   : > { %3265 = vmatprep.mubr.bf16.mxu0 %v3441_v52  ;;  %3337 = vmatprep.mubr.bf16.mxu1 %v3442_v53 }
  0x7e   : > { %3266 = vmatmul.mubr.bf16.gmra.mrb[44].mxu0 %v3443_v54  ;;  %3338 = vmatmul.mubr.bf16.gmra.mrb[44].mxu1 %v3444_v55 }
  0x7f   : > { %3269 = vmatprep.mubr.bf16.mxu0 %v3445_v56  ;;  %3341 = vmatprep.mubr.bf16.mxu1 %v3446_v57 }
  0x86   : > { %3270 = vmatmul.mubr.bf16.gmra.mrb[48].mxu0 %v3447_v58  ;;  %3342 = vmatmul.mubr.bf16.gmra.mrb[48].mxu1 %v3448_v59 }
  0x87   : > { %3273 = vmatprep.mubr.bf16.mxu0 %v3449_v60  ;;  %3345 = vmatprep.mubr.bf16.mxu1 %v3450_v61 }
  0x8e   : > { %3274 = vmatmul.mubr.bf16.gmra.mrb[52].mxu0 %v3451_v62  ;;  %3346 = vmatmul.mubr.bf16.gmra.mrb[52].mxu1 %v3452_v63 }
  0x8f   : > { %3277 = vmatprep.mubr.bf16.mxu0 %v3453_v0  ;;  %3349 = vmatprep.mubr.bf16.mxu1 %v3454_v1 }
  0x96   : > { %3278 = vmatmul.mubr.bf16.gmra.mrb[56].mxu0 %v3455_v2  ;;  %3350 = vmatmul.mubr.bf16.gmra.mrb[56].mxu1 %v3456_v3 }
  0x97   : > { %3281 = vmatprep.mubr.bf16.mxu0 %v3457_v4  ;;  %3353 = vmatprep.mubr.bf16.mxu1 %v3458_v5 }
  0x9e   : > { %3282 = vmatmul.mubr.bf16.gmra.mrb[60].mxu0 %v3459_v6  ;;  %3354 = vmatmul.mubr.bf16.gmra.mrb[60].mxu1 %v3460_v7 }
  0x9f   : > { %3285 = vmatprep.mubr.bf16.mxu0 %v3461_v8  ;;  %3357 = vmatprep.mubr.bf16.mxu1 %v3462_v9 }
  0xa6   : > { %3286 = vmatmul.mubr.bf16.gmra.mrb[64].mxu0 %v3463_v10  ;;  %3358 = vmatmul.mubr.bf16.gmra.mrb[64].mxu1 %v3464_v11 }
  0xa7   : > { %3289 = vmatprep.mubr.bf16.mxu0 %v3465_v12  ;;  %3361 = vmatprep.mubr.bf16.mxu1 %v3466_v13 }
  0xae   : > { %3290 = vmatmul.mubr.bf16.gmra.mrb[68].mxu0 %v3467_v14  ;;  %3362 = vmatmul.mubr.bf16.gmra.mrb[68].mxu1 %v3468_v15 }
  0xf9   : > { %v3223_v16 = vpop.f32.mrb[0].mxu0  ;;  %v3295_v17 = vpop.f32.mrb[0].mxu1 }
  0xfa   : > { %v822_v18 = vpop.f32.mrb[1].mxu0  ;;  %v1110_v19 = vpop.f32.mrb[1].mxu1  ;;  %v1399_v22 = vmax.f32 %v3223_v16, 0.0  ;;  %v1471_v23 = vmax.f32 %v3295_v17, 0.0 }
  0xfb   : > { %v3224_v20 = vpop.f32.mrb[2].mxu0  ;;  %v3296_v21 = vpop.f32.mrb[2].mxu1  ;;  %v1397_v28 = vmax.f32 %v822_v18, 0.0  ;;  %v1469_v29 = vmax.f32 %v1110_v19, 0.0 }
  0xfc   : > { %v1400_v24 = vmax.f32 %v3224_v20, 0.0  ;;  %v1472_v25 = vmax.f32 %v3296_v21, 0.0  ;;  %v825_v26 = vpop.f32.mrb[3].mxu0  ;;  %v1113_v27 = vpop.f32.mrb[3].mxu1 }
  0xfd   : > { %v1398_v30 = vmax.f32 %v825_v26, 0.0  ;;  %v1470_v31 = vmax.f32 %v1113_v27, 0.0 }
  0xfe   : > { %v2702_v32 = vpack.c.bf16 %v1400_v24, %v1399_v22  ;;  %v2882_v33 = vpack.c.bf16 %v1472_v25, %v1471_v23 }
  0xff   : > { %v2697_v34 = vpack.c.bf16 %v1398_v30, %v1397_v28  ;;  %v2877_v35 = vpack.c.bf16 %v1470_v31, %v1469_v29 }
 0x100   : > { %3054 = vst [vmem:[%s3611_s6 + $0x8] sm:$0xff] %v2702_v32   ;;  %3090 = vst [vmem:[%s3611_s6 + $0x128] sm:$0xff] %v2882_v33  }
 0x101   : > { %2698 = vst [vmem:[%s3611_s6] sm:$0xff] %v2697_v34   ;;  %3089 = vst [vmem:[%s3611_s6 + $0x120] sm:$0xff] %v2877_v35   ;;  %v3227_v36 = vpop.f32.mrb[4].mxu0  ;;  %v3299_v37 = vpop.f32.mrb[4].mxu1 }
 0x102   : > { %v838_v38 = vpop.f32.mrb[5].mxu0  ;;  %v1126_v39 = vpop.f32.mrb[5].mxu1  ;;  %v1403_v42 = vmax.f32 %v3227_v36, 0.0  ;;  %v1475_v43 = vmax.f32 %v3299_v37, 0.0 }
 0x103   : > { %v3228_v40 = vpop.f32.mrb[6].mxu0  ;;  %v3300_v41 = vpop.f32.mrb[6].mxu1  ;;  %v1401_v48 = vmax.f32 %v838_v38, 0.0  ;;  %v1473_v49 = vmax.f32 %v1126_v39, 0.0 }
 0x104   : > { %v1404_v44 = vmax.f32 %v3228_v40, 0.0  ;;  %v1476_v45 = vmax.f32 %v3300_v41, 0.0  ;;  %v841_v46 = vpop.f32.mrb[7].mxu0  ;;  %v1129_v47 = vpop.f32.mrb[7].mxu1 }
 0x105   : > { %v1402_v50 = vmax.f32 %v841_v46, 0.0  ;;  %v1474_v51 = vmax.f32 %v1129_v47, 0.0 }
 0x106   : > { %v2712_v52 = vpack.c.bf16 %v1404_v44, %v1403_v42  ;;  %v2892_v53 = vpack.c.bf16 %v1476_v45, %v1475_v43 }
 0x107   : > { %v2707_v54 = vpack.c.bf16 %v1402_v50, %v1401_v48  ;;  %v2887_v55 = vpack.c.bf16 %v1474_v51, %v1473_v49 }
 0x108   : > { %3056 = vst [vmem:[%s3611_s6 + $0x18] sm:$0xff] %v2712_v52   ;;  %3092 = vst [vmem:[%s3611_s6 + $0x138] sm:$0xff] %v2892_v53  }
 0x109   : > { %3055 = vst [vmem:[%s3611_s6 + $0x10] sm:$0xff] %v2707_v54   ;;  %3091 = vst [vmem:[%s3611_s6 + $0x130] sm:$0xff] %v2887_v55   ;;  %v3231_v56 = vpop.f32.mrb[8].mxu0  ;;  %v3303_v57 = vpop.f32.mrb[8].mxu1 }
 0x10a   : > { %v854_v58 = vpop.f32.mrb[9].mxu0  ;;  %v1142_v59 = vpop.f32.mrb[9].mxu1  ;;  %v1407_v62 = vmax.f32 %v3231_v56, 0.0  ;;  %v1479_v63 = vmax.f32 %v3303_v57, 0.0 }
 0x10b   : > { %v3232_v60 = vpop.f32.mrb[10].mxu0  ;;  %v3304_v61 = vpop.f32.mrb[10].mxu1  ;;  %v1405_v4 = vmax.f32 %v854_v58, 0.0  ;;  %v1477_v5 = vmax.f32 %v1142_v59, 0.0 }
 0x10c   : > { %v1408_v0 = vmax.f32 %v3232_v60, 0.0  ;;  %v1480_v1 = vmax.f32 %v3304_v61, 0.0  ;;  %v857_v2 = vpop.f32.mrb[11].mxu0  ;;  %v1145_v3 = vpop.f32.mrb[11].mxu1 }
 0x10d   : > { %v1406_v6 = vmax.f32 %v857_v2, 0.0  ;;  %v1478_v7 = vmax.f32 %v1145_v3, 0.0 }
 0x10e   : > { %v2722_v8 = vpack.c.bf16 %v1408_v0, %v1407_v62  ;;  %v2902_v9 = vpack.c.bf16 %v1480_v1, %v1479_v63 }
 0x10f   : > { %v2717_v10 = vpack.c.bf16 %v1406_v6, %v1405_v4  ;;  %v2897_v11 = vpack.c.bf16 %v1478_v7, %v1477_v5 }
 0x110   : > { %3058 = vst [vmem:[%s3611_s6 + $0x28] sm:$0xff] %v2722_v8   ;;  %3094 = vst [vmem:[%s3611_s6 + $0x148] sm:$0xff] %v2902_v9  }
 0x111   : > { %3057 = vst [vmem:[%s3611_s6 + $0x20] sm:$0xff] %v2717_v10   ;;  %3093 = vst [vmem:[%s3611_s6 + $0x140] sm:$0xff] %v2897_v11   ;;  %v3235_v12 = vpop.f32.mrb[12].mxu0  ;;  %v3307_v13 = vpop.f32.mrb[12].mxu1 }
 0x112   : > { %v870_v14 = vpop.f32.mrb[13].mxu0  ;;  %v1158_v15 = vpop.f32.mrb[13].mxu1  ;;  %v1411_v18 = vmax.f32 %v3235_v12, 0.0  ;;  %v1483_v19 = vmax.f32 %v3307_v13, 0.0 }
 0x113   : > { %v3236_v16 = vpop.f32.mrb[14].mxu0  ;;  %v3308_v17 = vpop.f32.mrb[14].mxu1  ;;  %v1409_v24 = vmax.f32 %v870_v14, 0.0  ;;  %v1481_v25 = vmax.f32 %v1158_v15, 0.0 }
 0x114   : > { %v1412_v20 = vmax.f32 %v3236_v16, 0.0  ;;  %v1484_v21 = vmax.f32 %v3308_v17, 0.0  ;;  %v873_v22 = vpop.f32.mrb[15].mxu0  ;;  %v1161_v23 = vpop.f32.mrb[15].mxu1 }
 0x115   : > { %v1410_v26 = vmax.f32 %v873_v22, 0.0  ;;  %v1482_v27 = vmax.f32 %v1161_v23, 0.0 }
 0x116   : > { %v2732_v28 = vpack.c.bf16 %v1412_v20, %v1411_v18  ;;  %v2912_v29 = vpack.c.bf16 %v1484_v21, %v1483_v19 }
 0x117   : > { %v2727_v30 = vpack.c.bf16 %v1410_v26, %v1409_v24  ;;  %v2907_v31 = vpack.c.bf16 %v1482_v27, %v1481_v25 }
 0x118   : > { %3060 = vst [vmem:[%s3611_s6 + $0x38] sm:$0xff] %v2732_v28   ;;  %3096 = vst [vmem:[%s3611_s6 + $0x158] sm:$0xff] %v2912_v29  }
 0x119   : > { %3059 = vst [vmem:[%s3611_s6 + $0x30] sm:$0xff] %v2727_v30   ;;  %3095 = vst [vmem:[%s3611_s6 + $0x150] sm:$0xff] %v2907_v31   ;;  %v3239_v32 = vpop.f32.mrb[16].mxu0  ;;  %v3311_v33 = vpop.f32.mrb[16].mxu1 }
 0x11a   : > { %v886_v34 = vpop.f32.mrb[17].mxu0  ;;  %v1174_v35 = vpop.f32.mrb[17].mxu1  ;;  %v1415_v38 = vmax.f32 %v3239_v32, 0.0  ;;  %v1487_v39 = vmax.f32 %v3311_v33, 0.0 }
 0x11b   : > { %v3240_v36 = vpop.f32.mrb[18].mxu0  ;;  %v3312_v37 = vpop.f32.mrb[18].mxu1  ;;  %v1413_v44 = vmax.f32 %v886_v34, 0.0  ;;  %v1485_v45 = vmax.f32 %v1174_v35, 0.0 }
 0x11c   : > { %v1416_v40 = vmax.f32 %v3240_v36, 0.0  ;;  %v1488_v41 = vmax.f32 %v3312_v37, 0.0  ;;  %v889_v42 = vpop.f32.mrb[19].mxu0  ;;  %v1177_v43 = vpop.f32.mrb[19].mxu1 }
 0x11d   : > { %v1414_v46 = vmax.f32 %v889_v42, 0.0  ;;  %v1486_v47 = vmax.f32 %v1177_v43, 0.0 }
 0x11e   : > { %v2742_v48 = vpack.c.bf16 %v1416_v40, %v1415_v38  ;;  %v2922_v49 = vpack.c.bf16 %v1488_v41, %v1487_v39 }
 0x11f   : > { %v2737_v50 = vpack.c.bf16 %v1414_v46, %v1413_v44  ;;  %v2917_v51 = vpack.c.bf16 %v1486_v47, %v1485_v45 }
 0x120   : > { %3062 = vst [vmem:[%s3611_s6 + $0x48] sm:$0xff] %v2742_v48   ;;  %3098 = vst [vmem:[%s3611_s6 + $0x168] sm:$0xff] %v2922_v49  }
 0x121   : > { %3061 = vst [vmem:[%s3611_s6 + $0x40] sm:$0xff] %v2737_v50   ;;  %3097 = vst [vmem:[%s3611_s6 + $0x160] sm:$0xff] %v2917_v51   ;;  %v3243_v52 = vpop.f32.mrb[20].mxu0  ;;  %v3315_v53 = vpop.f32.mrb[20].mxu1 }
 0x122   : > { %v902_v54 = vpop.f32.mrb[21].mxu0  ;;  %v1190_v55 = vpop.f32.mrb[21].mxu1  ;;  %v1419_v58 = vmax.f32 %v3243_v52, 0.0  ;;  %v1491_v59 = vmax.f32 %v3315_v53, 0.0 }
 0x123   : > { %v3244_v56 = vpop.f32.mrb[22].mxu0  ;;  %v3316_v57 = vpop.f32.mrb[22].mxu1  ;;  %v1417_v0 = vmax.f32 %v902_v54, 0.0  ;;  %v1489_v1 = vmax.f32 %v1190_v55, 0.0 }
 0x124   : > { %v1420_v60 = vmax.f32 %v3244_v56, 0.0  ;;  %v1492_v61 = vmax.f32 %v3316_v57, 0.0  ;;  %v905_v62 = vpop.f32.mrb[23].mxu0  ;;  %v1193_v63 = vpop.f32.mrb[23].mxu1 }
 0x125   : > { %v1418_v2 = vmax.f32 %v905_v62, 0.0  ;;  %v1490_v3 = vmax.f32 %v1193_v63, 0.0 }
 0x126   : > { %v2752_v4 = vpack.c.bf16 %v1420_v60, %v1419_v58  ;;  %v2932_v5 = vpack.c.bf16 %v1492_v61, %v1491_v59 }
 0x127   : > { %v2747_v6 = vpack.c.bf16 %v1418_v2, %v1417_v0  ;;  %v2927_v7 = vpack.c.bf16 %v1490_v3, %v1489_v1 }
 0x128   : > { %3064 = vst [vmem:[%s3611_s6 + $0x58] sm:$0xff] %v2752_v4   ;;  %3100 = vst [vmem:[%s3611_s6 + $0x178] sm:$0xff] %v2932_v5  }
 0x129   : > { %3063 = vst [vmem:[%s3611_s6 + $0x50] sm:$0xff] %v2747_v6   ;;  %3099 = vst [vmem:[%s3611_s6 + $0x170] sm:$0xff] %v2927_v7   ;;  %v3247_v8 = vpop.f32.mrb[24].mxu0  ;;  %v3319_v9 = vpop.f32.mrb[24].mxu1 }
 0x12a   : > { %v918_v10 = vpop.f32.mrb[25].mxu0  ;;  %v1206_v11 = vpop.f32.mrb[25].mxu1  ;;  %v1423_v14 = vmax.f32 %v3247_v8, 0.0  ;;  %v1495_v15 = vmax.f32 %v3319_v9, 0.0 }
 0x12b   : > { %v3248_v12 = vpop.f32.mrb[26].mxu0  ;;  %v3320_v13 = vpop.f32.mrb[26].mxu1  ;;  %v1421_v20 = vmax.f32 %v918_v10, 0.0  ;;  %v1493_v21 = vmax.f32 %v1206_v11, 0.0 }
 0x12c   : > { %v1424_v16 = vmax.f32 %v3248_v12, 0.0  ;;  %v1496_v17 = vmax.f32 %v3320_v13, 0.0  ;;  %v921_v18 = vpop.f32.mrb[27].mxu0  ;;  %v1209_v19 = vpop.f32.mrb[27].mxu1 }
 0x12d   : > { %v1422_v22 = vmax.f32 %v921_v18, 0.0  ;;  %v1494_v23 = vmax.f32 %v1209_v19, 0.0 }
 0x12e   : > { %v2762_v24 = vpack.c.bf16 %v1424_v16, %v1423_v14  ;;  %v2942_v25 = vpack.c.bf16 %v1496_v17, %v1495_v15 }
 0x12f   : > { %v2757_v26 = vpack.c.bf16 %v1422_v22, %v1421_v20  ;;  %v2937_v27 = vpack.c.bf16 %v1494_v23, %v1493_v21 }
 0x130   : > { %3066 = vst [vmem:[%s3611_s6 + $0x68] sm:$0xff] %v2762_v24   ;;  %3102 = vst [vmem:[%s3611_s6 + $0x188] sm:$0xff] %v2942_v25  }
 0x131   : > { %3065 = vst [vmem:[%s3611_s6 + $0x60] sm:$0xff] %v2757_v26   ;;  %3101 = vst [vmem:[%s3611_s6 + $0x180] sm:$0xff] %v2937_v27   ;;  %v3251_v28 = vpop.f32.mrb[28].mxu0  ;;  %v3323_v29 = vpop.f32.mrb[28].mxu1 }
 0x132   : > { %v934_v30 = vpop.f32.mrb[29].mxu0  ;;  %v1222_v31 = vpop.f32.mrb[29].mxu1  ;;  %v1427_v34 = vmax.f32 %v3251_v28, 0.0  ;;  %v1499_v35 = vmax.f32 %v3323_v29, 0.0 }
 0x133   : > { %v3252_v32 = vpop.f32.mrb[30].mxu0  ;;  %v3324_v33 = vpop.f32.mrb[30].mxu1  ;;  %v1425_v40 = vmax.f32 %v934_v30, 0.0  ;;  %v1497_v41 = vmax.f32 %v1222_v31, 0.0 }
 0x134   : > { %v1428_v36 = vmax.f32 %v3252_v32, 0.0  ;;  %v1500_v37 = vmax.f32 %v3324_v33, 0.0  ;;  %v937_v38 = vpop.f32.mrb[31].mxu0  ;;  %v1225_v39 = vpop.f32.mrb[31].mxu1 }
 0x135   : > { %v1426_v42 = vmax.f32 %v937_v38, 0.0  ;;  %v1498_v43 = vmax.f32 %v1225_v39, 0.0 }
 0x136   : > { %v2772_v44 = vpack.c.bf16 %v1428_v36, %v1427_v34  ;;  %v2952_v45 = vpack.c.bf16 %v1500_v37, %v1499_v35 }
 0x137   : > { %v2767_v46 = vpack.c.bf16 %v1426_v42, %v1425_v40  ;;  %v2947_v47 = vpack.c.bf16 %v1498_v43, %v1497_v41 }
 0x138   : > { %3068 = vst [vmem:[%s3611_s6 + $0x78] sm:$0xff] %v2772_v44   ;;  %3104 = vst [vmem:[%s3611_s6 + $0x198] sm:$0xff] %v2952_v45  }
 0x139   : > { %3067 = vst [vmem:[%s3611_s6 + $0x70] sm:$0xff] %v2767_v46   ;;  %3103 = vst [vmem:[%s3611_s6 + $0x190] sm:$0xff] %v2947_v47   ;;  %v3255_v48 = vpop.f32.mrb[32].mxu0  ;;  %v3327_v49 = vpop.f32.mrb[32].mxu1 }
 0x13a   : > { %v950_v50 = vpop.f32.mrb[33].mxu0  ;;  %v1238_v51 = vpop.f32.mrb[33].mxu1  ;;  %v1431_v54 = vmax.f32 %v3255_v48, 0.0  ;;  %v1503_v55 = vmax.f32 %v3327_v49, 0.0 }
 0x13b   : > { %v3256_v52 = vpop.f32.mrb[34].mxu0  ;;  %v3328_v53 = vpop.f32.mrb[34].mxu1  ;;  %v1429_v60 = vmax.f32 %v950_v50, 0.0  ;;  %v1501_v61 = vmax.f32 %v1238_v51, 0.0 }
 0x13c   : > { %v1432_v56 = vmax.f32 %v3256_v52, 0.0  ;;  %v1504_v57 = vmax.f32 %v3328_v53, 0.0  ;;  %v953_v58 = vpop.f32.mrb[35].mxu0  ;;  %v1241_v59 = vpop.f32.mrb[35].mxu1 }
 0x13d   : > { %v1430_v62 = vmax.f32 %v953_v58, 0.0  ;;  %v1502_v63 = vmax.f32 %v1241_v59, 0.0 }
 0x13e   : > { %v2782_v0 = vpack.c.bf16 %v1432_v56, %v1431_v54  ;;  %v2962_v1 = vpack.c.bf16 %v1504_v57, %v1503_v55 }
 0x13f   : > { %v2777_v2 = vpack.c.bf16 %v1430_v62, %v1429_v60  ;;  %v2957_v3 = vpack.c.bf16 %v1502_v63, %v1501_v61 }
 0x140   : > { %3070 = vst [vmem:[%s3611_s6 + $0x88] sm:$0xff] %v2782_v0   ;;  %3106 = vst [vmem:[%s3611_s6 + $0x1a8] sm:$0xff] %v2962_v1  }
 0x141   : > { %3069 = vst [vmem:[%s3611_s6 + $0x80] sm:$0xff] %v2777_v2   ;;  %3105 = vst [vmem:[%s3611_s6 + $0x1a0] sm:$0xff] %v2957_v3   ;;  %v3259_v4 = vpop.f32.mrb[36].mxu0  ;;  %v3331_v5 = vpop.f32.mrb[36].mxu1 }
 0x142   : > { %v966_v6 = vpop.f32.mrb[37].mxu0  ;;  %v1254_v7 = vpop.f32.mrb[37].mxu1  ;;  %v1435_v10 = vmax.f32 %v3259_v4, 0.0  ;;  %v1507_v11 = vmax.f32 %v3331_v5, 0.0 }
 0x143   : > { %v3260_v8 = vpop.f32.mrb[38].mxu0  ;;  %v3332_v9 = vpop.f32.mrb[38].mxu1  ;;  %v1433_v16 = vmax.f32 %v966_v6, 0.0  ;;  %v1505_v17 = vmax.f32 %v1254_v7, 0.0 }
 0x144   : > { %v1436_v12 = vmax.f32 %v3260_v8, 0.0  ;;  %v1508_v13 = vmax.f32 %v3332_v9, 0.0  ;;  %v969_v14 = vpop.f32.mrb[39].mxu0  ;;  %v1257_v15 = vpop.f32.mrb[39].mxu1 }
 0x145   : > { %v1434_v18 = vmax.f32 %v969_v14, 0.0  ;;  %v1506_v19 = vmax.f32 %v1257_v15, 0.0 }
 0x146   : > { %v2792_v20 = vpack.c.bf16 %v1436_v12, %v1435_v10  ;;  %v2972_v21 = vpack.c.bf16 %v1508_v13, %v1507_v11 }
 0x147   : > { %v2787_v22 = vpack.c.bf16 %v1434_v18, %v1433_v16  ;;  %v2967_v23 = vpack.c.bf16 %v1506_v19, %v1505_v17 }
 0x148   : > { %3072 = vst [vmem:[%s3611_s6 + $0x98] sm:$0xff] %v2792_v20   ;;  %3108 = vst [vmem:[%s3611_s6 + $0x1b8] sm:$0xff] %v2972_v21  }
 0x149   : > { %3071 = vst [vmem:[%s3611_s6 + $0x90] sm:$0xff] %v2787_v22   ;;  %3107 = vst [vmem:[%s3611_s6 + $0x1b0] sm:$0xff] %v2967_v23   ;;  %v3263_v24 = vpop.f32.mrb[40].mxu0  ;;  %v3335_v25 = vpop.f32.mrb[40].mxu1 }
 0x14a   : > { %v982_v26 = vpop.f32.mrb[41].mxu0  ;;  %v1270_v27 = vpop.f32.mrb[41].mxu1  ;;  %v1439_v30 = vmax.f32 %v3263_v24, 0.0  ;;  %v1511_v31 = vmax.f32 %v3335_v25, 0.0 }
 0x14b   : > { %v3264_v28 = vpop.f32.mrb[42].mxu0  ;;  %v3336_v29 = vpop.f32.mrb[42].mxu1  ;;  %v1437_v36 = vmax.f32 %v982_v26, 0.0  ;;  %v1509_v37 = vmax.f32 %v1270_v27, 0.0 }
 0x14c   : > { %v1440_v32 = vmax.f32 %v3264_v28, 0.0  ;;  %v1512_v33 = vmax.f32 %v3336_v29, 0.0  ;;  %v985_v34 = vpop.f32.mrb[43].mxu0  ;;  %v1273_v35 = vpop.f32.mrb[43].mxu1 }
 0x14d   : > { %v1438_v38 = vmax.f32 %v985_v34, 0.0  ;;  %v1510_v39 = vmax.f32 %v1273_v35, 0.0 }
 0x14e   : > { %v2802_v40 = vpack.c.bf16 %v1440_v32, %v1439_v30  ;;  %v2982_v41 = vpack.c.bf16 %v1512_v33, %v1511_v31 }
 0x14f   : > { %v2797_v42 = vpack.c.bf16 %v1438_v38, %v1437_v36  ;;  %v2977_v43 = vpack.c.bf16 %v1510_v39, %v1509_v37 }
 0x150   : > { %3074 = vst [vmem:[%s3611_s6 + $0xa8] sm:$0xff] %v2802_v40   ;;  %3110 = vst [vmem:[%s3611_s6 + $0x1c8] sm:$0xff] %v2982_v41  }
 0x151   : > { %3073 = vst [vmem:[%s3611_s6 + $0xa0] sm:$0xff] %v2797_v42   ;;  %3109 = vst [vmem:[%s3611_s6 + $0x1c0] sm:$0xff] %v2977_v43   ;;  %v3267_v44 = vpop.f32.mrb[44].mxu0  ;;  %v3339_v45 = vpop.f32.mrb[44].mxu1 }
 0x152   : > { %v998_v46 = vpop.f32.mrb[45].mxu0  ;;  %v1286_v47 = vpop.f32.mrb[45].mxu1  ;;  %v1443_v50 = vmax.f32 %v3267_v44, 0.0  ;;  %v1515_v51 = vmax.f32 %v3339_v45, 0.0 }
 0x153   : > { %v3268_v48 = vpop.f32.mrb[46].mxu0  ;;  %v3340_v49 = vpop.f32.mrb[46].mxu1  ;;  %v1441_v56 = vmax.f32 %v998_v46, 0.0  ;;  %v1513_v57 = vmax.f32 %v1286_v47, 0.0 }
 0x154   : > { %v1444_v52 = vmax.f32 %v3268_v48, 0.0  ;;  %v1516_v53 = vmax.f32 %v3340_v49, 0.0  ;;  %v1001_v54 = vpop.f32.mrb[47].mxu0  ;;  %v1289_v55 = vpop.f32.mrb[47].mxu1 }
 0x155   : > { %v1442_v58 = vmax.f32 %v1001_v54, 0.0  ;;  %v1514_v59 = vmax.f32 %v1289_v55, 0.0 }
 0x156   : > { %v2812_v60 = vpack.c.bf16 %v1444_v52, %v1443_v50  ;;  %v2992_v61 = vpack.c.bf16 %v1516_v53, %v1515_v51 }
 0x157   : > { %v2807_v62 = vpack.c.bf16 %v1442_v58, %v1441_v56  ;;  %v2987_v63 = vpack.c.bf16 %v1514_v59, %v1513_v57 }
 0x158   : > { %3076 = vst [vmem:[%s3611_s6 + $0xb8] sm:$0xff] %v2812_v60   ;;  %3112 = vst [vmem:[%s3611_s6 + $0x1d8] sm:$0xff] %v2992_v61  }
 0x159   : > { %3075 = vst [vmem:[%s3611_s6 + $0xb0] sm:$0xff] %v2807_v62   ;;  %3111 = vst [vmem:[%s3611_s6 + $0x1d0] sm:$0xff] %v2987_v63   ;;  %v3271_v0 = vpop.f32.mrb[48].mxu0  ;;  %v3343_v1 = vpop.f32.mrb[48].mxu1 }
 0x15a   : > { %v1014_v2 = vpop.f32.mrb[49].mxu0  ;;  %v1302_v3 = vpop.f32.mrb[49].mxu1  ;;  %v1447_v6 = vmax.f32 %v3271_v0, 0.0  ;;  %v1519_v7 = vmax.f32 %v3343_v1, 0.0 }
 0x15b   : > { %v3272_v4 = vpop.f32.mrb[50].mxu0  ;;  %v3344_v5 = vpop.f32.mrb[50].mxu1  ;;  %v1445_v12 = vmax.f32 %v1014_v2, 0.0  ;;  %v1517_v13 = vmax.f32 %v1302_v3, 0.0 }
 0x15c   : > { %v1448_v8 = vmax.f32 %v3272_v4, 0.0  ;;  %v1520_v9 = vmax.f32 %v3344_v5, 0.0  ;;  %v1017_v10 = vpop.f32.mrb[51].mxu0  ;;  %v1305_v11 = vpop.f32.mrb[51].mxu1 }
 0x15d   : > { %v1446_v14 = vmax.f32 %v1017_v10, 0.0  ;;  %v1518_v15 = vmax.f32 %v1305_v11, 0.0 }
 0x15e   : > { %v2822_v16 = vpack.c.bf16 %v1448_v8, %v1447_v6  ;;  %v3002_v17 = vpack.c.bf16 %v1520_v9, %v1519_v7 }
 0x15f   : > { %v2817_v18 = vpack.c.bf16 %v1446_v14, %v1445_v12  ;;  %v2997_v19 = vpack.c.bf16 %v1518_v15, %v1517_v13 }
 0x160   : > { %3078 = vst [vmem:[%s3611_s6 + $0xc8] sm:$0xff] %v2822_v16   ;;  %3114 = vst [vmem:[%s3611_s6 + $0x1e8] sm:$0xff] %v3002_v17  }
 0x161   : > { %3077 = vst [vmem:[%s3611_s6 + $0xc0] sm:$0xff] %v2817_v18   ;;  %3113 = vst [vmem:[%s3611_s6 + $0x1e0] sm:$0xff] %v2997_v19   ;;  %v3275_v20 = vpop.f32.mrb[52].mxu0  ;;  %v3347_v21 = vpop.f32.mrb[52].mxu1 }
 0x162   : > { %v1030_v22 = vpop.f32.mrb[53].mxu0  ;;  %v1318_v23 = vpop.f32.mrb[53].mxu1  ;;  %v1451_v26 = vmax.f32 %v3275_v20, 0.0  ;;  %v1523_v27 = vmax.f32 %v3347_v21, 0.0 }
 0x163   : > { %v3276_v24 = vpop.f32.mrb[54].mxu0  ;;  %v3348_v25 = vpop.f32.mrb[54].mxu1  ;;  %v1449_v32 = vmax.f32 %v1030_v22, 0.0  ;;  %v1521_v33 = vmax.f32 %v1318_v23, 0.0 }
 0x164   : > { %v1452_v28 = vmax.f32 %v3276_v24, 0.0  ;;  %v1524_v29 = vmax.f32 %v3348_v25, 0.0  ;;  %v1033_v30 = vpop.f32.mrb[55].mxu0  ;;  %v1321_v31 = vpop.f32.mrb[55].mxu1 }
 0x165   : > { %v1450_v34 = vmax.f32 %v1033_v30, 0.0  ;;  %v1522_v35 = vmax.f32 %v1321_v31, 0.0 }
 0x166   : > { %v2832_v36 = vpack.c.bf16 %v1452_v28, %v1451_v26  ;;  %v3012_v37 = vpack.c.bf16 %v1524_v29, %v1523_v27 }
 0x167   : > { %v2827_v38 = vpack.c.bf16 %v1450_v34, %v1449_v32  ;;  %v3007_v39 = vpack.c.bf16 %v1522_v35, %v1521_v33 }
 0x168   : > { %3080 = vst [vmem:[%s3611_s6 + $0xd8] sm:$0xff] %v2832_v36   ;;  %3116 = vst [vmem:[%s3611_s6 + $0x1f8] sm:$0xff] %v3012_v37  }
 0x169   : > { %3079 = vst [vmem:[%s3611_s6 + $0xd0] sm:$0xff] %v2827_v38   ;;  %3115 = vst [vmem:[%s3611_s6 + $0x1f0] sm:$0xff] %v3007_v39   ;;  %v3279_v40 = vpop.f32.mrb[56].mxu0  ;;  %v3351_v41 = vpop.f32.mrb[56].mxu1 }
 0x16a   : > { %v1046_v42 = vpop.f32.mrb[57].mxu0  ;;  %v1334_v43 = vpop.f32.mrb[57].mxu1  ;;  %v1455_v46 = vmax.f32 %v3279_v40, 0.0  ;;  %v1527_v47 = vmax.f32 %v3351_v41, 0.0 }
 0x16b   : > { %v3280_v44 = vpop.f32.mrb[58].mxu0  ;;  %v3352_v45 = vpop.f32.mrb[58].mxu1  ;;  %v1453_v52 = vmax.f32 %v1046_v42, 0.0  ;;  %v1525_v53 = vmax.f32 %v1334_v43, 0.0 }
 0x16c   : > { %v1456_v48 = vmax.f32 %v3280_v44, 0.0  ;;  %v1528_v49 = vmax.f32 %v3352_v45, 0.0  ;;  %v1049_v50 = vpop.f32.mrb[59].mxu0  ;;  %v1337_v51 = vpop.f32.mrb[59].mxu1 }
 0x16d   : > { %v1454_v54 = vmax.f32 %v1049_v50, 0.0  ;;  %v1526_v55 = vmax.f32 %v1337_v51, 0.0 }
 0x16e   : > { %v2842_v56 = vpack.c.bf16 %v1456_v48, %v1455_v46  ;;  %v3022_v57 = vpack.c.bf16 %v1528_v49, %v1527_v47 }
 0x16f   : > { %v2837_v58 = vpack.c.bf16 %v1454_v54, %v1453_v52  ;;  %v3017_v59 = vpack.c.bf16 %v1526_v55, %v1525_v53 }
 0x170   : > { %3082 = vst [vmem:[%s3611_s6 + $0xe8] sm:$0xff] %v2842_v56   ;;  %3118 = vst [vmem:[%s3611_s6 + $0x208] sm:$0xff] %v3022_v57  }
 0x171   : > { %3081 = vst [vmem:[%s3611_s6 + $0xe0] sm:$0xff] %v2837_v58   ;;  %3117 = vst [vmem:[%s3611_s6 + $0x200] sm:$0xff] %v3017_v59   ;;  %v3283_v60 = vpop.f32.mrb[60].mxu0  ;;  %v3355_v61 = vpop.f32.mrb[60].mxu1 }
 0x172   : > { %v1062_v62 = vpop.f32.mrb[61].mxu0  ;;  %v1350_v63 = vpop.f32.mrb[61].mxu1  ;;  %v1459_v2 = vmax.f32 %v3283_v60, 0.0  ;;  %v1531_v3 = vmax.f32 %v3355_v61, 0.0 }
 0x173   : > { %v3284_v0 = vpop.f32.mrb[62].mxu0  ;;  %v3356_v1 = vpop.f32.mrb[62].mxu1  ;;  %v1457_v8 = vmax.f32 %v1062_v62, 0.0  ;;  %v1529_v9 = vmax.f32 %v1350_v63, 0.0 }
 0x174   : > { %v1460_v4 = vmax.f32 %v3284_v0, 0.0  ;;  %v1532_v5 = vmax.f32 %v3356_v1, 0.0  ;;  %v1065_v6 = vpop.f32.mrb[63].mxu0  ;;  %v1353_v7 = vpop.f32.mrb[63].mxu1 }
 0x175   : > { %v1458_v10 = vmax.f32 %v1065_v6, 0.0  ;;  %v1530_v11 = vmax.f32 %v1353_v7, 0.0 }
 0x176   : > { %v2852_v12 = vpack.c.bf16 %v1460_v4, %v1459_v2  ;;  %v3032_v13 = vpack.c.bf16 %v1532_v5, %v1531_v3 }
 0x177   : > { %v2847_v14 = vpack.c.bf16 %v1458_v10, %v1457_v8  ;;  %v3027_v15 = vpack.c.bf16 %v1530_v11, %v1529_v9 }
 0x178   : > { %3084 = vst [vmem:[%s3611_s6 + $0xf8] sm:$0xff] %v2852_v12   ;;  %3120 = vst [vmem:[%s3611_s6 + $0x218] sm:$0xff] %v3032_v13  }
 0x179   : > { %3083 = vst [vmem:[%s3611_s6 + $0xf0] sm:$0xff] %v2847_v14   ;;  %3119 = vst [vmem:[%s3611_s6 + $0x210] sm:$0xff] %v3027_v15   ;;  %v3287_v16 = vpop.f32.mrb[64].mxu0  ;;  %v3359_v17 = vpop.f32.mrb[64].mxu1 }
 0x17a   : > { %v1078_v18 = vpop.f32.mrb[65].mxu0  ;;  %v1366_v19 = vpop.f32.mrb[65].mxu1  ;;  %v1463_v22 = vmax.f32 %v3287_v16, 0.0  ;;  %v1535_v23 = vmax.f32 %v3359_v17, 0.0 }
 0x17b   : > { %v3288_v20 = vpop.f32.mrb[66].mxu0  ;;  %v3360_v21 = vpop.f32.mrb[66].mxu1  ;;  %v1461_v28 = vmax.f32 %v1078_v18, 0.0  ;;  %v1533_v29 = vmax.f32 %v1366_v19, 0.0 }
 0x17c   : > { %v1464_v24 = vmax.f32 %v3288_v20, 0.0  ;;  %v1536_v25 = vmax.f32 %v3360_v21, 0.0  ;;  %v1081_v26 = vpop.f32.mrb[67].mxu0  ;;  %v1369_v27 = vpop.f32.mrb[67].mxu1 }
 0x17d   : > { %v1462_v30 = vmax.f32 %v1081_v26, 0.0  ;;  %v1534_v31 = vmax.f32 %v1369_v27, 0.0 }
 0x17e   : > { %v2862_v32 = vpack.c.bf16 %v1464_v24, %v1463_v22  ;;  %v3042_v33 = vpack.c.bf16 %v1536_v25, %v1535_v23 }
 0x17f   : > { %v2857_v34 = vpack.c.bf16 %v1462_v30, %v1461_v28  ;;  %v3037_v35 = vpack.c.bf16 %v1534_v31, %v1533_v29 }
 0x180   : > { %3086 = vst [vmem:[%s3611_s6 + $0x108] sm:$0xff] %v2862_v32   ;;  %3122 = vst [vmem:[%s3611_s6 + $0x228] sm:$0xff] %v3042_v33  }
 0x181   : > { %3085 = vst [vmem:[%s3611_s6 + $0x100] sm:$0xff] %v2857_v34   ;;  %3121 = vst [vmem:[%s3611_s6 + $0x220] sm:$0xff] %v3037_v35   ;;  %v3291_v36 = vpop.f32.mrb[68].mxu0  ;;  %v3363_v37 = vpop.f32.mrb[68].mxu1 }
 0x182   : > { %v1094_v38 = vpop.f32.mrb[69].mxu0  ;;  %v1382_v39 = vpop.f32.mrb[69].mxu1  ;;  %v1467_v42 = vmax.f32 %v3291_v36, 0.0  ;;  %v1539_v43 = vmax.f32 %v3363_v37, 0.0 }
 0x183   : > { %v3292_v40 = vpop.f32.mrb[70].mxu0  ;;  %v3364_v41 = vpop.f32.mrb[70].mxu1  ;;  %v1465_v48 = vmax.f32 %v1094_v38, 0.0  ;;  %v1537_v49 = vmax.f32 %v1382_v39, 0.0 }
 0x184   : > { %v1468_v44 = vmax.f32 %v3292_v40, 0.0  ;;  %v1540_v45 = vmax.f32 %v3364_v41, 0.0  ;;  %v1097_v46 = vpop.f32.mrb[71].mxu0  ;;  %v1385_v47 = vpop.f32.mrb[71].mxu1 }
 0x185   : > { %v1466_v50 = vmax.f32 %v1097_v46, 0.0  ;;  %v1538_v51 = vmax.f32 %v1385_v47, 0.0 }
 0x186   : > { %v2872_v52 = vpack.c.bf16 %v1468_v44, %v1467_v42  ;;  %v3052_v53 = vpack.c.bf16 %v1540_v45, %v1539_v43 }
 0x187   : > { %v2867_v54 = vpack.c.bf16 %v1466_v50, %v1465_v48  ;;  %v3047_v55 = vpack.c.bf16 %v1538_v51, %v1537_v49 }
 0x188   : > { %3088 = vst [vmem:[%s3611_s6 + $0x118] sm:$0xff] %v2872_v52   ;;  %3124 = vst [vmem:[%s3611_s6 + $0x238] sm:$0xff] %v3052_v53  }
 0x189   : > { %3087 = vst [vmem:[%s3611_s6 + $0x110] sm:$0xff] %v2867_v54   ;;  %3123 = vst [vmem:[%s3611_s6 + $0x230] sm:$0xff] %v3047_v55  }
 0x18a PF: > { %s12_s9 = sadd.s32 1, %s3475_s9  }
 0x18b   : > { %p9_p4 = scmp.ge.s32.totalorder %s12_s9, 4  }
 0x18d   :  { %11 = sbr.rel (!%p9_p4) target bundleno = 1 (0x1), region = 58 }

// kernel: cnn_forward.3
= control target key start
LH: loop header
LB: loop body
LE: loop exit
PB: predicated region body
PF: predicated region fallthrough
CT: control target
= control target key end

     0   :  { %s11187_s0 = inlined_call_operand.vmem [shape: bf16[64,3456], index: 0, kind: input, shape index: {}]   ;;  %s11188_s1 = inlined_call_operand.vmem [shape: bf16[3456,128], index: 1, kind: input, shape index: {}]   ;;  %s11189_s2 = inlined_call_operand.vmem [shape: bf16[9,16,64], index: 2, kind: input, shape index: {}]   ;;  %s11190_s3 = inlined_call_operand.vmem [shape: bf16[9,128,128], index: 3, kind: input, shape index: {}]   ;;  %s11191_s4 = inlined_call_operand.vmem [shape: bf16[8,2,16], index: 4, kind: input, shape index: {}]   ;;  %s11192_s5 = inlined_call_operand.vmem [shape: bf16[8,128,256], index: 5, kind: input, shape index: {}]   ;;  %s11193_s6 = inlined_call_operand.vmem [shape: bf16[256,128], index: 6, kind: input, shape index: {}]   ;;  %s11194_s7 = inlined_call_operand.hbm [shape: f32[2,128], index: 7, kind: output, shape index: {}]  }
   0x1   :  { %v8401_v0 = vld [vmem:[%s11188_s1 + $0x40] sm:$0xff]   ;;  %v8403_v2 = vld [vmem:[%s11188_s1 + $0x48] sm:$0xff]   ;;  %v8405_v4 = vld [vmem:[%s11188_s1 + $0x50] sm:$0xff]  }
   0x2   :  { %v8402_v1 = vld [vmem:[%s11188_s1] sm:$0xff]   ;;  %7281 = vmatprep.subr.bf16.mxu1 %v8401_v0  ;;  %v8404_v3 = vld [vmem:[%s11188_s1 + $0x8] sm:$0xff]   ;;  %v8406_v5 = vld [vmem:[%s11188_s1 + $0x10] sm:$0xff]  }
   0x3   :  { %7282 = vmatpush3.bf16.msra.mxu1 %v8402_v1  ;;  %v8407_v6 = vld [vmem:[%s11188_s1 + $0x58] sm:$0xff]   ;;  %v8409_v8 = vld [vmem:[%s11188_s1 + $0x60] sm:$0xff]   ;;  %v8411_v10 = vld [vmem:[%s11188_s1 + $0x68] sm:$0xff]  }
   0x4   :  { %7283 = vmatprep.subr.bf16.mxu1 %v8403_v2  ;;  %v8408_v7 = vld [vmem:[%s11188_s1 + $0x18] sm:$0xff]   ;;  %v8410_v9 = vld [vmem:[%s11188_s1 + $0x20] sm:$0xff]   ;;  %v8412_v12 = vld [vmem:[%s11188_s1 + $0x28] sm:$0xff]  }
   0x5   :  { %v8419_v11 = vld [vmem:[%s11187_s0 + $0x4] ss:$108 sps:$4 sm:$0xff]   ;;  %v8415_v17 = vld [vmem:[%s11188_s1 + $0x78] sm:$0xff]   ;;  %v8426_v18 = vld [vmem:[%s11188_s1 + $0x148] sm:$0xff]  }
   0x6   :  { %v8413_v13 = vld [vmem:[%s11188_s1 + $0x70] sm:$0xff]   ;;  %2444 = vmatprep.mubr.bf16.mxu1 %v8419_v11  ;;  %v8422_v14 = vld [vmem:[%s11188_s1 + $0x140] sm:$0xff]   ;;  %v8429_v19 = vld [vmem:[%s11188_s1 + $0x108] sm:$0xff]  }
   0x7   :  { %7284 = vmatpush3.bf16.msra.mxu1 %v8404_v3  ;;  %v8423_v15 = vld [vmem:[%s11188_s1 + $0x100] sm:$0xff]   ;;  %v8414_v16 = vld [vmem:[%s11188_s1 + $0x30] sm:$0xff]   ;;  %7361 = vmatprep.subr.bf16.mxu0 %v8422_v14  ;;  %v8416_v20 = vld [vmem:[%s11188_s1 + $0x38] sm:$0xff]  }
   0x8   :  { %7285 = vmatprep.subr.bf16.mxu1 %v8405_v4  ;;  %7362 = vmatpush3.bf16.msra.mxu0 %v8423_v15  ;;  %v8417_v21 = vld [vmem:[%s11187_s0] ss:$108 sps:$4 sm:$0xff]   ;;  %v8433_v24 = vld [vmem:[%s11188_s1 + $0x150] sm:$0xff]   ;;  %v8427_v26 = vld [vmem:[%s11187_s0 + $0xdc] ss:$108 sps:$4 sm:$0xff]  }
   0x9   :  { %7363 = vmatprep.subr.bf16.mxu0 %v8426_v18  ;;  %v8420_v22 = vld [vmem:[%s11188_s1 + $0xc0] sm:$0xff]   ;;  %v8434_v25 = vld [vmem:[%s11188_s1 + $0x110] sm:$0xff]   ;;  %v8424_v27 = vld [vmem:[%s11188_s1 + $0xc8] sm:$0xff]  }
   0xa   :  { %v8421_v23 = vld [vmem:[%s11188_s1 + $0x80] sm:$0xff]   ;;  %v8437_v28 = vld [vmem:[%s11188_s1 + $0x158] sm:$0xff]   ;;  %v8425_v29 = vld [vmem:[%s11188_s1 + $0x88] sm:$0xff]  }
   0xb   :  { %7286 = vmatpush3.bf16.msra.mxu1 %v8406_v5  ;;  %v8440_v30 = vld [vmem:[%s11188_s1 + $0x118] sm:$0xff]   ;;  %v8431_v32 = vld [vmem:[%s11188_s1 + $0xd0] sm:$0xff]   ;;  %v8444_v35 = vld [vmem:[%s11188_s1 + $0x160] sm:$0xff]  }
   0xc   :  { %7287 = vmatprep.subr.bf16.mxu1 %v8407_v6  ;;  %7364 = vmatpush3.bf16.msra.mxu0 %v8429_v19  ;;  %v8430_v31 = vld [vmem:[%s11187_s0 + $0xd8] ss:$108 sps:$4 sm:$0xff]   ;;  %v8432_v33 = vld [vmem:[%s11188_s1 + $0x90] sm:$0xff]   ;;  %v8448_v39 = vld [vmem:[%s11188_s1 + $0x168] sm:$0xff]  }
   0xd   :  { %7365 = vmatprep.subr.bf16.mxu0 %v8433_v24  ;;  %v8438_v34 = vld [vmem:[%s11187_s0 + $0x1b4] ss:$108 sps:$4 sm:$0xff]   ;;  %v8435_v37 = vld [vmem:[%s11188_s1 + $0xd8] sm:$0xff]   ;;  %v8451_v42 = vld [vmem:[%s11188_s1 + $0x128] sm:$0xff]  }
   0xe   :  { %v8445_v36 = vld [vmem:[%s11188_s1 + $0x120] sm:$0xff]   ;;  %v8436_v38 = vld [vmem:[%s11188_s1 + $0x98] sm:$0xff]   ;;  %v8446_v44 = vld [vmem:[%s11188_s1 + $0xe8] sm:$0xff]  }
   0xf   :  { %7288 = vmatpush3.bf16.msra.mxu1 %v8408_v7  ;;  %v8442_v40 = vld [vmem:[%s11188_s1 + $0xe0] sm:$0xff]   ;;  %v8441_v41 = vld [vmem:[%s11187_s0 + $0x1b0] ss:$108 sps:$4 sm:$0xff]   ;;  %v8449_v45 = vld [vmem:[%s11187_s0 + $0x28c] ss:$108 sps:$4 sm:$0xff]  }
  0x10   :  { %7289 = vmatprep.subr.bf16.mxu1 %v8409_v8  ;;  %7366 = vmatpush3.bf16.msra.mxu0 %v8434_v25  ;;  %v8443_v43 = vld [vmem:[%s11188_s1 + $0xa0] sm:$0xff]   ;;  %v8455_v46 = vld [vmem:[%s11188_s1 + $0x170] sm:$0xff]   ;;  %v8447_v48 = vld [vmem:[%s11188_s1 + $0xa8] sm:$0xff]  }
  0x11   :  { %7367 = vmatprep.subr.bf16.mxu0 %v8437_v28  ;;  %v8456_v47 = vld [vmem:[%s11188_s1 + $0x130] sm:$0xff]   ;;  %v8459_v50 = vld [vmem:[%s11188_s1 + $0x178] sm:$0xff]   ;;  %v8469_v59 = vld [vmem:[%s11188_s1 + $0x240] sm:$0xff]  }
  0x12   :  { %v8453_v49 = vld [vmem:[%s11188_s1 + $0xf0] sm:$0xff]   ;;  %v8457_v53 = vld [vmem:[%s11188_s1 + $0xf8] sm:$0xff]   ;;  %v8470_v60 = vld [vmem:[%s11188_s1 + $0x200] sm:$0xff]  }
  0x13   :  { %7290 = vmatpush3.bf16.msra.mxu1 %v8410_v9  ;;  %v8452_v51 = vld [vmem:[%s11187_s0 + $0x288] ss:$108 sps:$4 sm:$0xff]   ;;  %v8463_v54 = vld [vmem:[%s11188_s1 + $0x138] sm:$0xff]   ;;  %v8464_v62 = vld [vmem:[%s11188_s1 + $0x1c0] sm:$0xff]  }
  0x14   :  { %7291 = vmatprep.subr.bf16.mxu1 %v8411_v10  ;;  %7368 = vmatpush3.bf16.msra.mxu0 %v8440_v30  ;;  %v8454_v52 = vld [vmem:[%s11188_s1 + $0xb0] sm:$0xff]   ;;  %v8462_v55 = vld [vmem:[%s11187_s0 + $0xc] ss:$108 sps:$4 sm:$0xff]   ;;  %v8468_v63 = vld [vmem:[%s11188_s1 + $0x180] sm:$0xff]  }
  0x15   :  { %7369 = vmatprep.subr.bf16.mxu0 %v8444_v35  ;;  %v8465_v56 = vld [vmem:[%s11187_s0 + $0x10] ss:$108 sps:$4 sm:$0xff]   ;;  %v8467_v57 = vld [vmem:[%s11187_s0 + $0x14] ss:$108 sps:$4 sm:$0xff]   ;;  %v8471_v0 = vld [vmem:[%s11188_s1 + $0x1c8] sm:$0xff]  }
  0x16   :  { %v8458_v58 = vld [vmem:[%s11188_s1 + $0xb8] sm:$0xff]   ;;  %2574 = vmatprep.mubr.bf16.mxu0 %v8467_v57  ;;  %v8460_v61 = vld [vmem:[%s11187_s0 + $0x8] ss:$108 sps:$4 sm:$0xff]   ;;  %v8474_v2 = vld [vmem:[%s11187_s0 + $0xe4] ss:$108 sps:$4 sm:$0xff]  }
  0x17   :  { %7292 = vmatpush3.bf16.msra.mxu1 %v8412_v12  ;;  %v8473_v1 = vld [vmem:[%s11188_s1 + $0x248] sm:$0xff]   ;;  %v8478_v7 = vld [vmem:[%s11188_s1 + $0x1d0] sm:$0xff]   ;;  %v8485_v12 = vld [vmem:[%s11188_s1 + $0x1d8] sm:$0xff]  }
  0x18   :  { %7293 = vmatprep.subr.bf16.mxu1 %v8413_v13  ;;  %7370 = vmatpush3.bf16.msra.mxu0 %v8445_v36  ;;  %v8476_v3 = vld [vmem:[%s11188_s1 + $0x208] sm:$0xff]   ;;  %v8483_v9 = vld [vmem:[%s11188_s1 + $0x250] sm:$0xff]   ;;  %v8487_v13 = vld [vmem:[%s11188_s1 + $0x258] sm:$0xff]  }
  0x19   :  { %7371 = vmatprep.subr.bf16.mxu0 %v8448_v39  ;;  %v8472_v4 = vld [vmem:[%s11188_s1 + $0x188] sm:$0xff]   ;;  %v8484_v10 = vld [vmem:[%s11188_s1 + $0x210] sm:$0xff]   ;;  %v8486_v15 = vld [vmem:[%s11188_s1 + $0x198] sm:$0xff]  }
  0x1a   :  { %v8479_v5 = vld [vmem:[%s11187_s0 + $0xec] ss:$108 sps:$4 sm:$0xff]   ;;  %v8482_v8 = vld [vmem:[%s11187_s0 + $0xe8] ss:$108 sps:$4 sm:$0xff]   ;;  %v8492_v18 = vld [vmem:[%s11188_s1 + $0x1e0] sm:$0xff]  }
  0x1b   :  { %7294 = vmatpush3.bf16.msra.mxu1 %v8414_v16  ;;  %v8477_v6 = vld [vmem:[%s11187_s0 + $0xe0] ss:$108 sps:$4 sm:$0xff]   ;;  %v8481_v11 = vld [vmem:[%s11188_s1 + $0x190] sm:$0xff]   ;;  %v8488_v14 = vld [vmem:[%s11187_s0 + $0x1bc] ss:$108 sps:$4 sm:$0xff]  }
  0x1c   :  { %7295 = vmatprep.subr.bf16.mxu1 %v8415_v17  ;;  %7372 = vmatpush3.bf16.msra.mxu0 %v8451_v42  ;;  %v8490_v16 = vld [vmem:[%s11188_s1 + $0x218] sm:$0xff]   ;;  %v8493_v19 = vld [vmem:[%s11187_s0 + $0x1c4] ss:$108 sps:$4 sm:$0xff]   ;;  %v8499_v24 = vld [vmem:[%s11188_s1 + $0x1e8] sm:$0xff]  }
  0x1d   :  { %7373 = vmatprep.subr.bf16.mxu0 %v8455_v46  ;;  %v8491_v17 = vld [vmem:[%s11187_s0 + $0x1b8] ss:$108 sps:$4 sm:$0xff]   ;;  %v8500_v25 = vld [vmem:[%s11188_s1 + $0x1a8] sm:$0xff]   ;;  %v8506_v30 = vld [vmem:[%s11188_s1 + $0x1f0] sm:$0xff]  }
  0x1e   :  { %v8504_v28 = vld [vmem:[%s11188_s1 + $0x228] sm:$0xff]   ;;  %v8512_v35 = vld [vmem:[%s11188_s1 + $0x230] sm:$0xff]   ;;  %v8513_v36 = vld [vmem:[%s11188_s1 + $0x1f8] sm:$0xff]  }
  0x1f   :  { %7296 = vmatpush3.bf16.msra.mxu1 %v8416_v20  ;;  %v8495_v20 = vld [vmem:[%s11188_s1 + $0x1a0] sm:$0xff]  }
  0x20   :  { %7321 = vmatprep.subr.bf16.mxu1 %v8420_v22  ;;  %7374 = vmatpush3.bf16.msra.mxu0 %v8456_v47  ;;  %v8497_v22 = vld [vmem:[%s11188_s1 + $0x260] sm:$0xff]  }
  0x21   :  { %7375 = vmatprep.subr.bf16.mxu0 %v8459_v50  ;;  %v8516_v39 = vld [vmem:[%s11187_s0 + $0x18] ss:$108 sps:$4 sm:$0xff]   ;;  %v8529_v50 = vld [vmem:[%s11188_s1 + $0x348] sm:$0xff]  }
  0x22   :  { %2445 = vmatmul.mubr.bf16.vlgmr.msra.gmra.mrb[0].mxu1 %v8417_v21  ;;  %v8496_v21 = vld [vmem:[%s11187_s0 + $0x1c0] ss:$108 sps:$4 sm:$0xff]   ;;  %v8538_v57 = vld [vmem:[%s11187_s0 + $0xf8] ss:$108 sps:$4 sm:$0xff]  }
  0x23   :  { %7322 = vmatpush3.bf16.msra.mxu1 %v8421_v23  ;;  %2452 = vmatprep.mubr.bf16.mxu1 %v8427_v26  ;;  %v8498_v23 = vld [vmem:[%s11188_s1 + $0x220] sm:$0xff]   ;;  %v8501_v26 = vld [vmem:[%s11188_s1 + $0x268] sm:$0xff]  }
  0x24   :  { %7323 = vmatprep.subr.bf16.mxu1 %v8424_v27  ;;  %7376 = vmatpush3.bf16.msra.mxu0 %v8463_v54  ;;  %v8502_v27 = vld [vmem:[%s11187_s0 + $0x294] ss:$108 sps:$4 sm:$0xff]  }
  0x25   :  { %7441 = vmatprep.subr.bf16.mxu0 %v8469_v59  ;;  %v8520_v42 = vld [vmem:[%s11188_s1 + $0x2c0] sm:$0xff]   ;;  %v8534_v54 = vld [vmem:[%s11188_s1 + $0x2d0] sm:$0xff]  }
  0x26   :  { %v8525_v46 = vld [vmem:[%s11188_s1 + $0x340] sm:$0xff]   ;;  %v8540_v59 = vld [vmem:[%s11188_s1 + $0x310] sm:$0xff]  }
  0x27   :  { %7324 = vmatpush3.bf16.msra.mxu1 %v8425_v29  ;;  %2575 = vmatmul.mubr.bf16.vlgmr.msra.gmra.mrb[0].mxu0 %v8465_v56  ;;  %v8505_v29 = vld [vmem:[%s11187_s0 + $0x290] ss:$108 sps:$4 sm:$0xff]   ;;  %v8526_v47 = vld [vmem:[%s11188_s1 + $0x300] sm:$0xff]  }
  0x28   :  { %7325 = vmatprep.subr.bf16.mxu1 %v8431_v32  ;;  %7442 = vmatpush3.bf16.msra.mxu0 %v8470_v60  ;;  %v8509_v32 = vld [vmem:[%s11188_s1 + $0x1b0] sm:$0xff]   ;;  %v8541_v60 = vld [vmem:[%s11188_s1 + $0x2d8] sm:$0xff]  }
  0x29   :  { %7443 = vmatprep.subr.bf16.mxu0 %v8473_v1  ;;  %2582 = vmatprep.mubr.bf16.mxu0 %v8479_v5  ;;  %v8537_v56 = vld [vmem:[%s11188_s1 + $0x290] sm:$0xff]  }
  0x2a   :  { %2453 = vmatmul.mubr.bf16.gmra.mrb[4].mxu1 %v8430_v31  ;;  %v8507_v31 = vld [vmem:[%s11187_s0 + $0x29c] ss:$108 sps:$4 sm:$0xff]  }
  0x2b   :  { %7326 = vmatpush3.bf16.msra.mxu1 %v8432_v33  ;;  %2460 = vmatprep.mubr.bf16.mxu1 %v8438_v34  ;;  %v8510_v33 = vld [vmem:[%s11187_s0 + $0x298] ss:$108 sps:$4 sm:$0xff]   ;;  %v8511_v34 = vld [vmem:[%s11188_s1 + $0x270] sm:$0xff]  }
  0x2c   :  { %7327 = vmatprep.subr.bf16.mxu1 %v8435_v37  ;;  %7444 = vmatpush3.bf16.msra.mxu0 %v8476_v3  ;;  %v8514_v37 = vld [vmem:[%s11188_s1 + $0x1b8] sm:$0xff]   ;;  %v8547_v1 = vld [vmem:[%s11187_s0 + $0x1c8] ss:$108 sps:$4 sm:$0xff]  }
  0x2d   :  { %7445 = vmatprep.subr.bf16.mxu0 %v8483_v9  ;;  %v8549_v3 = vld [vmem:[%s11187_s0 + $0x1d4] ss:$108 sps:$4 sm:$0xff]   ;;  %v8552_v5 = vld [vmem:[%s11187_s0 + $0x1d0] ss:$108 sps:$4 sm:$0xff]   ;;  %v8556_v9 = vld [vmem:[%s11188_s1 + $0x2a8] sm:$0xff]  }
  0x2f   :  { %7328 = vmatpush3.bf16.msra.mxu1 %v8436_v38  ;;  %2583 = vmatmul.mubr.bf16.gmra.mrb[4].mxu0 %v8482_v8  ;;  %v8515_v38 = vld [vmem:[%s11188_s1 + $0x278] sm:$0xff]   ;;  %v8555_v8 = vld [vmem:[%s11188_s1 + $0x2e8] sm:$0xff]  }
  0x30   :  { %7329 = vmatprep.subr.bf16.mxu1 %v8442_v40  ;;  %7446 = vmatpush3.bf16.msra.mxu0 %v8484_v10  ;;  %v8518_v40 = vld [vmem:[%s11187_s0 + $0x1c] ss:$108 sps:$4 sm:$0xff]  }
  0x31   :  { %7447 = vmatprep.subr.bf16.mxu0 %v8487_v13  ;;  %2590 = vmatprep.mubr.bf16.mxu0 %v8493_v19  ;;  %v8557_v10 = vld [vmem:[%s11188_s1 + $0x368] sm:$0xff]   ;;  %v8568_v19 = vld [vmem:[%s11188_s1 + $0x330] sm:$0xff]  }
  0x32   :  { %2461 = vmatmul.mubr.bf16.gmra.mrb[8].mxu1 %v8441_v41  ;;  %v8519_v41 = vld [vmem:[%s11188_s1 + $0x238] sm:$0xff]   ;;  %v8561_v13 = vld [vmem:[%s11187_s0 + $0x2a0] ss:$108 sps:$4 sm:$0xff]  }
  0x33   :  { %7330 = vmatpush3.bf16.msra.mxu1 %v8443_v43  ;;  %2468 = vmatprep.mubr.bf16.mxu1 %v8449_v45  ;;  %v8521_v43 = vld [vmem:[%s11187_s0 + $0x20] ss:$108 sps:$4 sm:$0xff]  }
  0x34   :  { %7331 = vmatprep.subr.bf16.mxu1 %v8446_v44  ;;  %7448 = vmatpush3.bf16.msra.mxu0 %v8490_v16  ;;  %v8523_v44 = vld [vmem:[%s11187_s0 + $0x24] ss:$108 sps:$4 sm:$0xff]  }
  0x35   :  { %7449 = vmatprep.subr.bf16.mxu0 %v8497_v22  ;;  %v8524_v45 = vld [vmem:[%s11188_s1 + $0x280] sm:$0xff]   ;;  %v8565_v16 = vld [vmem:[%s11188_s1 + $0x2b0] sm:$0xff]   ;;  %v8571_v22 = vld [vmem:[%s11188_s1 + $0x378] sm:$0xff]  }
  0x37   :  { %7332 = vmatpush3.bf16.msra.mxu1 %v8447_v48  ;;  %2591 = vmatmul.mubr.bf16.gmra.mrb[8].mxu0 %v8496_v21  ;;  %v8527_v48 = vld [vmem:[%s11188_s1 + $0x2c8] sm:$0xff]   ;;  %v8570_v21 = vld [vmem:[%s11188_s1 + $0x2b8] sm:$0xff]  }
  0x38   :  { %7333 = vmatprep.subr.bf16.mxu1 %v8453_v49  ;;  %7450 = vmatpush3.bf16.msra.mxu0 %v8498_v23  ;;  %v8528_v49 = vld [vmem:[%s11188_s1 + $0x288] sm:$0xff]  }
  0x39   :  { %7451 = vmatprep.subr.bf16.mxu0 %v8501_v26  ;;  %2598 = vmatprep.mubr.bf16.mxu0 %v8507_v31  ;;  %v8572_v23 = vld [vmem:[%s11187_s0 + $0x28] ss:$108 sps:$4 sm:$0xff]   ;;  %v8576_v26 = vld [vmem:[%s11188_s1 + $0x3c0] sm:$0xff]  }
  0x3a   :  { %2469 = vmatmul.mubr.bf16.gmra.mrb[12].mxu1 %v8452_v51  ;;  %v8530_v51 = vld [vmem:[%s11187_s0 + $0xf4] ss:$108 sps:$4 sm:$0xff]  }
  0x3b   :  { %7334 = vmatpush3.bf16.msra.mxu1 %v8454_v52  ;;  %2509 = vmatprep.mubr.bf16.mxu1 %v8462_v55  ;;  %v8532_v52 = vld [vmem:[%s11188_s1 + $0x308] sm:$0xff]   ;;  %v8582_v31 = vld [vmem:[%s11188_s1 + $0x400] sm:$0xff]  }
  0x3c   :  { %7335 = vmatprep.subr.bf16.mxu1 %v8457_v53  ;;  %7452 = vmatpush3.bf16.msra.mxu0 %v8504_v28  ;;  %v8533_v53 = vld [vmem:[%s11187_s0 + $0xf0] ss:$108 sps:$4 sm:$0xff]   ;;  %v8579_v28 = vld [vmem:[%s11187_s0 + $0x34] ss:$108 sps:$4 sm:$0xff]  }
  0x3d   :  { %7453 = vmatprep.subr.bf16.mxu0 %v8511_v34  ;;  %v8535_v55 = vld [vmem:[%s11187_s0 + $0xfc] ss:$108 sps:$4 sm:$0xff]  }
  0x3e   :  { %v8585_v34 = vld [vmem:[%s11188_s1 + $0x448] sm:$0xff]  }
  0x3f   :  { %7336 = vmatpush3.bf16.msra.mxu1 %v8458_v58  ;;  %2599 = vmatmul.mubr.bf16.gmra.mrb[12].mxu0 %v8510_v33  ;;  %v8539_v58 = vld [vmem:[%s11188_s1 + $0x350] sm:$0xff]   ;;  %v8584_v33 = vld [vmem:[%s11188_s1 + $0x388] sm:$0xff]  }
  0x40   :  { %7401 = vmatprep.subr.bf16.mxu1 %v8464_v62  ;;  %7454 = vmatpush3.bf16.msra.mxu0 %v8512_v35  ;;  %v8543_v62 = vld [vmem:[%s11188_s1 + $0x358] sm:$0xff]   ;;  %v8586_v35 = vld [vmem:[%s11187_s0 + $0x104] ss:$108 sps:$4 sm:$0xff]  }
  0x41   :  { %7455 = vmatprep.subr.bf16.mxu0 %v8515_v38  ;;  %2704 = vmatprep.mubr.bf16.mxu0 %v8523_v44  ;;  %v8590_v38 = vld [vmem:[%s11188_s1 + $0x3d0] sm:$0xff]   ;;  %v8597_v44 = vld [vmem:[%s11188_s1 + $0x3d8] sm:$0xff]  }
  0x42   :  { %2510 = vmatmul.mubr.bf16.vlgmr.msra.gmra.mrb[16].mxu1 %v8460_v61  ;;  %v8542_v61 = vld [vmem:[%s11188_s1 + $0x298] sm:$0xff]  }
  0x43   :  { %7402 = vmatpush3.bf16.msra.mxu1 %v8468_v63  ;;  %2517 = vmatprep.mubr.bf16.mxu1 %v8474_v2  ;;  %v8544_v63 = vld [vmem:[%s11187_s0 + $0x1cc] ss:$108 sps:$4 sm:$0xff]   ;;  %v8548_v2 = vld [vmem:[%s11188_s1 + $0x2e0] sm:$0xff]  }
  0x44   :  { %7403 = vmatprep.subr.bf16.mxu1 %v8471_v0  ;;  %7456 = vmatpush3.bf16.msra.mxu0 %v8519_v41  ;;  %v8546_v0 = vld [vmem:[%s11188_s1 + $0x318] sm:$0xff]   ;;  %v8594_v41 = vld [vmem:[%s11187_s0 + $0x108] ss:$108 sps:$4 sm:$0xff]  }
  0x45   :  { %7521 = vmatprep.subr.bf16.mxu0 %v8525_v46  ;;  %v8599_v46 = vld [vmem:[%s11188_s1 + $0x458] sm:$0xff]  }
  0x47   :  { %7404 = vmatpush3.bf16.msra.mxu1 %v8472_v4  ;;  %2705 = vmatmul.mubr.bf16.vlgmr.msra.gmra.mrb[16].mxu0 %v8521_v43  ;;  %v8551_v4 = vld [vmem:[%s11188_s1 + $0x2a0] sm:$0xff]   ;;  %v8596_v43 = vld [vmem:[%s11188_s1 + $0x410] sm:$0xff]  }
  0x48   :  { %7405 = vmatprep.subr.bf16.mxu1 %v8478_v7  ;;  %7522 = vmatpush3.bf16.msra.mxu0 %v8526_v47  ;;  %v8554_v7 = vld [vmem:[%s11188_s1 + $0x320] sm:$0xff]   ;;  %v8600_v47 = vld [vmem:[%s11187_s0 + $0x1dc] ss:$108 sps:$4 sm:$0xff]  }
  0x49   :  { %7523 = vmatprep.subr.bf16.mxu0 %v8529_v50  ;;  %2712 = vmatprep.mubr.bf16.mxu0 %v8535_v55  ;;  %v8604_v50 = vld [vmem:[%s11188_s1 + $0x3e0] sm:$0xff]  }
  0x4a   :  { %2518 = vmatmul.mubr.bf16.gmra.mrb[20].mxu1 %v8477_v6  ;;  %v8553_v6 = vld [vmem:[%s11188_s1 + $0x360] sm:$0xff]  }
  0x4b   :  { %7406 = vmatpush3.bf16.msra.mxu1 %v8481_v11  ;;  %2525 = vmatprep.mubr.bf16.mxu1 %v8488_v14  ;;  %v8558_v11 = vld [vmem:[%s11187_s0 + $0x2a4] ss:$108 sps:$4 sm:$0xff]  }
  0x4c   :  { %7407 = vmatprep.subr.bf16.mxu1 %v8485_v12  ;;  %7524 = vmatpush3.bf16.msra.mxu0 %v8532_v52  ;;  %v8560_v12 = vld [vmem:[%s11188_s1 + $0x328] sm:$0xff]   ;;  %v8562_v14 = vld [vmem:[%s11188_s1 + $0x2f0] sm:$0xff]   ;;  %v8607_v52 = vld [vmem:[%s11188_s1 + $0x3a0] sm:$0xff]  }
  0x4d   :  { %7525 = vmatprep.subr.bf16.mxu0 %v8539_v58  ;;  %v8610_v55 = vld [vmem:[%s11188_s1 + $0x420] sm:$0xff]   ;;  %v8613_v58 = vld [vmem:[%s11188_s1 + $0x468] sm:$0xff]  }
  0x4f   :  { %7408 = vmatpush3.bf16.msra.mxu1 %v8486_v15  ;;  %2713 = vmatmul.mubr.bf16.gmra.mrb[20].mxu0 %v8538_v57  ;;  %v8563_v15 = vld [vmem:[%s11187_s0 + $0x2ac] ss:$108 sps:$4 sm:$0xff]  }
  0x50   :  { %7409 = vmatprep.subr.bf16.mxu1 %v8492_v18  ;;  %7526 = vmatpush3.bf16.msra.mxu0 %v8540_v59  ;;  %v8567_v18 = vld [vmem:[%s11188_s1 + $0x370] sm:$0xff]   ;;  %v8612_v57 = vld [vmem:[%s11188_s1 + $0x3a8] sm:$0xff]  }
  0x51   :  { %7527 = vmatprep.subr.bf16.mxu0 %v8543_v62  ;;  %2720 = vmatprep.mubr.bf16.mxu0 %v8549_v3  ;;  %v8614_v59 = vld [vmem:[%s11187_s0 + $0x2b4] ss:$108 sps:$4 sm:$0xff]  }
  0x52   :  { %2526 = vmatmul.mubr.bf16.gmra.mrb[24].mxu1 %v8491_v17  ;;  %v8566_v17 = vld [vmem:[%s11187_s0 + $0x2a8] ss:$108 sps:$4 sm:$0xff]  }
  0x53   :  { %7410 = vmatpush3.bf16.msra.mxu1 %v8495_v20  ;;  %2533 = vmatprep.mubr.bf16.mxu1 %v8502_v27  ;;  %v8569_v20 = vld [vmem:[%s11188_s1 + $0x2f8] sm:$0xff]   ;;  %v8618_v62 = vld [vmem:[%s11188_s1 + $0x3f0] sm:$0xff]  }
  0x54   :  { %7411 = vmatprep.subr.bf16.mxu1 %v8499_v24  ;;  %7528 = vmatpush3.bf16.msra.mxu0 %v8546_v0  ;;  %v8574_v24 = vld [vmem:[%s11187_s0 + $0x2c] ss:$108 sps:$4 sm:$0xff]   ;;  %v8577_v27 = vld [vmem:[%s11187_s0 + $0x30] ss:$108 sps:$4 sm:$0xff]  }
  0x55   :  { %7529 = vmatprep.subr.bf16.mxu0 %v8553_v6  ;;  %v8621_v0 = vld [vmem:[%s11188_s1 + $0x3b0] sm:$0xff]   ;;  %v8627_v6 = vld [vmem:[%s11188_s1 + $0x478] sm:$0xff]  }
  0x56   :  { %v8624_v3 = vld [vmem:[%s11188_s1 + $0x430] sm:$0xff]  }
  0x57   :  { %7412 = vmatpush3.bf16.msra.mxu1 %v8500_v25  ;;  %2721 = vmatmul.mubr.bf16.gmra.mrb[24].mxu0 %v8552_v5  ;;  %v8575_v25 = vld [vmem:[%s11188_s1 + $0x338] sm:$0xff]  }
  0x58   :  { %7413 = vmatprep.subr.bf16.mxu1 %v8506_v30  ;;  %7530 = vmatpush3.bf16.msra.mxu0 %v8554_v7  ;;  %v8581_v30 = vld [vmem:[%s11188_s1 + $0x440] sm:$0xff]   ;;  %v8626_v5 = vld [vmem:[%s11188_s1 + $0x3b8] sm:$0xff]  }
  0x59   :  { %7531 = vmatprep.subr.bf16.mxu0 %v8557_v10  ;;  %2728 = vmatprep.mubr.bf16.mxu0 %v8563_v15  ;;  %v8628_v7 = vld [vmem:[%s11187_s0 + $0x38] ss:$108 sps:$4 sm:$0xff]  }
  0x5a   :  { %2534 = vmatmul.mubr.bf16.gmra.mrb[28].mxu1 %v8505_v29  ;;  %v8580_v29 = vld [vmem:[%s11188_s1 + $0x380] sm:$0xff]  }
  0x5b   :  { %7414 = vmatpush3.bf16.msra.mxu1 %v8509_v32  ;;  %2639 = vmatprep.mubr.bf16.mxu1 %v8518_v40  ;;  %v8583_v32 = vld [vmem:[%s11188_s1 + $0x3c8] sm:$0xff]   ;;  %v8593_v40 = vld [vmem:[%s11188_s1 + $0x390] sm:$0xff]   ;;  %v8632_v10 = vld [vmem:[%s11188_s1 + $0x4c0] sm:$0xff]  }
  0x5c   :  { %7415 = vmatprep.subr.bf16.mxu1 %v8513_v36  ;;  %7532 = vmatpush3.bf16.msra.mxu0 %v8560_v12  ;;  %v8588_v36 = vld [vmem:[%s11188_s1 + $0x408] sm:$0xff]   ;;  %v8635_v12 = vld [vmem:[%s11187_s0 + $0x44] ss:$108 sps:$4 sm:$0xff]  }
  0x5d   :  { %7533 = vmatprep.subr.bf16.mxu0 %v8567_v18  ;;  %v8638_v15 = vld [vmem:[%s11188_s1 + $0x500] sm:$0xff]   ;;  %v8641_v18 = vld [vmem:[%s11188_s1 + $0x548] sm:$0xff]  }
  0x5f   :  { %7416 = vmatpush3.bf16.msra.mxu1 %v8514_v37  ;;  %2729 = vmatmul.mubr.bf16.gmra.mrb[28].mxu0 %v8566_v17  ;;  %v8589_v37 = vld [vmem:[%s11187_s0 + $0x100] ss:$108 sps:$4 sm:$0xff]  }
  0x60   :  { %7481 = vmatprep.subr.bf16.mxu1 %v8520_v42  ;;  %7534 = vmatpush3.bf16.msra.mxu0 %v8568_v19  ;;  %v8595_v42 = vld [vmem:[%s11188_s1 + $0x450] sm:$0xff]   ;;  %v8640_v17 = vld [vmem:[%s11188_s1 + $0x488] sm:$0xff]  }
  0x61   :  { %7535 = vmatprep.subr.bf16.mxu0 %v8571_v22  ;;  %2834 = vmatprep.mubr.bf16.mxu0 %v8579_v28  ;;  %v8642_v19 = vld [vmem:[%s11187_s0 + $0x114] ss:$108 sps:$4 sm:$0xff]   ;;  %v8653_v28 = vld [vmem:[%s11188_s1 + $0x4d8] sm:$0xff]  }
  0x62   :  { %2640 = vmatmul.mubr.bf16.vlgmr.msra.gmra.mrb[32].mxu1 %v8516_v39  ;;  %v8591_v39 = vld [vmem:[%s11187_s0 + $0x10c] ss:$108 sps:$4 sm:$0xff]   ;;  %v8646_v22 = vld [vmem:[%s11188_s1 + $0x4d0] sm:$0xff]  }
  0x63   :  { %7482 = vmatpush3.bf16.msra.mxu1 %v8524_v45  ;;  %2647 = vmatprep.mubr.bf16.mxu1 %v8530_v51  ;;  %v8598_v45 = vld [vmem:[%s11188_s1 + $0x398] sm:$0xff]   ;;  %v8605_v51 = vld [vmem:[%s11187_s0 + $0x1e4] ss:$108 sps:$4 sm:$0xff]  }
  0x64   :  { %7483 = vmatprep.subr.bf16.mxu1 %v8527_v48  ;;  %7536 = vmatpush3.bf16.msra.mxu0 %v8575_v25  ;;  %v8602_v48 = vld [vmem:[%s11188_s1 + $0x418] sm:$0xff]  }
  0x65   :  { %7601 = vmatprep.subr.bf16.mxu0 %v8581_v30  ;;  %v8650_v25 = vld [vmem:[%s11187_s0 + $0x118] ss:$108 sps:$4 sm:$0xff]  }
  0x66   :  { %v8655_v30 = vld [vmem:[%s11188_s1 + $0x558] sm:$0xff]  }
  0x67   :  { %7484 = vmatpush3.bf16.msra.mxu1 %v8528_v49  ;;  %2835 = vmatmul.mubr.bf16.vlgmr.msra.gmra.mrb[32].mxu0 %v8577_v27  ;;  %v8603_v49 = vld [vmem:[%s11187_s0 + $0x1d8] ss:$108 sps:$4 sm:$0xff]   ;;  %v8652_v27 = vld [vmem:[%s11188_s1 + $0x510] sm:$0xff]  }
  0x68   :  { %7485 = vmatprep.subr.bf16.mxu1 %v8534_v54  ;;  %7602 = vmatpush3.bf16.msra.mxu0 %v8582_v31  ;;  %v8609_v54 = vld [vmem:[%s11188_s1 + $0x460] sm:$0xff]   ;;  %v8656_v31 = vld [vmem:[%s11187_s0 + $0x1ec] ss:$108 sps:$4 sm:$0xff]  }
  0x69   :  { %7603 = vmatprep.subr.bf16.mxu0 %v8585_v34  ;;  %2842 = vmatprep.mubr.bf16.mxu0 %v8591_v39  ;;  %v8660_v34 = vld [vmem:[%s11188_s1 + $0x4e0] sm:$0xff]  }
  0x6a   :  { %2648 = vmatmul.mubr.bf16.gmra.mrb[36].mxu1 %v8533_v53  ;;  %v8608_v53 = vld [vmem:[%s11187_s0 + $0x1e0] ss:$108 sps:$4 sm:$0xff]  }
  0x6b   :  { %7486 = vmatpush3.bf16.msra.mxu1 %v8537_v56  ;;  %2655 = vmatprep.mubr.bf16.mxu1 %v8544_v63  ;;  %v8611_v56 = vld [vmem:[%s11188_s1 + $0x3e8] sm:$0xff]   ;;  %v8666_v39 = vld [vmem:[%s11188_s1 + $0x520] sm:$0xff]  }
  0x6c   :  { %7487 = vmatprep.subr.bf16.mxu1 %v8541_v60  ;;  %7604 = vmatpush3.bf16.msra.mxu0 %v8588_v36  ;;  %v8616_v60 = vld [vmem:[%s11188_s1 + $0x428] sm:$0xff]   ;;  %v8663_v36 = vld [vmem:[%s11188_s1 + $0x4a0] sm:$0xff]  }
  0x6d   :  { %7605 = vmatprep.subr.bf16.mxu0 %v8595_v42  ;;  %v8619_v63 = vld [vmem:[%s11187_s0 + $0x2bc] ss:$108 sps:$4 sm:$0xff]  }
  0x6e   :  { %v8669_v42 = vld [vmem:[%s11188_s1 + $0x568] sm:$0xff]  }
  0x6f   :  { %7488 = vmatpush3.bf16.msra.mxu1 %v8542_v61  ;;  %2843 = vmatmul.mubr.bf16.gmra.mrb[36].mxu0 %v8594_v41  ;;  %v8617_v61 = vld [vmem:[%s11187_s0 + $0x2b0] ss:$108 sps:$4 sm:$0xff]   ;;  %v8668_v41 = vld [vmem:[%s11188_s1 + $0x4a8] sm:$0xff]  }
  0x70   :  { %7489 = vmatprep.subr.bf16.mxu1 %v8548_v2  ;;  %7606 = vmatpush3.bf16.msra.mxu0 %v8596_v43  ;;  %v8623_v2 = vld [vmem:[%s11188_s1 + $0x470] sm:$0xff]  }
  0x71   :  { %7607 = vmatprep.subr.bf16.mxu0 %v8599_v46  ;;  %2850 = vmatprep.mubr.bf16.mxu0 %v8605_v51  ;;  %v8670_v43 = vld [vmem:[%s11187_s0 + $0x2c4] ss:$108 sps:$4 sm:$0xff]  }
  0x72   :  { %2656 = vmatmul.mubr.bf16.gmra.mrb[40].mxu1 %v8547_v1  ;;  %v8622_v1 = vld [vmem:[%s11187_s0 + $0x2b8] ss:$108 sps:$4 sm:$0xff]   ;;  %v8674_v46 = vld [vmem:[%s11188_s1 + $0x4f0] sm:$0xff]  }
  0x73   :  { %7490 = vmatpush3.bf16.msra.mxu1 %v8551_v4  ;;  %2663 = vmatprep.mubr.bf16.mxu1 %v8558_v11  ;;  %v8625_v4 = vld [vmem:[%s11188_s1 + $0x3f8] sm:$0xff]   ;;  %v8633_v11 = vld [vmem:[%s11187_s0 + $0x40] ss:$108 sps:$4 sm:$0xff]   ;;  %v8680_v51 = vld [vmem:[%s11188_s1 + $0x530] sm:$0xff]  }
  0x74   :  { %7491 = vmatprep.subr.bf16.mxu1 %v8555_v8  ;;  %7608 = vmatpush3.bf16.msra.mxu0 %v8602_v48  ;;  %v8630_v8 = vld [vmem:[%s11187_s0 + $0x3c] ss:$108 sps:$4 sm:$0xff]   ;;  %v8677_v48 = vld [vmem:[%s11188_s1 + $0x4b0] sm:$0xff]  }
  0x75   :  { %7609 = vmatprep.subr.bf16.mxu0 %v8609_v54  ;;  %v8683_v54 = vld [vmem:[%s11188_s1 + $0x578] sm:$0xff]  }
  0x77   :  { %7492 = vmatpush3.bf16.msra.mxu1 %v8556_v9  ;;  %2851 = vmatmul.mubr.bf16.gmra.mrb[40].mxu0 %v8608_v53  ;;  %v8631_v9 = vld [vmem:[%s11188_s1 + $0x438] sm:$0xff]  }
  0x78   :  { %7493 = vmatprep.subr.bf16.mxu1 %v8562_v14  ;;  %7610 = vmatpush3.bf16.msra.mxu0 %v8610_v55  ;;  %v8637_v14 = vld [vmem:[%s11188_s1 + $0x540] sm:$0xff]   ;;  %v8682_v53 = vld [vmem:[%s11188_s1 + $0x4b8] sm:$0xff]   ;;  %v8684_v55 = vld [vmem:[%s11187_s0 + $0x48] ss:$108 sps:$4 sm:$0xff]  }
  0x79   :  { %7611 = vmatprep.subr.bf16.mxu0 %v8613_v58  ;;  %2858 = vmatprep.mubr.bf16.mxu0 %v8619_v63  ;;  %v8688_v58 = vld [vmem:[%s11188_s1 + $0x5c0] sm:$0xff]  }
  0x7a   :  { %2664 = vmatmul.mubr.bf16.gmra.mrb[44].mxu1 %v8561_v13  ;;  %v8636_v13 = vld [vmem:[%s11188_s1 + $0x480] sm:$0xff]  }
  0x7b   :  { %7494 = vmatpush3.bf16.msra.mxu1 %v8565_v16  ;;  %2769 = vmatprep.mubr.bf16.mxu1 %v8574_v24  ;;  %v8639_v16 = vld [vmem:[%s11188_s1 + $0x4c8] sm:$0xff]   ;;  %v8649_v24 = vld [vmem:[%s11188_s1 + $0x490] sm:$0xff]   ;;  %v8694_v63 = vld [vmem:[%s11188_s1 + $0x600] sm:$0xff]  }
  0x7c   :  { %7495 = vmatprep.subr.bf16.mxu1 %v8569_v20  ;;  %7612 = vmatpush3.bf16.msra.mxu0 %v8616_v60  ;;  %v8644_v20 = vld [vmem:[%s11188_s1 + $0x508] sm:$0xff]   ;;  %v8691_v60 = vld [vmem:[%s11187_s0 + $0x54] ss:$108 sps:$4 sm:$0xff]  }
  0x7d   :  { %7613 = vmatprep.subr.bf16.mxu0 %v8623_v2  ;;  %v8697_v2 = vld [vmem:[%s11188_s1 + $0x648] sm:$0xff]  }
  0x7f   :  { %7496 = vmatpush3.bf16.msra.mxu1 %v8570_v21  ;;  %2859 = vmatmul.mubr.bf16.gmra.mrb[44].mxu0 %v8622_v1  ;;  %v8645_v21 = vld [vmem:[%s11187_s0 + $0x110] ss:$108 sps:$4 sm:$0xff]   ;;  %v8696_v1 = vld [vmem:[%s11188_s1 + $0x588] sm:$0xff]  }
  0x80   :  { %7561 = vmatprep.subr.bf16.mxu1 %v8576_v26  ;;  %7614 = vmatpush3.bf16.msra.mxu0 %v8624_v3  ;;  %v8651_v26 = vld [vmem:[%s11188_s1 + $0x550] sm:$0xff]  }
  0x81   :  { %7615 = vmatprep.subr.bf16.mxu0 %v8627_v6  ;;  %2964 = vmatprep.mubr.bf16.mxu0 %v8635_v12  ;;  %v8698_v3 = vld [vmem:[%s11187_s0 + $0x124] ss:$108 sps:$4 sm:$0xff]   ;;  %v8709_v12 = vld [vmem:[%s11188_s1 + $0x5d8] sm:$0xff]  }
  0x82   :  { %2770 = vmatmul.mubr.bf16.vlgmr.msra.gmra.mrb[48].mxu1 %v8572_v23  ;;  %v8647_v23 = vld [vmem:[%s11187_s0 + $0x11c] ss:$108 sps:$4 sm:$0xff]   ;;  %v8702_v6 = vld [vmem:[%s11188_s1 + $0x5d0] sm:$0xff]  }
  0x83   :  { %7562 = vmatpush3.bf16.msra.mxu1 %v8580_v29  ;;  %2777 = vmatprep.mubr.bf16.mxu1 %v8586_v35  ;;  %v8654_v29 = vld [vmem:[%s11188_s1 + $0x498] sm:$0xff]   ;;  %v8661_v35 = vld [vmem:[%s11187_s0 + $0x1f4] ss:$108 sps:$4 sm:$0xff]  }
  0x84   :  { %7563 = vmatprep.subr.bf16.mxu1 %v8583_v32  ;;  %7616 = vmatpush3.bf16.msra.mxu0 %v8631_v9  ;;  %v8658_v32 = vld [vmem:[%s11188_s1 + $0x518] sm:$0xff]   ;;  %v8706_v9 = vld [vmem:[%s11187_s0 + $0x128] ss:$108 sps:$4 sm:$0xff]  }
  0x85   :  { %7681 = vmatprep.subr.bf16.mxu0 %v8637_v14  ;;  %v8711_v14 = vld [vmem:[%s11188_s1 + $0x658] sm:$0xff]  }
  0x87   :  { %7564 = vmatpush3.bf16.msra.mxu1 %v8584_v33  ;;  %2965 = vmatmul.mubr.bf16.vlgmr.msra.gmra.mrb[48].mxu0 %v8633_v11  ;;  %v8659_v33 = vld [vmem:[%s11187_s0 + $0x1e8] ss:$108 sps:$4 sm:$0xff]  }
  0x88   :  { %7565 = vmatprep.subr.bf16.mxu1 %v8590_v38  ;;  %7682 = vmatpush3.bf16.msra.mxu0 %v8638_v15  ;;  %v8665_v38 = vld [vmem:[%s11188_s1 + $0x560] sm:$0xff]   ;;  %v8708_v11 = vld [vmem:[%s11188_s1 + $0x610] sm:$0xff]   ;;  %v8712_v15 = vld [vmem:[%s11187_s0 + $0x1fc] ss:$108 sps:$4 sm:$0xff]  }
  0x89   :  { %7683 = vmatprep.subr.bf16.mxu0 %v8641_v18  ;;  %2972 = vmatprep.mubr.bf16.mxu0 %v8647_v23 }
  0x8a   :  { %2778 = vmatmul.mubr.bf16.gmra.mrb[52].mxu1 %v8589_v37  ;;  %v8664_v37 = vld [vmem:[%s11187_s0 + $0x1f0] ss:$108 sps:$4 sm:$0xff]  }
  0x8b   :  { %7566 = vmatpush3.bf16.msra.mxu1 %v8593_v40  ;;  %2785 = vmatprep.mubr.bf16.mxu1 %v8600_v47  ;;  %v8667_v40 = vld [vmem:[%s11188_s1 + $0x4e8] sm:$0xff]  }
  0x8c   :  { %7567 = vmatprep.subr.bf16.mxu1 %v8597_v44  ;;  %7684 = vmatpush3.bf16.msra.mxu0 %v8644_v20  ;;  %v8672_v44 = vld [vmem:[%s11188_s1 + $0x528] sm:$0xff]  }
  0x8d   :  { %7685 = vmatprep.subr.bf16.mxu0 %v8651_v26  ;;  %v8675_v47 = vld [vmem:[%s11187_s0 + $0x2cc] ss:$108 sps:$4 sm:$0xff]  }
  0x8f   :  { %7568 = vmatpush3.bf16.msra.mxu1 %v8598_v45  ;;  %2973 = vmatmul.mubr.bf16.gmra.mrb[52].mxu0 %v8650_v25  ;;  %v8673_v45 = vld [vmem:[%s11187_s0 + $0x2c0] ss:$108 sps:$4 sm:$0xff]  }
  0x90   :  { %7569 = vmatprep.subr.bf16.mxu1 %v8604_v50  ;;  %7686 = vmatpush3.bf16.msra.mxu0 %v8652_v27  ;;  %v8679_v50 = vld [vmem:[%s11188_s1 + $0x570] sm:$0xff]   ;;  %v8720_v25 = vld [vmem:[%s11187_s0 + $0x200] ss:$108 sps:$4 sm:$0xff]  }
  0x91   :  { %7687 = vmatprep.subr.bf16.mxu0 %v8655_v30  ;;  %2980 = vmatprep.mubr.bf16.mxu0 %v8661_v35  ;;  %v8721_v27 = vld [vmem:[%s11188_s1 + $0x660] sm:$0xff]   ;;  %v8723_v30 = vld [vmem:[%s11188_s1 + $0x5e8] sm:$0xff]  }
  0x92   :  { %2786 = vmatmul.mubr.bf16.gmra.mrb[56].mxu1 %v8603_v49  ;;  %v8678_v49 = vld [vmem:[%s11187_s0 + $0x2c8] ss:$108 sps:$4 sm:$0xff]  }
  0x93   :  { %7570 = vmatpush3.bf16.msra.mxu1 %v8607_v52  ;;  %2793 = vmatprep.mubr.bf16.mxu1 %v8614_v59  ;;  %v8681_v52 = vld [vmem:[%s11188_s1 + $0x4f8] sm:$0xff]   ;;  %v8726_v35 = vld [vmem:[%s11187_s0 + $0x2d4] ss:$108 sps:$4 sm:$0xff]  }
  0x94   :  { %7571 = vmatprep.subr.bf16.mxu1 %v8611_v56  ;;  %7688 = vmatpush3.bf16.msra.mxu0 %v8658_v32  ;;  %v8686_v56 = vld [vmem:[%s11187_s0 + $0x4c] ss:$108 sps:$4 sm:$0xff]   ;;  %v8689_v59 = vld [vmem:[%s11187_s0 + $0x50] ss:$108 sps:$4 sm:$0xff]  }
  0x95   :  { %7689 = vmatprep.subr.bf16.mxu0 %v8665_v38  ;;  %v8728_v38 = vld [vmem:[%s11188_s1 + $0x628] sm:$0xff]  }
  0x97   :  { %7572 = vmatpush3.bf16.msra.mxu1 %v8612_v57  ;;  %2981 = vmatmul.mubr.bf16.gmra.mrb[56].mxu0 %v8664_v37  ;;  %v8687_v57 = vld [vmem:[%s11188_s1 + $0x538] sm:$0xff]  }
  0x98   :  { %7573 = vmatprep.subr.bf16.mxu1 %v8618_v62  ;;  %7690 = vmatpush3.bf16.msra.mxu0 %v8666_v39  ;;  %v8693_v62 = vld [vmem:[%s11188_s1 + $0x640] sm:$0xff]  }
  0x99   :  { %7691 = vmatprep.subr.bf16.mxu0 %v8669_v42  ;;  %2988 = vmatprep.mubr.bf16.mxu0 %v8675_v47  ;;  %v8730_v42 = vld [vmem:[%s11188_s1 + $0x5f0] sm:$0xff]  }
  0x9a   :  { %2794 = vmatmul.mubr.bf16.gmra.mrb[60].mxu1 %v8617_v61  ;;  %v8692_v61 = vld [vmem:[%s11188_s1 + $0x580] sm:$0xff]  }
  0x9b   :  { %7574 = vmatpush3.bf16.msra.mxu1 %v8621_v0  ;;  %2899 = vmatprep.mubr.bf16.mxu1 %v8630_v8  ;;  %v8695_v0 = vld [vmem:[%s11188_s1 + $0x5c8] sm:$0xff]   ;;  %v8705_v8 = vld [vmem:[%s11188_s1 + $0x590] sm:$0xff]  }
  0x9c   :  { %7575 = vmatprep.subr.bf16.mxu1 %v8625_v4  ;;  %7692 = vmatpush3.bf16.msra.mxu0 %v8672_v44  ;;  %v8700_v4 = vld [vmem:[%s11188_s1 + $0x608] sm:$0xff]   ;;  %v8733_v44 = vld [vmem:[%s11188_s1 + $0x5b0] sm:$0xff]  }
  0x9d   :  { %7693 = vmatprep.subr.bf16.mxu0 %v8679_v50  ;;  %v8737_v50 = vld [vmem:[%s11188_s1 + $0x5f8] sm:$0xff]  }
  0x9f   :  { %7576 = vmatpush3.bf16.msra.mxu1 %v8626_v5  ;;  %2989 = vmatmul.mubr.bf16.gmra.mrb[60].mxu0 %v8678_v49  ;;  %v8701_v5 = vld [vmem:[%s11187_s0 + $0x120] ss:$108 sps:$4 sm:$0xff]  }
  0xa0   :  { %7641 = vmatprep.subr.bf16.mxu1 %v8632_v10  ;;  %7694 = vmatpush3.bf16.msra.mxu0 %v8680_v51  ;;  %v8707_v10 = vld [vmem:[%s11188_s1 + $0x650] sm:$0xff]  }
  0xa1   :  { %7695 = vmatprep.subr.bf16.mxu0 %v8683_v54  ;;  %3094 = vmatprep.mubr.bf16.mxu0 %v8691_v60  ;;  %v8744_v60 = vld [vmem:[%s11188_s1 + $0x680] sm:$0xff]  }
  0xa2   :  { %2900 = vmatmul.mubr.bf16.vlgmr.msra.gmra.mrb[64].mxu1 %v8628_v7  ;;  %v8703_v7 = vld [vmem:[%s11187_s0 + $0x12c] ss:$108 sps:$4 sm:$0xff]  }
  0xa3   :  { %7642 = vmatpush3.bf16.msra.mxu1 %v8636_v13  ;;  %2907 = vmatprep.mubr.bf16.mxu1 %v8642_v19  ;;  %v8710_v13 = vld [vmem:[%s11188_s1 + $0x598] sm:$0xff]   ;;  %v8716_v19 = vld [vmem:[%s11188_s1 + $0x5e0] sm:$0xff]  }
  0xa4   :  { %7643 = vmatprep.subr.bf16.mxu1 %v8639_v16  ;;  %7696 = vmatpush3.bf16.msra.mxu0 %v8687_v57  ;;  %v8714_v16 = vld [vmem:[%s11188_s1 + $0x618] sm:$0xff]  }
  0xa5   :  { %7761 = vmatprep.subr.bf16.mxu0 %v8693_v62  ;;  %v8740_v57 = vld [vmem:[%s11187_s0 + $0x58] ss:$108 sps:$4 sm:$0xff]  }
  0xa7   :  { %7644 = vmatpush3.bf16.msra.mxu1 %v8640_v17  ;;  %3095 = vmatmul.mubr.bf16.vlgmr.msra.gmra.mrb[64].mxu0 %v8689_v59  ;;  %v8715_v17 = vld [vmem:[%s11187_s0 + $0x1f8] ss:$108 sps:$4 sm:$0xff]  }
  0xa8   :  { %7645 = vmatprep.subr.bf16.mxu1 %v8646_v22  ;;  %7762 = vmatpush3.bf16.msra.mxu0 %v8694_v63  ;;  %v8743_v59 = vld [vmem:[%s11188_s1 + $0x638] sm:$0xff]   ;;  %v8747_v63 = vld [vmem:[%s11187_s0 + $0x64] ss:$108 sps:$4 sm:$0xff]  }
  0xa9   :  { %7763 = vmatprep.subr.bf16.mxu0 %v8697_v2  ;;  %3102 = vmatprep.mubr.bf16.mxu0 %v8703_v7 }
  0xaa   :  { %2908 = vmatmul.mubr.bf16.gmra.mrb[68].mxu1 %v8645_v21  ;;  %v8717_v21 = vld [vmem:[%s11187_s0 + $0x204] ss:$108 sps:$4 sm:$0xff]  }
  0xab   :  { %7646 = vmatpush3.bf16.msra.mxu1 %v8649_v24  ;;  %2915 = vmatprep.mubr.bf16.mxu1 %v8656_v31  ;;  %v8719_v24 = vld [vmem:[%s11188_s1 + $0x5a0] sm:$0xff]   ;;  %v8724_v31 = vld [vmem:[%s11188_s1 + $0x5a8] sm:$0xff]  }
  0xac   :  { %7647 = vmatprep.subr.bf16.mxu1 %v8653_v28  ;;  %7764 = vmatpush3.bf16.msra.mxu0 %v8700_v4  ;;  %v8751_v4 = vld [vmem:[%s11187_s0 + $0x130] ss:$108 sps:$4 sm:$0xff]  }
  0xad   :  { %7765 = vmatprep.subr.bf16.mxu0 %v8707_v10 }
  0xaf   :  { %7648 = vmatpush3.bf16.msra.mxu1 %v8654_v29  ;;  %3103 = vmatmul.mubr.bf16.gmra.mrb[68].mxu0 %v8706_v9  ;;  %v8722_v29 = vld [vmem:[%s11188_s1 + $0x620] sm:$0xff]   ;;  %v8753_v9 = vld [vmem:[%s11187_s0 + $0x13c] ss:$108 sps:$4 sm:$0xff]  }
  0xb0   :  { %7649 = vmatprep.subr.bf16.mxu1 %v8660_v34  ;;  %7766 = vmatpush3.bf16.msra.mxu0 %v8708_v11 }
  0xb1   :  { %7767 = vmatprep.subr.bf16.mxu0 %v8711_v14  ;;  %3110 = vmatprep.mubr.bf16.mxu0 %v8717_v21  ;;  %v8760_v21 = vld [vmem:[%s11188_s1 + $0x6a0] sm:$0xff]  }
  0xb2   :  { %2916 = vmatmul.mubr.bf16.gmra.mrb[72].mxu1 %v8659_v33  ;;  %v8725_v33 = vld [vmem:[%s11188_s1 + $0x668] sm:$0xff]  }
  0xb3   :  { %7650 = vmatpush3.bf16.msra.mxu1 %v8663_v36  ;;  %2923 = vmatprep.mubr.bf16.mxu1 %v8670_v43  ;;  %v8731_v43 = vld [vmem:[%s11187_s0 + $0x2dc] ss:$108 sps:$4 sm:$0xff]  }
  0xb4   :  { %7651 = vmatprep.subr.bf16.mxu1 %v8667_v40  ;;  %7768 = vmatpush3.bf16.msra.mxu0 %v8714_v16  ;;  %v8729_v40 = vld [vmem:[%s11187_s0 + $0x2d0] ss:$108 sps:$4 sm:$0xff]  }
  0xb5   :  { %7769 = vmatprep.subr.bf16.mxu0 %v8721_v27 }
  0xb7   :  { %7652 = vmatpush3.bf16.msra.mxu1 %v8668_v41  ;;  %3111 = vmatmul.mubr.bf16.gmra.mrb[72].mxu0 %v8720_v25  ;;  %v8765_v25 = vld [vmem:[%s11187_s0 + $0x2e4] ss:$108 sps:$4 sm:$0xff]  }
  0xb8   :  { %7653 = vmatprep.subr.bf16.mxu1 %v8674_v46  ;;  %7770 = vmatpush3.bf16.msra.mxu0 %v8722_v29  ;;  %v8735_v46 = vld [vmem:[%s11188_s1 + $0x670] sm:$0xff]  }
  0xb9   :  { %7771 = vmatprep.subr.bf16.mxu0 %v8725_v33  ;;  %3118 = vmatprep.mubr.bf16.mxu0 %v8731_v43 }
  0xba   :  { %2924 = vmatmul.mubr.bf16.gmra.mrb[76].mxu1 %v8673_v45  ;;  %v8734_v45 = vld [vmem:[%s11187_s0 + $0x2d8] ss:$108 sps:$4 sm:$0xff]  }
  0xbb   :  { %7654 = vmatpush3.bf16.msra.mxu1 %v8677_v48  ;;  %3029 = vmatprep.mubr.bf16.mxu1 %v8686_v56  ;;  %v8736_v48 = vld [vmem:[%s11188_s1 + $0x630] sm:$0xff]  }
  0xbc   :  { %7655 = vmatprep.subr.bf16.mxu1 %v8681_v52  ;;  %7772 = vmatpush3.bf16.msra.mxu0 %v8728_v38 }
  0xbd   :  { %7773 = vmatprep.subr.bf16.mxu0 %v8735_v46 }
  0xbf   :  { %7656 = vmatpush3.bf16.msra.mxu1 %v8682_v53  ;;  %3119 = vmatmul.mubr.bf16.gmra.mrb[76].mxu0 %v8734_v45  ;;  %v8738_v53 = vld [vmem:[%s11188_s1 + $0x5b8] sm:$0xff]  }
  0xc0   :  { %7721 = vmatprep.subr.bf16.mxu1 %v8688_v58  ;;  %7774 = vmatpush3.bf16.msra.mxu0 %v8736_v48  ;;  %v8742_v58 = vld [vmem:[%s11187_s0 + $0x5c] ss:$108 sps:$4 sm:$0xff]  }
  0xc1   :  { %3224 = vmatprep.mubr.bf16.mxu0 %v8747_v63  ;;  %v8772_v45 = vld [vmem:[%s11188_s1 + $0x6b8] sm:$0xff]  }
  0xc2   :  { %3030 = vmatmul.mubr.bf16.vlgmr.msra.gmra.mrb[80].mxu1 %v8684_v55  ;;  %v8739_v55 = vld [vmem:[%s11188_s1 + $0x678] sm:$0xff]  }
  0xc3   :  { %7722 = vmatpush3.bf16.msra.mxu1 %v8692_v61  ;;  %3037 = vmatprep.mubr.bf16.mxu1 %v8698_v3  ;;  %v8745_v61 = vld [vmem:[%s11187_s0 + $0x60] ss:$108 sps:$4 sm:$0xff]  }
  0xc4   :  { %7723 = vmatprep.subr.bf16.mxu1 %v8695_v0  ;;  %7775 = vmatprep.subr.bf16.mxu0 %v8739_v55  ;;  %v8748_v0 = vld [vmem:[%s11188_s1 + $0x688] sm:$0xff]   ;;  %v8749_v3 = vld [vmem:[%s11187_s0 + $0x134] ss:$108 sps:$4 sm:$0xff]  }
  0xc5   :  { %7776 = vmatpush3.bf16.msra.mxu0 %v8743_v59 }
  0xc7   :  { %7724 = vmatpush3.bf16.msra.mxu1 %v8696_v1 }
  0xc8   :  { %7725 = vmatprep.subr.bf16.mxu1 %v8702_v6  ;;  %3225 = vmatmul.mubr.bf16.vlgmr.msra.gmra.mrb[80].mxu0 %v8745_v61  ;;  %v8752_v6 = vld [vmem:[%s11188_s1 + $0x690] sm:$0xff]  }
  0xc9   :  { %3232 = vmatprep.mubr.bf16.mxu0 %v8753_v9 }
  0xca   :  { %3038 = vmatmul.mubr.bf16.gmra.mrb[84].mxu1 %v8701_v5 }
  0xcb   :  { %7726 = vmatpush3.bf16.msra.mxu1 %v8705_v8  ;;  %3045 = vmatprep.mubr.bf16.mxu1 %v8712_v15  ;;  %v8757_v15 = vld [vmem:[%s11187_s0 + $0x20c] ss:$108 sps:$4 sm:$0xff]  }
  0xcc   :  { %7727 = vmatprep.subr.bf16.mxu1 %v8709_v12  ;;  %v8756_v12 = vld [vmem:[%s11188_s1 + $0x698] sm:$0xff]  }
  0xcf   :  { %7728 = vmatpush3.bf16.msra.mxu1 %v8710_v13 }
  0xd0   :  { %7729 = vmatprep.subr.bf16.mxu1 %v8716_v19 }
  0xd2   :  { %3046 = vmatmul.mubr.bf16.gmra.mrb[88].mxu1 %v8715_v17  ;;  %v8755_v17 = vld [vmem:[%s11187_s0 + $0x138] ss:$108 sps:$4 sm:$0xff]  }
  0xd3   :  { %7730 = vmatpush3.bf16.msra.mxu1 %v8719_v24  ;;  %3053 = vmatprep.mubr.bf16.mxu1 %v8726_v35  ;;  %v8759_v24 = vld [vmem:[%s11187_s0 + $0x208] ss:$108 sps:$4 sm:$0xff]  }
  0xd4   :  { %7731 = vmatprep.subr.bf16.mxu1 %v8723_v30  ;;  %3233 = vmatmul.mubr.bf16.gmra.mrb[84].mxu0 %v8755_v17  ;;  %v8763_v30 = vld [vmem:[%s11187_s0 + $0x210] ss:$108 sps:$4 sm:$0xff]  }
  0xd7   :  { %7732 = vmatpush3.bf16.msra.mxu1 %v8724_v31 }
  0xd8   :  { %7733 = vmatprep.subr.bf16.mxu1 %v8730_v42  ;;  %v8773_v42 = vld [vmem:[%s11187_s0 + $0x68] ss:$108 sps:$4 sm:$0xff]  }
  0xda   :  { %3054 = vmatmul.mubr.bf16.gmra.mrb[92].mxu1 %v8729_v40 }
  0xdb   :  { %7734 = vmatpush3.bf16.msra.mxu1 %v8733_v44  ;;  %3159 = vmatprep.mubr.bf16.mxu1 %v8742_v58 }
  0xdc   :  { %7735 = vmatprep.subr.bf16.mxu1 %v8737_v50  ;;  %v8771_v50 = vld [vmem:[%s11187_s0 + $0x2e8] ss:$108 sps:$4 sm:$0xff]  }
  0xdf   :  { %7736 = vmatpush3.bf16.msra.mxu1 %v8738_v53 }
  0xe0   :  { %7977 = vmatprep.subr.bf16.mxu1 %v8744_v60 }
  0xe2   :  { %3160 = vmatmul.mubr.bf16.vlgmr.msra.gmra.mrb[96].mxu1 %v8740_v57 }
  0xe3   :  { %7978 = vmatpush3.bf16.msra.mxu1 %v8744_v60  ;;  %3167 = vmatprep.mubr.bf16.mxu1 %v8749_v3 }
  0xe4   :  { %7979 = vmatprep.subr.bf16.mxu1 %v8748_v0 }
  0xe7   :  { %7980 = vmatpush3.bf16.msra.mxu1 %v8748_v0 }
  0xe8   :  { %7981 = vmatprep.subr.bf16.mxu1 %v8752_v6 }
  0xea   :  { %3168 = vmatmul.mubr.bf16.gmra.mrb[100].mxu1 %v8751_v4 }
  0xeb   :  { %3175 = vmatprep.mubr.bf16.mxu1 %v8757_v15  ;;  %7982 = vmatpush3.bf16.msra.mxu1 %v8752_v6 }
  0xec   :  { %7983 = vmatprep.subr.bf16.mxu1 %v8756_v12 }
  0xef   :  { %7984 = vmatpush3.bf16.msra.mxu1 %v8756_v12 }
  0xf0   :  { %7985 = vmatprep.subr.bf16.mxu1 %v8760_v21 }
  0xf2   :  { %3176 = vmatmul.mubr.bf16.gmra.mrb[104].mxu1 %v8759_v24 }
  0xf3   :  { %3183 = vmatprep.mubr.bf16.mxu1 %v8765_v25  ;;  %7986 = vmatpush3.bf16.msra.mxu1 %v8760_v21  ;;  %v8776_v21 = vld [vmem:[%s11187_s0 + $0x2f0] ss:$108 sps:$4 sm:$0xff]  }
  0xf5   :  { %v7297_v18 = vpop.f32.mrb[0].mxu1 }
  0xf6   :  { %v7298_v20 = vpop.f32.mrb[1].mxu1 }
  0xf7   :  { %v9962_v22 = vadd.f32 %v7298_v20, %v7297_v18  ;;  %v7300_v23 = vpop.f32.mrb[2].mxu1  ;;  %v8761_v20 = vld [vmem:[%s11187_s0 + $0x214] ss:$108 sps:$4 sm:$0xff]  }
  0xf8   :  { %v7301_v26 = vpop.f32.mrb[3].mxu1  ;;  %3240 = vmatprep.mubr.bf16.mxu0 %v8761_v20 }
  0xf9   :  { %v9973_v28 = vadd.f32 %v7301_v26, %v7300_v23  ;;  %3241 = vmatmul.mubr.bf16.gmra.mrb[88].mxu0 %v8763_v30 }
  0xfa   :  { %v7377_v2 = vpop.f32.mrb[0].mxu0 }
  0xfb   :  { %v7378_v8 = vpop.f32.mrb[1].mxu0 }
  0xfc   :  { %v7379_v11 = vadd.f32 %v7378_v8, %v7377_v2  ;;  %v7380_v14 = vpop.f32.mrb[2].mxu0 }
  0xfd   :  { %v7303_v32 = vpop.f32.mrb[4].mxu1  ;;  %v7381_v16 = vpop.f32.mrb[3].mxu0 }
  0xfe   :  { %v7304_v34 = vpop.f32.mrb[5].mxu1  ;;  %v7382_v18 = vadd.f32 %v7381_v16, %v7380_v14 }
  0xff   :  { %v9990_v36 = vadd.f32 %v7304_v34, %v7303_v32  ;;  %v7306_v37 = vpop.f32.mrb[6].mxu1  ;;  %v8764_v34 = vld [vmem:[%s11188_s1 + $0x6a8] sm:$0xff]  }
 0x100   :  { %v7307_v39 = vpop.f32.mrb[7].mxu1  ;;  %7987 = vmatprep.subr.bf16.mxu1 %v8764_v34 }
 0x101   :  { %v9998_v41 = vadd.f32 %v7307_v39, %v7306_v37  ;;  %v8769_v39 = vld [vmem:[%s11187_s0 + $0x2ec] ss:$108 sps:$4 sm:$0xff]   ;;  %7988 = vmatpush3.bf16.msra.mxu1 %v8764_v34 }
 0x102   :  { %v7383_v33 = vpop.f32.mrb[4].mxu0  ;;  %3248 = vmatprep.mubr.bf16.mxu0 %v8769_v39 }
 0x103   :  { %v7384_v44 = vpop.f32.mrb[5].mxu0  ;;  %3249 = vmatmul.mubr.bf16.gmra.mrb[92].mxu0 %v8771_v50 }
 0x104   :  { %v7385_v48 = vadd.f32 %v7384_v44, %v7383_v33 }
 0x105   :  { %v7309_v47 = vpop.f32.mrb[8].mxu1 }
 0x106   :  { %v7310_v49 = vpop.f32.mrb[9].mxu1 }
 0x107   :  { %v10021_v51 = vadd.f32 %v7310_v49, %v7309_v47  ;;  %v7312_v52 = vpop.f32.mrb[10].mxu1  ;;  %v7386_v49 = vpop.f32.mrb[6].mxu0 }
 0x108   :  { %v7313_v54 = vpop.f32.mrb[11].mxu1  ;;  %v7387_v53 = vpop.f32.mrb[7].mxu0 }
 0x109   :  { %v10029_v56 = vadd.f32 %v7313_v54, %v7312_v52  ;;  %v7388_v57 = vadd.f32 %v7387_v53, %v7386_v49 }
 0x10a   :  { %v7389_v58 = vpop.f32.mrb[8].mxu0 }
 0x10b   :  { %v7390_v60 = vpop.f32.mrb[9].mxu0 }
 0x10c   :  { %v7391_v0 = vadd.f32 %v7390_v60, %v7389_v58 }
 0x10d   :  { %v7315_v62 = vpop.f32.mrb[12].mxu1 }
 0x10e   :  { %v7316_v1 = vpop.f32.mrb[13].mxu1 }
 0x10f   :  { %v10058_v5 = vadd.f32 %v7316_v1, %v7315_v62  ;;  %v7318_v7 = vpop.f32.mrb[14].mxu1  ;;  %v7392_v1 = vpop.f32.mrb[10].mxu0 }
 0x110   :  { %v7319_v10 = vpop.f32.mrb[15].mxu1  ;;  %v7393_v4 = vpop.f32.mrb[11].mxu0 }
 0x111   :  { %v10069_v13 = vadd.f32 %v7319_v10, %v7318_v7  ;;  %v7394_v8 = vadd.f32 %v7393_v4, %v7392_v1 }
 0x112   :  { %v7395_v17 = vpop.f32.mrb[12].mxu0 }
 0x113   :  { %v7396_v20 = vpop.f32.mrb[13].mxu0 }
 0x114   :  { %v7398_v24 = vpop.f32.mrb[14].mxu0 }
 0x115   :  { %v7337_v19 = vpop.f32.mrb[16].mxu1 }
 0x116   :  { %v7338_v23 = vpop.f32.mrb[17].mxu1 }
 0x117   :  { %v7339_v26 = vadd.f32 %v7338_v23, %v7337_v19  ;;  %v7340_v27 = vpop.f32.mrb[18].mxu1  ;;  %v7397_v23 = vadd.f32 %v7396_v20, %v7395_v17 }
 0x118   :  { %v7341_v29 = vpop.f32.mrb[19].mxu1 }
 0x119   :  { %v2512_v31 = vadd.f32 %v7339_v26, %v9962_v22  ;;  %v7342_v32 = vadd.f32 %v7341_v29, %v7340_v27  ;;  %v8767_v22 = vld [vmem:[%s11187_s0 + $0x2e0] ss:$108 sps:$4 sm:$0xff]   ;;  %v7399_v26 = vpop.f32.mrb[15].mxu0 }
 0x11a   :  { %3184 = vmatmul.mubr.bf16.gmra.mrb[108].mxu1 %v8767_v22  ;;  %v7400_v27 = vadd.f32 %v7399_v26, %v7398_v24 }
 0x11b   :  { %v2515_v35 = vadd.f32 %v7342_v32, %v9973_v28  ;;  %v10097_v37 = vadd.f32 %v7379_v11, %v2512_v31  ;;  %v8768_v28 = vld [vmem:[%s11188_s1 + $0x6b0] sm:$0xff]   ;;  %7993 = vmatprep.mubr.bf16.mxu1 %v8773_v42 }
 0x11c   :  { %7989 = vmatprep.subr.bf16.mxu1 %v8768_v28 }
 0x11d   :  { %v7343_v38 = vpop.f32.mrb[20].mxu1  ;;  %v10105_v40 = vadd.f32 %v7382_v18, %v2515_v35  ;;  %7990 = vmatpush3.bf16.msra.mxu1 %v8768_v28 }
 0x11e   :  { %v7344_v43 = vpop.f32.mrb[21].mxu1  ;;  %7991 = vmatprep.subr.bf16.mxu1 %v8772_v45 }
 0x11f   :  { %v7345_v46 = vadd.f32 %v7344_v43, %v7343_v38  ;;  %v7346_v47 = vpop.f32.mrb[22].mxu1  ;;  %v7457_v38 = vpop.f32.mrb[16].mxu0 }
 0x120   :  { %v7347_v52 = vpop.f32.mrb[23].mxu1  ;;  %v7458_v42 = vpop.f32.mrb[17].mxu0 }
 0x121   :  { %v2520_v54 = vadd.f32 %v7345_v46, %v9990_v36  ;;  %v7348_v55 = vadd.f32 %v7347_v52, %v7346_v47  ;;  %v8774_v36 = vld [vmem:[%s11187_s0 + $0x140] ss:$108 sps:$4 sm:$0xff]   ;;  %7992 = vmatpush3.bf16.msra.mxu1 %v8772_v45  ;;  %v7459_v43 = vadd.f32 %v7458_v42, %v7457_v38 }
 0x123   :  { %v2523_v61 = vadd.f32 %v7348_v55, %v9998_v41  ;;  %v2585_v62 = vadd.f32 %v7385_v48, %v2520_v54  ;;  %v8775_v41 = vld [vmem:[%s11187_s0 + $0x218] ss:$108 sps:$4 sm:$0xff]  }
 0x124   :  { %7994 = vmatmul.mubr.bf16.vlgmr.msra.gmra.mrb[112].mxu1 %v8774_v36 }
 0x125   :  { %v7349_v59 = vpop.f32.mrb[24].mxu1  ;;  %v2588_v6 = vadd.f32 %v7388_v57, %v2523_v61  ;;  %7997 = vmatprep.mubr.bf16.mxu1 %v8775_v41 }
 0x126   :  { %v7350_v63 = vpop.f32.mrb[25].mxu1 }
 0x127   :  { %v7351_v2 = vadd.f32 %v7350_v63, %v7349_v59  ;;  %v7352_v3 = vpop.f32.mrb[26].mxu1 }
 0x128   :  { %v7353_v7 = vpop.f32.mrb[27].mxu1 }
 0x129   :  { %v2528_v9 = vadd.f32 %v7351_v2, %v10021_v51  ;;  %v7354_v10 = vadd.f32 %v7353_v7, %v7352_v3 }
 0x12b   :  { %v2531_v11 = vadd.f32 %v7354_v10, %v10029_v56  ;;  %v2593_v12 = vadd.f32 %v7391_v0, %v2528_v9 }
 0x12c   :  { %7998 = vmatmul.mubr.bf16.gmra.mrb[116].mxu1 %v8776_v21 }
 0x12d   :  { %v10129_v14 = vadd.f32 %v7394_v8, %v2531_v11  ;;  %v7355_v15 = vpop.f32.mrb[28].mxu1 }
 0x12e   :  { %v7356_v16 = vpop.f32.mrb[29].mxu1 }
 0x12f   :  { %v7357_v18 = vadd.f32 %v7356_v16, %v7355_v15  ;;  %v7358_v19 = vpop.f32.mrb[30].mxu1 }
 0x130   :  { %v7359_v51 = vpop.f32.mrb[31].mxu1 }
 0x131   :  { %v2536_v56 = vadd.f32 %v7357_v18, %v10058_v5  ;;  %v7360_v25 = vadd.f32 %v7359_v51, %v7358_v19  ;;  %v7460_v5 = vpop.f32.mrb[18].mxu0 }
 0x132   :  { %v7461_v45 = vpop.f32.mrb[19].mxu0 }
 0x133   :  { %v2539_v29 = vadd.f32 %v7360_v25, %v10069_v13  ;;  %v2601_v30 = vadd.f32 %v7397_v23, %v2536_v56  ;;  %v7462_v13 = vadd.f32 %v7461_v45, %v7460_v5  ;;  %v7463_v55 = vpop.f32.mrb[20].mxu0 }
 0x134   :  { %v7464_v58 = vpop.f32.mrb[21].mxu0 }
 0x135   :  { %v2604_v31 = vadd.f32 %v7400_v27, %v2539_v29  ;;  %v7417_v32 = vpop.f32.mrb[32].mxu1  ;;  %v7465_v59 = vadd.f32 %v7464_v58, %v7463_v55  ;;  %v7466_v60 = vpop.f32.mrb[22].mxu0 }
 0x136   :  { %v7418_v33 = vpop.f32.mrb[33].mxu1  ;;  %v7467_v61 = vpop.f32.mrb[23].mxu0 }
 0x137   :  { %v7419_v34 = vadd.f32 %v7418_v33, %v7417_v32  ;;  %v7420_v35 = vpop.f32.mrb[34].mxu1  ;;  %v7468_v0 = vadd.f32 %v7467_v61, %v7466_v60  ;;  %v7469_v36 = vpop.f32.mrb[24].mxu0 }
 0x138   :  { %v7421_v39 = vpop.f32.mrb[35].mxu1  ;;  %v7470_v9 = vpop.f32.mrb[25].mxu0 }
 0x139   :  { %v2642_v22 = vadd.f32 %v7419_v34, %v10097_v37  ;;  %v7422_v28 = vadd.f32 %v7421_v39, %v7420_v35  ;;  %v7472_v10 = vpop.f32.mrb[26].mxu0 }
 0x13b   :  { %v2645_v44 = vadd.f32 %v7422_v28, %v10105_v40  ;;  %v2707_v46 = vadd.f32 %v7459_v43, %v2642_v22 }
 0x13d   :  { %v2710_v47 = vadd.f32 %v7462_v13, %v2645_v44  ;;  %v7423_v48 = vpop.f32.mrb[36].mxu1 }
 0x13e   :  { %v7424_v49 = vpop.f32.mrb[37].mxu1 }
 0x13f   :  { %v7425_v50 = vadd.f32 %v7424_v49, %v7423_v48  ;;  %v7426_v52 = vpop.f32.mrb[38].mxu1 }
 0x140   :  { %v7427_v53 = vpop.f32.mrb[39].mxu1 }
 0x141   :  { %v2650_v54 = vadd.f32 %v7425_v50, %v2585_v62  ;;  %v7428_v57 = vadd.f32 %v7427_v53, %v7426_v52  ;;  %v7471_v62 = vadd.f32 %v7470_v9, %v7469_v36 }
 0x143   :  { %v2653_v37 = vadd.f32 %v7428_v57, %v2588_v6  ;;  %v2715_v63 = vadd.f32 %v7465_v59, %v2650_v54  ;;  %v7473_v6 = vpop.f32.mrb[27].mxu0 }
 0x144   :  { %v7474_v16 = vadd.f32 %v7473_v6, %v7472_v10  ;;  %v7475_v51 = vpop.f32.mrb[28].mxu0 }
 0x145   :  { %v2718_v40 = vadd.f32 %v7468_v0, %v2653_v37  ;;  %v7429_v1 = vpop.f32.mrb[40].mxu1  ;;  %v7476_v25 = vpop.f32.mrb[29].mxu0 }
 0x146   :  { %v7430_v2 = vpop.f32.mrb[41].mxu1  ;;  %v7478_v26 = vpop.f32.mrb[30].mxu0 }
 0x147   :  { %v7431_v3 = vadd.f32 %v7430_v2, %v7429_v1  ;;  %v7432_v4 = vpop.f32.mrb[42].mxu1  ;;  %v7479_v29 = vpop.f32.mrb[31].mxu0 }
 0x148   :  { %v7433_v7 = vpop.f32.mrb[43].mxu1  ;;  %v7480_v33 = vadd.f32 %v7479_v29, %v7478_v26  ;;  %v7537_v42 = vpop.f32.mrb[32].mxu0 }
 0x149   :  { %v2658_v8 = vadd.f32 %v7431_v3, %v2593_v12  ;;  %v7434_v41 = vadd.f32 %v7433_v7, %v7432_v4  ;;  %v7477_v12 = vadd.f32 %v7476_v25, %v7475_v51  ;;  %v7538_v5 = vpop.f32.mrb[33].mxu0 }
 0x14a   :  { %v7540_v45 = vpop.f32.mrb[34].mxu0 }
 0x14b   :  { %v2661_v11 = vadd.f32 %v7434_v41, %v10129_v14  ;;  %v2723_v15 = vadd.f32 %v7471_v62, %v2658_v8  ;;  %v7541_v13 = vpop.f32.mrb[35].mxu0 }
 0x14c   :  { %v7542_v49 = vadd.f32 %v7541_v13, %v7540_v45  ;;  %v7543_v55 = vpop.f32.mrb[36].mxu0 }
 0x14d   :  { %v2726_v17 = vadd.f32 %v7474_v16, %v2661_v11  ;;  %v7435_v18 = vpop.f32.mrb[44].mxu1 }
 0x14e   :  { %v7436_v19 = vpop.f32.mrb[45].mxu1 }
 0x14f   :  { %v7437_v20 = vadd.f32 %v7436_v19, %v7435_v18  ;;  %v7438_v21 = vpop.f32.mrb[46].mxu1 }
 0x150   :  { %v7439_v23 = vpop.f32.mrb[47].mxu1 }
 0x151   :  { %v2666_v24 = vadd.f32 %v7437_v20, %v2601_v30  ;;  %v7440_v56 = vadd.f32 %v7439_v23, %v7438_v21  ;;  %v7539_v30 = vadd.f32 %v7538_v5, %v7537_v42 }
 0x153   :  { %v2669_v27 = vadd.f32 %v7440_v56, %v2604_v31  ;;  %v2731_v32 = vadd.f32 %v7477_v12, %v2666_v24 }
 0x155   :  { %v2734_v14 = vadd.f32 %v7480_v33, %v2669_v27  ;;  %v7497_v34 = vpop.f32.mrb[48].mxu1 }
 0x156   :  { %v7498_v35 = vpop.f32.mrb[49].mxu1 }
 0x157   :  { %v7499_v38 = vadd.f32 %v7498_v35, %v7497_v34  ;;  %v7500_v39 = vpop.f32.mrb[50].mxu1 }
 0x158   :  { %v7501_v22 = vpop.f32.mrb[51].mxu1 }
 0x159   :  { %v2772_v28 = vadd.f32 %v7499_v38, %v2707_v46  ;;  %v7502_v43 = vadd.f32 %v7501_v22, %v7500_v39  ;;  %v7544_v46 = vpop.f32.mrb[37].mxu0  ;;  %v9090_v39 = vmov 0.0  }
 0x15a   :  { %v7545_v59 = vadd.f32 %v7544_v46, %v7543_v55  ;;  %v7546_v60 = vpop.f32.mrb[38].mxu0  ;;  %8001 = vmatprep.subr.bf16.mxu1 %v9090_v39  ;;  %8013 = vmatprep.subr.bf16.mxu0 %v9090_v39 }
 0x15b   :  { %v2775_v44 = vadd.f32 %v7502_v43, %v2710_v47  ;;  %v2837_v48 = vadd.f32 %v7539_v30, %v2772_v28  ;;  %v7547_v47 = vpop.f32.mrb[39].mxu0 }
 0x15c   :  { %v7548_v1 = vadd.f32 %v7547_v47, %v7546_v60  ;;  %v7549_v8 = vpop.f32.mrb[40].mxu0 }
 0x15d   :  { %v10139_v31 = vadd.f32 %v7542_v49, %v2775_v44  ;;  %v7503_v50 = vpop.f32.mrb[52].mxu1 }
 0x15e   :  { %v7504_v52 = vpop.f32.mrb[53].mxu1 }
 0x15f   :  { %v7505_v53 = vadd.f32 %v7504_v52, %v7503_v50  ;;  %v7506_v54 = vpop.f32.mrb[54].mxu1 }
 0x160   :  { %v7507_v57 = vpop.f32.mrb[55].mxu1 }
 0x161   :  { %v2780_v58 = vadd.f32 %v7505_v53, %v2715_v63  ;;  %v7508_v37 = vadd.f32 %v7507_v57, %v7506_v54  ;;  %v7550_v63 = vpop.f32.mrb[41].mxu0 }
 0x162   :  { %v7551_v10 = vadd.f32 %v7550_v63, %v7549_v8  ;;  %v7552_v11 = vpop.f32.mrb[42].mxu0 }
 0x163   :  { %v2783_v61 = vadd.f32 %v7508_v37, %v2718_v40  ;;  %v10141_v0 = vadd.f32 %v7545_v59, %v2780_v58  ;;  %v7553_v16 = vpop.f32.mrb[43].mxu0 }
 0x164   :  { %v7554_v18 = vadd.f32 %v7553_v16, %v7552_v11  ;;  %v7555_v25 = vpop.f32.mrb[44].mxu0 }
 0x165   :  { %v10143_v2 = vadd.f32 %v7548_v1, %v2783_v61  ;;  %v7509_v3 = vpop.f32.mrb[56].mxu1 }
 0x166   :  { %v7510_v4 = vpop.f32.mrb[57].mxu1 }
 0x167   :  { %v7511_v36 = vadd.f32 %v7510_v4, %v7509_v3  ;;  %v7512_v7 = vpop.f32.mrb[58].mxu1 }
 0x168   :  { %v7513_v41 = vpop.f32.mrb[59].mxu1 }
 0x169   :  { %v2788_v9 = vadd.f32 %v7511_v36, %v2723_v15  ;;  %v7514_v62 = vadd.f32 %v7513_v41, %v7512_v7  ;;  %v7556_v15 = vpop.f32.mrb[45].mxu0 }
 0x16a   :  { %v7557_v27 = vadd.f32 %v7556_v15, %v7555_v25  ;;  %v7558_v29 = vpop.f32.mrb[46].mxu0 }
 0x16b   :  { %v2791_v6 = vadd.f32 %v7514_v62, %v2726_v17  ;;  %v10145_v40 = vadd.f32 %v7551_v10, %v2788_v9  ;;  %v7559_v33 = vpop.f32.mrb[47].mxu0 }
 0x16c   :  { %v7560_v34 = vadd.f32 %v7559_v33, %v7558_v29  ;;  %v7617_v42 = vpop.f32.mrb[48].mxu0 }
 0x16d   :  { %v10147_v19 = vadd.f32 %v7554_v18, %v2791_v6  ;;  %v7515_v20 = vpop.f32.mrb[60].mxu1  ;;  %v7618_v44 = vpop.f32.mrb[49].mxu0 }
 0x16e   :  { %v7516_v21 = vpop.f32.mrb[61].mxu1  ;;  %v7619_v30 = vadd.f32 %v7618_v44, %v7617_v42  ;;  %v7620_v45 = vpop.f32.mrb[50].mxu0 }
 0x16f   :  { %v7517_v51 = vadd.f32 %v7516_v21, %v7515_v20  ;;  %v7518_v23 = vpop.f32.mrb[62].mxu1  ;;  %v7621_v49 = vpop.f32.mrb[51].mxu0 }
 0x170   :  { %v7519_v24 = vpop.f32.mrb[63].mxu1  ;;  %v7622_v52 = vadd.f32 %v7621_v49, %v7620_v45 }
 0x171   :  { %v2796_v56 = vadd.f32 %v7517_v51, %v2731_v32  ;;  %v7520_v12 = vadd.f32 %v7519_v24, %v7518_v23 }
 0x173   :  { %v2799_v26 = vadd.f32 %v7520_v12, %v2734_v14  ;;  %v10149_v17 = vadd.f32 %v7557_v27, %v2796_v56 }
 0x175   :  { %v10151_v35 = vadd.f32 %v7560_v34, %v2799_v26  ;;  %v7577_v38 = vpop.f32.mrb[64].mxu1 }
 0x176   :  { %v7578_v22 = vpop.f32.mrb[65].mxu1 }
 0x177   :  { %v7579_v32 = vadd.f32 %v7578_v22, %v7577_v38  ;;  %v7580_v28 = vpop.f32.mrb[66].mxu1 }
 0x178   :  { %v7581_v43 = vpop.f32.mrb[67].mxu1 }
 0x179   :  { %v2902_v14 = vadd.f32 %v7579_v32, %v2837_v48  ;;  %v7582_v5 = vadd.f32 %v7581_v43, %v7580_v28 }
 0x17b   :  { %v2905_v13 = vadd.f32 %v7582_v5, %v10139_v31  ;;  %v2967_v50 = vadd.f32 %v7619_v30, %v2902_v14 }
 0x17d   :  { %v10156_v53 = vadd.f32 %v7622_v52, %v2905_v13 }
 0x17e   :  { %12 = vsyncpa [#allocation3], 0  ;;  %v7583_v54 = vpop.f32.mrb[68].mxu1  ;;  %vm9091_vm0 = vmmov 0   ;;  %v7623_v48 = vpop.f32.mrb[52].mxu0  ;;  %vm3341_vm1 = vcmask 523264  }
 0x17f   :  { %v7584_v55 = vpop.f32.mrb[69].mxu1  ;;  %8021 = vmatprep.mubr.msk.bf16.mxu0 %vm9091_vm0, %v9090_v39  ;;  %8009 = vmatprep.mubr.msk.bf16.mxu1 %vm9091_vm0, %v9090_v39  ;;  %v7624_v59 = vpop.f32.mrb[53].mxu0  ;;  %vm4782_vm2 = vcmask 130048  }
 0x180   :  { %v7585_v57 = vadd.f32 %v7584_v55, %v7583_v54  ;;  %v7586_v58 = vpop.f32.mrb[70].mxu1  ;;  %v7625_v60 = vadd.f32 %v7624_v59, %v7623_v48  ;;  %v7626_v61 = vpop.f32.mrb[54].mxu0 }
 0x181   :  { %v7587_v37 = vpop.f32.mrb[71].mxu1  ;;  %v7627_v1 = vpop.f32.mrb[55].mxu0 }
 0x182   :  { %v2910_v31 = vadd.f32 %v7585_v57, %v10141_v0  ;;  %v7588_v46 = vadd.f32 %v7587_v37, %v7586_v58  ;;  %v7628_v4 = vadd.f32 %v7627_v1, %v7626_v61  ;;  %v7629_v10 = vpop.f32.mrb[56].mxu0 }
 0x183   :  { %v7630_v0 = vpop.f32.mrb[57].mxu0 }
 0x184   :  { %v2913_v47 = vadd.f32 %v7588_v46, %v10143_v2  ;;  %v2975_v3 = vadd.f32 %v7625_v60, %v2910_v31  ;;  %v7631_v16 = vadd.f32 %v7630_v0, %v7629_v10  ;;  %v7632_v18 = vpop.f32.mrb[58].mxu0 }
 0x185   :  { %v7589_v7 = vpop.f32.mrb[72].mxu1  ;;  %v7633_v20 = vpop.f32.mrb[59].mxu0 }
 0x186   :  { %v2978_v36 = vadd.f32 %v7628_v4, %v2913_v47  ;;  %v7590_v8 = vpop.f32.mrb[73].mxu1  ;;  %v7634_v21 = vadd.f32 %v7633_v20, %v7632_v18  ;;  %v7635_v12 = vpop.f32.mrb[60].mxu0 }
 0x187   :  { %v7591_v41 = vadd.f32 %v7590_v8, %v7589_v7  ;;  %v7592_v9 = vpop.f32.mrb[74].mxu1  ;;  %v7636_v27 = vpop.f32.mrb[61].mxu0 }
 0x188   :  { %v7593_v62 = vpop.f32.mrb[75].mxu1  ;;  %v7637_v29 = vadd.f32 %v7636_v27, %v7635_v12  ;;  %v7638_v33 = vpop.f32.mrb[62].mxu0 }
 0x189   :  { %v2918_v63 = vadd.f32 %v7591_v41, %v10145_v40  ;;  %v7594_v11 = vadd.f32 %v7593_v62, %v7592_v9  ;;  %v7639_v34 = vpop.f32.mrb[63].mxu0 }
 0x18a   :  { %v7640_v22 = vadd.f32 %v7639_v34, %v7638_v33  ;;  %v7697_v5 = vpop.f32.mrb[64].mxu0 }
 0x18b   :  { %v2921_v6 = vadd.f32 %v7594_v11, %v10147_v19  ;;  %v2983_v2 = vadd.f32 %v7631_v16, %v2918_v63  ;;  %v7698_v13 = vpop.f32.mrb[65].mxu0 }
 0x18c   :  { %v7700_v49 = vpop.f32.mrb[66].mxu0 }
 0x18d   :  { %v2986_v51 = vadd.f32 %v7634_v21, %v2921_v6  ;;  %v7595_v23 = vpop.f32.mrb[76].mxu1  ;;  %v7701_v54 = vpop.f32.mrb[67].mxu0 }
 0x18e   :  { %v7596_v24 = vpop.f32.mrb[77].mxu1  ;;  %v7703_v60 = vpop.f32.mrb[68].mxu0 }
 0x18f   :  { %v7597_v56 = vadd.f32 %v7596_v24, %v7595_v23  ;;  %v7598_v25 = vpop.f32.mrb[78].mxu1  ;;  %v7704_v47 = vpop.f32.mrb[69].mxu0 }
 0x190   :  { %v7599_v15 = vpop.f32.mrb[79].mxu1  ;;  %v7705_v1 = vadd.f32 %v7704_v47, %v7703_v60  ;;  %v7706_v4 = vpop.f32.mrb[70].mxu0 }
 0x191   :  { %v2926_v26 = vadd.f32 %v7597_v56, %v10149_v17  ;;  %v7600_v40 = vadd.f32 %v7599_v15, %v7598_v25  ;;  %v7699_v17 = vadd.f32 %v7698_v13, %v7697_v5  ;;  %v7707_v7 = vpop.f32.mrb[71].mxu0 }
 0x192   :  { %v7708_v41 = vadd.f32 %v7707_v7, %v7706_v4  ;;  %v7709_v11 = vpop.f32.mrb[72].mxu0 }
 0x193   :  { %v2929_v19 = vadd.f32 %v7600_v40, %v10151_v35  ;;  %v2991_v38 = vadd.f32 %v7637_v29, %v2926_v26  ;;  %v7702_v35 = vadd.f32 %v7701_v54, %v7700_v49  ;;  %v7710_v18 = vpop.f32.mrb[73].mxu0 }
 0x194   :  { %v7712_v20 = vpop.f32.mrb[74].mxu0 }
 0x195   :  { %v2994_v32 = vadd.f32 %v7640_v22, %v2929_v19  ;;  %v7657_v28 = vpop.f32.mrb[80].mxu1  ;;  %v7713_v23 = vpop.f32.mrb[75].mxu0 }
 0x196   :  { %v7658_v42 = vpop.f32.mrb[81].mxu1  ;;  %v7714_v24 = vadd.f32 %v7713_v23, %v7712_v20  ;;  %v7715_v40 = vpop.f32.mrb[76].mxu0 }
 0x197   :  { %v7659_v43 = vadd.f32 %v7658_v42, %v7657_v28  ;;  %v7660_v14 = vpop.f32.mrb[82].mxu1  ;;  %v7716_v19 = vpop.f32.mrb[77].mxu0 }
 0x198   :  { %v7661_v44 = vpop.f32.mrb[83].mxu1  ;;  %v7717_v34 = vadd.f32 %v7716_v19, %v7715_v40 }
 0x199   :  { %v3032_v30 = vadd.f32 %v7659_v43, %v2967_v50  ;;  %v7662_v45 = vadd.f32 %v7661_v44, %v7660_v14 }
 0x19b   :  { %v3035_v52 = vadd.f32 %v7662_v45, %v10156_v53  ;;  %v3097_v55 = vadd.f32 %v7699_v17, %v3032_v30 }
 0x19d   :  { %v3100_v57 = vadd.f32 %v7702_v35, %v3035_v52  ;;  %v7663_v58 = vpop.f32.mrb[84].mxu1 }
 0x19e   :  { %v7664_v48 = vpop.f32.mrb[85].mxu1 }
 0x19f   :  { %v7665_v37 = vadd.f32 %v7664_v48, %v7663_v58  ;;  %v7666_v31 = vpop.f32.mrb[86].mxu1 }
 0x1a0   :  { %v7667_v46 = vpop.f32.mrb[87].mxu1 }
 0x1a1   :  { %v3040_v59 = vadd.f32 %v7665_v37, %v2975_v3  ;;  %v7668_v61 = vadd.f32 %v7667_v46, %v7666_v31  ;;  %v7711_v3 = vadd.f32 %v7710_v18, %v7709_v11 }
 0x1a3   :  { %v3043_v50 = vadd.f32 %v7668_v61, %v2978_v36  ;;  %v3105_v8 = vadd.f32 %v7705_v1, %v3040_v59 }
 0x1a5   :  { %v3108_v53 = vadd.f32 %v7708_v41, %v3043_v50  ;;  %v7669_v9 = vpop.f32.mrb[88].mxu1 }
 0x1a6   :  { %v7670_v62 = vpop.f32.mrb[89].mxu1 }
 0x1a7   :  { %v7671_v63 = vadd.f32 %v7670_v62, %v7669_v9  ;;  %v7672_v10 = vpop.f32.mrb[90].mxu1 }
 0x1a8   :  { %v7673_v0 = vpop.f32.mrb[91].mxu1 }
 0x1a9   :  { %v3048_v6 = vadd.f32 %v7671_v63, %v2983_v2  ;;  %v7674_v16 = vadd.f32 %v7673_v0, %v7672_v10  ;;  %v7718_v2 = vpop.f32.mrb[78].mxu0 }
 0x1aa   :  { %v7719_v28 = vpop.f32.mrb[79].mxu0 }
 0x1ab   :  { %v3051_v21 = vadd.f32 %v7674_v16, %v2986_v51  ;;  %v3113_v36 = vadd.f32 %v7711_v3, %v3048_v6  ;;  %v7720_v43 = vadd.f32 %v7719_v28, %v7718_v2  ;;  %v7777_v17 = vpop.f32.mrb[80].mxu0 }
 0x1ac   :  { %v7778_v52 = vpop.f32.mrb[81].mxu0 }
 0x1ad   :  { %v3116_v56 = vadd.f32 %v7714_v24, %v3051_v21  ;;  %v7675_v25 = vpop.f32.mrb[92].mxu1  ;;  %v7780_v35 = vpop.f32.mrb[82].mxu0 }
 0x1ae   :  { %v7676_v12 = vpop.f32.mrb[93].mxu1  ;;  %v7781_v58 = vpop.f32.mrb[83].mxu0 }
 0x1af   :  { %v7677_v15 = vadd.f32 %v7676_v12, %v7675_v25  ;;  %v7678_v26 = vpop.f32.mrb[94].mxu1  ;;  %v7782_v48 = vadd.f32 %v7781_v58, %v7780_v35  ;;  %v7783_v50 = vpop.f32.mrb[84].mxu0 }
 0x1b0   :  { %v7679_v27 = vpop.f32.mrb[95].mxu1  ;;  %v7784_v4 = vpop.f32.mrb[85].mxu0 }
 0x1b1   :  { %v3056_v29 = vadd.f32 %v7677_v15, %v2991_v38  ;;  %v7680_v33 = vadd.f32 %v7679_v27, %v7678_v26  ;;  %v7779_v38 = vadd.f32 %v7778_v52, %v7777_v17  ;;  %v7785_v7 = vadd.f32 %v7784_v4, %v7783_v50  ;;  %v7786_v41 = vpop.f32.mrb[86].mxu0 }
 0x1b2   :  { %v7787_v9 = vpop.f32.mrb[87].mxu0 }
 0x1b3   :  { %v3059_v22 = vadd.f32 %v7680_v33, %v2994_v32  ;;  %v3121_v42 = vadd.f32 %v7717_v34, %v3056_v29 }
 0x1b5   :  { %v3124_v51 = vadd.f32 %v7720_v43, %v3059_v22  ;;  %v7737_v14 = vpop.f32.mrb[96].mxu1 }
 0x1b6   :  { %v7738_v5 = vpop.f32.mrb[97].mxu1 }
 0x1b7   :  { %v7739_v44 = vadd.f32 %v7738_v5, %v7737_v14  ;;  %v7740_v30 = vpop.f32.mrb[98].mxu1 }
 0x1b8   :  { %v7741_v45 = vpop.f32.mrb[99].mxu1 }
 0x1b9   :  { %v3162_v13 = vadd.f32 %v7739_v44, %v3097_v55  ;;  %v7742_v49 = vadd.f32 %v7741_v45, %v7740_v30 }
 0x1bb   :  { %v3165_v54 = vadd.f32 %v7742_v49, %v3100_v57  ;;  %v3227_v32 = vadd.f32 %v7779_v38, %v3162_v13  ;;  %v7788_v57 = vadd.f32 %v7787_v9, %v7786_v41 }
 0x1bd   :  { %v7743_v37 = vpop.f32.mrb[100].mxu1  ;;  %v3230_v60 = vadd.f32 %v7782_v48, %v3165_v54 }
 0x1be   :  { %v7744_v31 = vpop.f32.mrb[101].mxu1 }
 0x1bf   :  { %v7745_v46 = vadd.f32 %v7744_v31, %v7743_v37  ;;  %v7746_v59 = vpop.f32.mrb[102].mxu1 }
 0x1c0   :  { %v7747_v61 = vpop.f32.mrb[103].mxu1 }
 0x1c1   :  { %v3170_v47 = vadd.f32 %v7745_v46, %v3105_v8  ;;  %v7748_v1 = vadd.f32 %v7747_v61, %v7746_v59 }
 0x1c3   :  { %v3173_v55 = vadd.f32 %v7748_v1, %v3108_v53  ;;  %v3235_v63 = vadd.f32 %v7785_v7, %v3170_v47 }
 0x1c5   :  { %v7749_v62 = vpop.f32.mrb[104].mxu1  ;;  %v3238_v6 = vadd.f32 %v7788_v57, %v3173_v55  ;;  %v8777_v57 = vld [vmem:[%s11189_s2 + $0x8] sm:$0xff]  }
 0x1c6   :  { %v7750_v10 = vpop.f32.mrb[105].mxu1 }
 0x1c7   :  { %v7751_v11 = vadd.f32 %v7750_v10, %v7749_v62  ;;  %v7752_v0 = vpop.f32.mrb[106].mxu1  ;;  %v8779_v62 = vld [vmem:[%s11189_s2] sm:$0xff]   ;;  %v8786_v10 = vld [vmem:[%s11190_s3 + $0x48] sm:$0xff]  }
 0x1c8   :  { %v7753_v16 = vpop.f32.mrb[107].mxu1 }
 0x1c9   :  { %v3178_v18 = vadd.f32 %v7751_v11, %v3113_v36  ;;  %v7754_v20 = vadd.f32 %v7753_v16, %v7752_v0  ;;  %v8787_v11 = vld [vmem:[%s11190_s3 + $0x50] sm:$0xff]   ;;  %v8788_v0 = vld [vmem:[%s11190_s3 + $0x58] sm:$0xff]   ;;  %v8789_v16 = vld [vmem:[%s11190_s3 + $0x60] sm:$0xff]  }
 0x1cb   :  { %v3181_v8 = vadd.f32 %v7754_v20, %v3116_v56  ;;  %v8780_v20 = vld [vmem:[%s11189_s2 + $0x18] sm:$0xff]  }
 0x1cc   :  { %v7789_v3 = vpop.f32.mrb[88].mxu0 }
 0x1cd   :  { %v7790_v21 = vpop.f32.mrb[89].mxu0 }
 0x1ce   :  { %v7791_v23 = vadd.f32 %v7790_v21, %v7789_v3  ;;  %v7792_v24 = vpop.f32.mrb[90].mxu0  ;;  %v8791_v3 = vld [vmem:[%s11190_s3 + $0x70] sm:$0xff]   ;;  %v8781_v21 = vld [vmem:[%s11189_s2 + $0x20] sm:$0xff]  }
 0x1cf   :  { %v7793_v25 = vpop.f32.mrb[91].mxu0 }
 0x1d0   :  { %v7794_v53 = vadd.f32 %v7793_v25, %v7792_v24  ;;  %v3243_v15 = vadd.f32 %v7791_v23, %v3178_v18  ;;  %v8790_v18 = vld [vmem:[%s11190_s3 + $0x68] sm:$0xff]   ;;  %v8783_v23 = vld [vmem:[%s11189_s2 + $0x30] sm:$0xff]   ;;  %v8792_v24 = vld [vmem:[%s11190_s3 + $0x78] sm:$0xff]  }
 0x1d1   :  { %v8784_v25 = vld [vmem:[%s11189_s2 + $0x38] sm:$0xff]  }
 0x1d2   :  { %v3246_v29 = vadd.f32 %v7794_v53, %v3181_v8  ;;  %v8782_v8 = vld [vmem:[%s11189_s2 + $0x28] sm:$0xff]   ;;  %v8803_v53 = vld [vmem:[%s11189_s2 + $0x40] sm:$0xff]  }
 0x1d6   :  { %v7795_v34 = vpop.f32.mrb[92].mxu0 }
 0x1d7   :  { %v7796_v22 = vpop.f32.mrb[93].mxu0 }
 0x1d8   :  { %v7797_v28 = vadd.f32 %v7796_v22, %v7795_v34  ;;  %v7798_v43 = vpop.f32.mrb[94].mxu0 }
 0x1d9   :  { %v7799_v14 = vpop.f32.mrb[95].mxu0 }
 0x1da   :  { %v7800_v56 = vadd.f32 %v7799_v14, %v7798_v43  ;;  %v8796_v43 = vld [vmem:[%s11190_s3 + $0x18] sm:$0xff]  }
 0x1ed   :  { %v7755_v12 = vpop.f32.mrb[108].mxu1 }
 0x1ee   :  { %v7756_v26 = vpop.f32.mrb[109].mxu1 }
 0x1ef   :  { %v7757_v40 = vadd.f32 %v7756_v26, %v7755_v12  ;;  %v7758_v27 = vpop.f32.mrb[110].mxu1 }
 0x1f0   :  { %v7759_v33 = vpop.f32.mrb[111].mxu1 }
 0x1f1   :  { %v3186_v19 = vadd.f32 %v7757_v40, %v3121_v42  ;;  %v7760_v2 = vadd.f32 %v7759_v33, %v7758_v27 }
 0x1f3   :  { %v3189_v36 = vadd.f32 %v7760_v2, %v3124_v51  ;;  %v3251_v5 = vadd.f32 %v7797_v28, %v3186_v19  ;;  %v8795_v28 = vld [vmem:[%s11190_s3 + $0x10] sm:$0xff]  }
 0x1f5   :  { %v3254_v13 = vadd.f32 %v7800_v56, %v3189_v36  ;;  %v8794_v36 = vld [vmem:[%s11190_s3 + $0x8] sm:$0xff]  }
 0x1f7   :  { %v7995_v44 = vpop.f32.mrb[112].mxu1 }
 0x1f8   :  { %v3300_v30 = vadd.f32 %v7995_v44, %v3235_v63  ;;  %v3291_v45 = vpop.f32.mrb[113].mxu1  ;;  %v8785_v63 = vld [vmem:[%s11190_s3 + $0x40] sm:$0xff]  }
 0x1f9   :  { %v3292_v17 = vadd.f32 %v3291_v45, %v3227_v32  ;;  %v7996_v49 = vpop.f32.mrb[114].mxu1 }
 0x1fa   :  { %v3303_v52 = vadd.f32 %v7996_v49, %v3238_v6  ;;  %v3294_v54 = vpop.f32.mrb[115].mxu1  ;;  %v3324_v35 = vmax.f32 %v3300_v30, 0.0  ;;  %v8778_v6 = vld [vmem:[%s11189_s2 + $0x10] sm:$0xff]   ;;  %v8800_v49 = vld [vmem:[%s11190_s3 + $0x38] sm:$0xff]  }
 0x1fb   :  { %v3295_v38 = vadd.f32 %v3294_v54, %v3230_v60  ;;  %v3322_v58 = vmax.f32 %v3292_v17, 0.0  ;;  %v8799_v17 = vld [vmem:[%s11190_s3 + $0x30] sm:$0xff]  }
 0x1fc   :  { %v3325_v42 = vmax.f32 %v3303_v52, 0.0 }
 0x1fd   :  { %v3323_v48 = vmax.f32 %v3295_v38, 0.0  ;;  %v8801_v38 = vld [vmem:[%s11190_s3 + $0x80] sm:$0xff]  }
 0x1fe   :  { %v10169_v37 = vpack.c.bf16 %v3325_v42, %v3324_v35 }
 0x1ff   :  { %v10171_v51 = vpack.c.bf16 %v3323_v48, %v3322_v58  ;;  %v7999_v31 = vpop.f32.mrb[116].mxu1  ;;  %v8802_v48 = vld [vmem:[%s11190_s3 + $0x88] sm:$0xff]  }
 0x200   :  { %v3316_v46 = vadd.f32 %v7999_v31, %v3251_v5  ;;  %v3307_v59 = vpop.f32.mrb[117].mxu1  ;;  %v8797_v5 = vld [vmem:[%s11190_s3 + $0x20] sm:$0xff]  }
 0x201   :  { %v3308_v61 = vadd.f32 %v3307_v59, %v3243_v15  ;;  %v8000_v47 = vpop.f32.mrb[118].mxu1  ;;  %8002 = vmatpush3.bf16.msra.mxu1 %v10171_v51  ;;  %8014 = vmatpush3.bf16.msra.mxu0 %v10171_v51  ;;  %v8806_v59 = vld [vmem:[%s11190_s3 + $0xa0] sm:$0xff]  }
 0x202   :  { %v3319_v32 = vadd.f32 %v8000_v47, %v3254_v13  ;;  %v3310_v50 = vpop.f32.mrb[119].mxu1  ;;  %8003 = vmatprep.subr.bf16.mxu1 %v9090_v39  ;;  %8015 = vmatprep.subr.bf16.mxu0 %v9090_v39  ;;  %v3328_v1 = vmax.f32 %v3316_v46, 0.0  ;;  %v8798_v13 = vld [vmem:[%s11190_s3 + $0x28] sm:$0xff]  }
 0x203   :  { %v3311_v60 = vadd.f32 %v3310_v50, %v3246_v29  ;;  %v3326_v55 = vmax.f32 %v3308_v61, 0.0  ;;  %v8793_v29 = vld [vmem:[%s11190_s3] sm:$0xff]   ;;  %v8807_v50 = vld [vmem:[%s11190_s3 + $0xa8] sm:$0xff]  }
 0x204   :  { %v3329_v4 = vmax.f32 %v3319_v32, 0.0 }
 0x205   :  { %v3327_v7 = vmax.f32 %v3311_v60, 0.0  ;;  %8004 = vmatpush3.bf16.msra.mxu1 %v10169_v37  ;;  %8016 = vmatpush3.bf16.msra.mxu0 %v10169_v37  ;;  %v8808_v60 = vld [vmem:[%s11190_s3 + $0xb0] sm:$0xff]  }
 0x206   :  { %v10179_v41 = vpack.c.bf16 %v3329_v4, %v3328_v1  ;;  %8005 = vmatprep.subr.bf16.mxu1 %v9090_v39  ;;  %8017 = vmatprep.subr.bf16.mxu0 %v9090_v39  ;;  %v8809_v1 = vld [vmem:[%s11190_s3 + $0xb8] sm:$0xff]  }
 0x207   :  { %v10183_v9 = vpack.c.bf16 %v3327_v7, %v3326_v55  ;;  %v8810_v7 = vld [vmem:[%s11190_s3 + $0xc0] sm:$0xff]  }
 0x209   :  { %8006 = vmatpush3.bf16.msra.mxu1 %v10183_v9  ;;  %8018 = vmatpush3.bf16.msra.mxu0 %v10183_v9 }
 0x20a   :  { %8007 = vmatprep.subr.bf16.mxu1 %v9090_v39  ;;  %8019 = vmatprep.subr.bf16.mxu0 %v9090_v39 }
 0x20d   :  { %8008 = vmatpush3.bf16.msra.mxu1 %v10179_v41  ;;  %8020 = vmatpush3.bf16.msra.mxu0 %v10179_v41 }
 0x20e   :  { %8065 = vmatprep.subr.bf16.mxu0 %v9090_v39  ;;  %8025 = vmatprep.subr.bf16.mxu1 %v9090_v39 }
 0x210   :  { %8022 = vmatmul.mubr.msk.bf16.vlgmr.msra.gmra.mrb[96].mxu0 %vm3341_vm1, %v8777_v57  ;;  %8010 = vmatmul.mubr.msk.bf16.vlgmr.msra.gmra.mrb[120].mxu1 %vm3341_vm1, %v8779_v62  ;;  %v8811_v62 = vld [vmem:[%s11190_s3 + $0xc8] sm:$0xff]  }
 0x211   :  { %8066 = vmatpush3.bf16.msra.mxu0 %v10171_v51  ;;  %8073 = vmatprep.mubr.msk.bf16.mxu0 %vm9091_vm0, %v9090_v39 }
 0x212   :  { %8067 = vmatprep.subr.bf16.mxu0 %v9090_v39  ;;  %8026 = vmatpush3.bf16.msra.mxu1 %v8785_v63  ;;  %v8812_v63 = vld [vmem:[%s11190_s3 + $0xd0] sm:$0xff]  }
 0x213   :  { %8027 = vmatprep.subr.bf16.mxu1 %v9090_v39  ;;  %8041 = vmatprep.mubr.msk.bf16.mxu1 %vm9091_vm0, %v9090_v39 }
 0x215   :  { %8068 = vmatpush3.bf16.msra.mxu0 %v10169_v37 }
 0x216   :  { %8069 = vmatprep.subr.bf16.mxu0 %v9090_v39  ;;  %8028 = vmatpush3.bf16.msra.mxu1 %v8786_v10  ;;  %v8813_v10 = vld [vmem:[%s11190_s3 + $0xd8] sm:$0xff]  }
 0x217   :  { %8029 = vmatprep.subr.bf16.mxu1 %v9090_v39 }
 0x219   :  { %8070 = vmatpush3.bf16.msra.mxu0 %v10183_v9 }
 0x21a   :  { %8071 = vmatprep.subr.bf16.mxu0 %v9090_v39  ;;  %8030 = vmatpush3.bf16.msra.mxu1 %v8787_v11 }
 0x21b   :  { %8031 = vmatprep.subr.bf16.mxu1 %v9090_v39 }
 0x21d   :  { %8072 = vmatpush3.bf16.msra.mxu0 %v10179_v41 }
 0x21e   :  { %8097 = vmatprep.subr.bf16.mxu0 %v9090_v39  ;;  %8032 = vmatpush3.bf16.msra.mxu1 %v8788_v0 }
 0x21f   :  { %8033 = vmatprep.subr.bf16.mxu1 %v9090_v39 }
 0x220   :  { %8074 = vmatmul.mubr.msk.bf16.vlgmr.msra.gmra.mrb[100].mxu0 %vm3341_vm1, %v8778_v6  ;;  %v8814_v6 = vld [vmem:[%s11190_s3 + $0xe0] sm:$0xff]  }
 0x221   :  { %8098 = vmatpush3.bf16.msra.mxu0 %v10171_v51  ;;  %8105 = vmatprep.mubr.msk.bf16.mxu0 %vm9091_vm0, %v9090_v39 }
 0x222   :  { %8099 = vmatprep.subr.bf16.mxu0 %v9090_v39  ;;  %8034 = vmatpush3.bf16.msra.mxu1 %v8789_v16 }
 0x223   :  { %8035 = vmatprep.subr.bf16.mxu1 %v9090_v39 }
 0x225   :  { %8100 = vmatpush3.bf16.msra.mxu0 %v10169_v37 }
 0x226   :  { %8101 = vmatprep.subr.bf16.mxu0 %v9090_v39  ;;  %8036 = vmatpush3.bf16.msra.mxu1 %v8790_v18 }
 0x227   :  { %8037 = vmatprep.subr.bf16.mxu1 %v9090_v39 }
 0x229   :  { %8102 = vmatpush3.bf16.msra.mxu0 %v10183_v9 }
 0x22a   :  { %8103 = vmatprep.subr.bf16.mxu0 %v9090_v39  ;;  %8038 = vmatpush3.bf16.msra.mxu1 %v8791_v3 }
 0x22b   :  { %8039 = vmatprep.subr.bf16.mxu1 %v9090_v39 }
 0x22d   :  { %8104 = vmatpush3.bf16.msra.mxu0 %v10179_v41 }
 0x22e   :  { %8129 = vmatprep.subr.bf16.mxu0 %v9090_v39  ;;  %8040 = vmatpush3.bf16.msra.mxu1 %v8792_v24 }
 0x22f   :  { %8045 = vmatprep.subr.bf16.mxu1 %v9090_v39 }
 0x230   :  { %8106 = vmatmul.mubr.msk.bf16.vlgmr.msra.gmra.mrb[104].mxu0 %vm3341_vm1, %v8780_v20  ;;  %v8815_v20 = vld [vmem:[%s11190_s3 + $0xe8] sm:$0xff]  }
 0x231   :  { %8130 = vmatpush3.bf16.msra.mxu0 %v10171_v51  ;;  %8137 = vmatprep.mubr.msk.bf16.mxu0 %vm9091_vm0, %v9090_v39 }
 0x232   :  { %8131 = vmatprep.subr.bf16.mxu0 %v9090_v39 }
 0x235   :  { %8132 = vmatpush3.bf16.msra.mxu0 %v10169_v37 }
 0x236   :  { %8133 = vmatprep.subr.bf16.mxu0 %v9090_v39 }
 0x239   :  { %8134 = vmatpush3.bf16.msra.mxu0 %v10183_v9 }
 0x23a   :  { %8135 = vmatprep.subr.bf16.mxu0 %v9090_v39 }
 0x23d   :  { %8136 = vmatpush3.bf16.msra.mxu0 %v10179_v41 }
 0x23e   :  { %8161 = vmatprep.subr.bf16.mxu0 %v9090_v39 }
 0x240   :  { %8138 = vmatmul.mubr.msk.bf16.vlgmr.msra.gmra.mrb[108].mxu0 %vm3341_vm1, %v8781_v21  ;;  %v8816_v21 = vld [vmem:[%s11190_s3 + $0xf0] sm:$0xff]  }
 0x241   :  { %8162 = vmatpush3.bf16.msra.mxu0 %v10171_v51  ;;  %8169 = vmatprep.mubr.msk.bf16.mxu0 %vm9091_vm0, %v9090_v39 }
 0x242   :  { %8163 = vmatprep.subr.bf16.mxu0 %v9090_v39 }
 0x245   :  { %8164 = vmatpush3.bf16.msra.mxu0 %v10169_v37 }
 0x246   :  { %8165 = vmatprep.subr.bf16.mxu0 %v9090_v39 }
 0x249   :  { %8166 = vmatpush3.bf16.msra.mxu0 %v10183_v9 }
 0x24a   :  { %8167 = vmatprep.subr.bf16.mxu0 %v9090_v39 }
 0x24d   :  { %8168 = vmatpush3.bf16.msra.mxu0 %v10179_v41 }
 0x24e   :  { %8193 = vmatprep.subr.bf16.mxu0 %v9090_v39 }
 0x250   :  { %8170 = vmatmul.mubr.msk.bf16.vlgmr.msra.gmra.mrb[112].mxu0 %vm3341_vm1, %v8782_v8  ;;  %v8817_v8 = vld [vmem:[%s11190_s3 + $0xf8] sm:$0xff]  }
 0x251   :  { %8194 = vmatpush3.bf16.msra.mxu0 %v10171_v51  ;;  %8201 = vmatprep.mubr.msk.bf16.mxu0 %vm9091_vm0, %v9090_v39 }
 0x252   :  { %8195 = vmatprep.subr.bf16.mxu0 %v9090_v39 }
 0x255   :  { %8196 = vmatpush3.bf16.msra.mxu0 %v10169_v37 }
 0x256   :  { %8197 = vmatprep.subr.bf16.mxu0 %v9090_v39 }
 0x259   :  { %8198 = vmatpush3.bf16.msra.mxu0 %v10183_v9 }
 0x25a   :  { %8199 = vmatprep.subr.bf16.mxu0 %v9090_v39 }
 0x25d   :  { %8200 = vmatpush3.bf16.msra.mxu0 %v10179_v41 }
 0x25e   :  { %8225 = vmatprep.subr.bf16.mxu0 %v9090_v39 }
 0x260   :  { %8202 = vmatmul.mubr.msk.bf16.vlgmr.msra.gmra.mrb[116].mxu0 %vm3341_vm1, %v8783_v23 }
 0x261   :  { %8226 = vmatpush3.bf16.msra.mxu0 %v10171_v51  ;;  %8233 = vmatprep.mubr.msk.bf16.mxu0 %vm9091_vm0, %v9090_v39 }
 0x262   :  { %8227 = vmatprep.subr.bf16.mxu0 %v9090_v39 }
 0x265   :  { %8228 = vmatpush3.bf16.msra.mxu0 %v10169_v37 }
 0x266   :  { %8229 = vmatprep.subr.bf16.mxu0 %v9090_v39 }
 0x269   :  { %8230 = vmatpush3.bf16.msra.mxu0 %v10183_v9 }
 0x26a   :  { %8231 = vmatprep.subr.bf16.mxu0 %v9090_v39 }
 0x26d   :  { %8232 = vmatpush3.bf16.msra.mxu0 %v10179_v41 }
 0x26e   :  { %8257 = vmatprep.subr.bf16.mxu0 %v9090_v39 }
 0x270   :  { %8234 = vmatmul.mubr.msk.bf16.vlgmr.msra.gmra.mrb[120].mxu0 %vm3341_vm1, %v8784_v25  ;;  %v8818_v25 = vld [vmem:[%s11190_s3 + $0x100] sm:$0xff]  }
 0x271   :  { %8258 = vmatpush3.bf16.msra.mxu0 %v10171_v51  ;;  %8265 = vmatprep.mubr.msk.bf16.mxu0 %vm9091_vm0, %v9090_v39  ;;  %v8805_v51 = vld [vmem:[%s11190_s3 + $0x98] sm:$0xff]  }
 0x272   :  { %8259 = vmatprep.subr.bf16.mxu0 %v9090_v39 }
 0x275   :  { %8260 = vmatpush3.bf16.msra.mxu0 %v10169_v37  ;;  %v8804_v37 = vld [vmem:[%s11190_s3 + $0x90] sm:$0xff]  }
 0x276   :  { %8261 = vmatprep.subr.bf16.mxu0 %v9090_v39 }
 0x279   :  { %8262 = vmatpush3.bf16.msra.mxu0 %v10183_v9 }
 0x27a   :  { %8263 = vmatprep.subr.bf16.mxu0 %v9090_v39 }
 0x27d   :  { %8264 = vmatpush3.bf16.msra.mxu0 %v10179_v41 }
 0x27e   :  { %8295 = vmatprep.subr.bf16.mxu0 %v9090_v39 }
 0x280   :  { %8266 = vmatmul.mubr.msk.bf16.vlgmr.msra.gmra.mrb[124].mxu0 %vm3341_vm1, %v8803_v53 }
 0x281   :  { %8297 = vmatprep.mubr.msk.bf16.mxu0 %vm9091_vm0, %v9090_v39 }
 0x2e3   :  { %v3448_v12 = vpop.f32.mrb[96].mxu0  ;;  %v3379_v15 = vpop.f32.mrb[120].mxu1 }
 0x2e4   :  { %v8023_v26 = vpop.f32.mrb[97].mxu0  ;;  %v8011_v40 = vpop.f32.mrb[121].mxu1 }
 0x2e5   :  { %v3451_v27 = vpop.f32.mrb[98].mxu0  ;;  %v3382_v33 = vpop.f32.mrb[122].mxu1  ;;  %v8819_v26 = vld [vmem:[%s11190_s3 + $0x108] sm:$0xff]   ;;  %v8820_v40 = vld [vmem:[%s11190_s3 + $0x110] sm:$0xff]  }
 0x2e6   :  { %v3455_v19 = vpack.c.bf16 %v3451_v27, %v3448_v12  ;;  %v8024_v34 = vpop.f32.mrb[99].mxu0  ;;  %v3386_v2 = vpack.c.bf16 %v3382_v33, %v3379_v15  ;;  %v8012_v22 = vpop.f32.mrb[123].mxu1  ;;  %v8821_v27 = vld [vmem:[%s11190_s3 + $0x118] sm:$0xff]   ;;  %v8823_v33 = vld [vmem:[%s11190_s3 + $0x128] sm:$0xff]  }
 0x2e8   :  { %8042 = vmatmul.mubr.bf16.vlgmr.msra.gmra.mrb[124].mxu1 %v3455_v19  ;;  %v8824_v19 = vld [vmem:[%s11190_s3 + $0x130] sm:$0xff]  }
 0x2e9   :  { %8046 = vmatpush3.bf16.msra.mxu1 %v8793_v29  ;;  %8061 = vmatprep.mubr.msk.bf16.mxu1 %vm9091_vm0, %v9090_v39  ;;  %v8822_v29 = vld [vmem:[%s11190_s3 + $0x120] sm:$0xff]  }
 0x2ea   :  { %8047 = vmatprep.subr.bf16.mxu1 %v9090_v39 }
 0x2ed   :  { %8048 = vmatpush3.bf16.msra.mxu1 %v8794_v36 }
 0x2ee   :  { %8049 = vmatprep.subr.bf16.mxu1 %v9090_v39 }
 0x2f1   :  { %8050 = vmatpush3.bf16.msra.mxu1 %v8795_v28 }
 0x2f2   :  { %8051 = vmatprep.subr.bf16.mxu1 %v9090_v39 }
 0x2f3   :  { %v3696_v14 = vpop.f32.mrb[100].mxu0 }
 0x2f4   :  { %v8075_v56 = vpop.f32.mrb[101].mxu0 }
 0x2f5   :  { %8052 = vmatpush3.bf16.msra.mxu1 %v8796_v43  ;;  %v3699_v44 = vpop.f32.mrb[102].mxu0  ;;  %v8827_v56 = vld [vmem:[%s11190_s3 + $0x148] sm:$0xff]  }
 0x2f6   :  { %8053 = vmatprep.subr.bf16.mxu1 %v9090_v39  ;;  %v3703_v30 = vpack.c.bf16 %v3699_v44, %v3696_v14  ;;  %v8076_v45 = vpop.f32.mrb[103].mxu0  ;;  %v8826_v14 = vld [vmem:[%s11190_s3 + $0x140] sm:$0xff]   ;;  %v8829_v44 = vld [vmem:[%s11190_s3 + $0x158] sm:$0xff]  }
 0x2f7   :  { %v8831_v45 = vld [vmem:[%s11190_s3 + $0x168] sm:$0xff]  }
 0x2f9   :  { %8054 = vmatpush3.bf16.msra.mxu1 %v8797_v5  ;;  %v8828_v5 = vld [vmem:[%s11190_s3 + $0x150] sm:$0xff]  }
 0x2fa   :  { %8055 = vmatprep.subr.bf16.mxu1 %v9090_v39 }
 0x2fd   :  { %8056 = vmatpush3.bf16.msra.mxu1 %v8798_v13  ;;  %v8832_v13 = vld [vmem:[%s11190_s3 + $0x170] sm:$0xff]  }
 0x2fe   :  { %8057 = vmatprep.subr.bf16.mxu1 %v9090_v39 }
 0x301   :  { %8058 = vmatpush3.bf16.msra.mxu1 %v8799_v17  ;;  %v8833_v17 = vld [vmem:[%s11190_s3 + $0x178] sm:$0xff]  }
 0x302   :  { %8059 = vmatprep.subr.bf16.mxu1 %v9090_v39 }
 0x303   :  { %v10368_v52 = vpop.f32.mrb[104].mxu0 }
 0x304   :  { %v8107_v54 = vpop.f32.mrb[105].mxu0 }
 0x305   :  { %8060 = vmatpush3.bf16.msra.mxu1 %v8800_v49  ;;  %v10373_v35 = vpop.f32.mrb[106].mxu0  ;;  %v8834_v49 = vld [vmem:[%s11190_s3 + $0x180] sm:$0xff]   ;;  %v8836_v54 = vld [vmem:[%s11190_s3 + $0x190] sm:$0xff]  }
 0x306   :  { %8077 = vmatprep.subr.bf16.mxu1 %v9090_v39  ;;  %v3864_v42 = vpack.c.bf16 %v10373_v35, %v10368_v52  ;;  %v8108_v58 = vpop.f32.mrb[107].mxu0  ;;  %v8835_v52 = vld [vmem:[%s11190_s3 + $0x188] sm:$0xff]   ;;  %v8838_v35 = vld [vmem:[%s11190_s3 + $0x1a0] sm:$0xff]  }
 0x307   :  { %v8840_v58 = vld [vmem:[%s11190_s3 + $0x1b0] sm:$0xff]  }
 0x308   :  { %8062 = vmatmul.mubr.bf16.vlgmr.msra.gmra.mrb[124].mxu1 %v3386_v2  ;;  %v8825_v2 = vld [vmem:[%s11190_s3 + $0x138] sm:$0xff]  }
 0x309   :  { %8078 = vmatpush3.bf16.msra.mxu1 %v8801_v38  ;;  %8093 = vmatprep.mubr.msk.bf16.mxu1 %vm9091_vm0, %v9090_v39  ;;  %v8837_v38 = vld [vmem:[%s11190_s3 + $0x198] sm:$0xff]  }
 0x30a   :  { %8079 = vmatprep.subr.bf16.mxu1 %v9090_v39 }
 0x30d   :  { %8080 = vmatpush3.bf16.msra.mxu1 %v8802_v48  ;;  %v8841_v48 = vld [vmem:[%s11190_s3 + $0x1b8] sm:$0xff]  }
 0x30e   :  { %8081 = vmatprep.subr.bf16.mxu1 %v9090_v39 }
 0x311   :  { %8082 = vmatpush3.bf16.msra.mxu1 %v8804_v37  ;;  %v8842_v37 = vld [vmem:[%s11190_s3 + $0x1c0] sm:$0xff]  }
 0x312   :  { %8083 = vmatprep.subr.bf16.mxu1 %v9090_v39 }
 0x313   :  { %v10392_v31 = vpop.f32.mrb[108].mxu0 }
 0x314   :  { %v8139_v46 = vpop.f32.mrb[109].mxu0 }
 0x315   :  { %8084 = vmatpush3.bf16.msra.mxu1 %v8805_v51  ;;  %v10397_v61 = vpop.f32.mrb[110].mxu0  ;;  %v8843_v51 = vld [vmem:[%s11190_s3 + $0x1c8] sm:$0xff]   ;;  %v8845_v46 = vld [vmem:[%s11190_s3 + $0x1d8] sm:$0xff]  }
 0x316   :  { %8085 = vmatprep.subr.bf16.mxu1 %v9090_v39  ;;  %v4025_v47 = vpack.c.bf16 %v10397_v61, %v10392_v31  ;;  %v8140_v32 = vpop.f32.mrb[111].mxu0  ;;  %v8844_v31 = vld [vmem:[%s11190_s3 + $0x1d0] sm:$0xff]   ;;  %v8847_v61 = vld [vmem:[%s11190_s3 + $0x1e8] sm:$0xff]  }
 0x317   :  { %v8849_v32 = vld [vmem:[%s11190_s3 + $0x1f8] sm:$0xff]  }
 0x319   :  { %8086 = vmatpush3.bf16.msra.mxu1 %v8806_v59  ;;  %v8846_v59 = vld [vmem:[%s11190_s3 + $0x1e0] sm:$0xff]  }
 0x31a   :  { %8087 = vmatprep.subr.bf16.mxu1 %v9090_v39 }
 0x31d   :  { %8088 = vmatpush3.bf16.msra.mxu1 %v8807_v50  ;;  %v8850_v50 = vld [vmem:[%s11190_s3 + $0x200] sm:$0xff]  }
 0x31e   :  { %8089 = vmatprep.subr.bf16.mxu1 %v9090_v39 }
 0x321   :  { %8090 = vmatpush3.bf16.msra.mxu1 %v8808_v60  ;;  %v8851_v60 = vld [vmem:[%s11190_s3 + $0x208] sm:$0xff]  }
 0x322   :  { %8091 = vmatprep.subr.bf16.mxu1 %v9090_v39 }
 0x323   :  { %v10414_v4 = vpop.f32.mrb[112].mxu0 }
 0x324   :  { %v8171_v55 = vpop.f32.mrb[113].mxu0 }
 0x325   :  { %8092 = vmatpush3.bf16.msra.mxu1 %v8809_v1  ;;  %v10419_v41 = vpop.f32.mrb[114].mxu0  ;;  %v8852_v1 = vld [vmem:[%s11190_s3 + $0x210] sm:$0xff]   ;;  %v8854_v55 = vld [vmem:[%s11190_s3 + $0x220] sm:$0xff]  }
 0x326   :  { %8109 = vmatprep.subr.bf16.mxu1 %v9090_v39  ;;  %v4186_v9 = vpack.c.bf16 %v10419_v41, %v10414_v4  ;;  %v8172_v57 = vpop.f32.mrb[115].mxu0  ;;  %v8853_v4 = vld [vmem:[%s11190_s3 + $0x218] sm:$0xff]   ;;  %v8856_v41 = vld [vmem:[%s11190_s3 + $0x230] sm:$0xff]  }
 0x328   :  { %8094 = vmatmul.mubr.bf16.vlgmr.msra.gmra.mrb[124].mxu1 %v3703_v30  ;;  %v8830_v30 = vld [vmem:[%s11190_s3 + $0x160] sm:$0xff]  }
 0x329   :  { %8110 = vmatpush3.bf16.msra.mxu1 %v8810_v7  ;;  %8125 = vmatprep.mubr.msk.bf16.mxu1 %vm9091_vm0, %v9090_v39  ;;  %v8855_v7 = vld [vmem:[%s11190_s3 + $0x228] sm:$0xff]  }
 0x32a   :  { %8111 = vmatprep.subr.bf16.mxu1 %v9090_v39 }
 0x32d   :  { %8112 = vmatpush3.bf16.msra.mxu1 %v8811_v62 }
 0x32e   :  { %8113 = vmatprep.subr.bf16.mxu1 %v9090_v39 }
 0x331   :  { %8114 = vmatpush3.bf16.msra.mxu1 %v8812_v63 }
 0x332   :  { %8115 = vmatprep.subr.bf16.mxu1 %v9090_v39 }
 0x333   :  { %v10438_v11 = vpop.f32.mrb[116].mxu0 }
 0x334   :  { %v8203_v0 = vpop.f32.mrb[117].mxu0 }
 0x335   :  { %8116 = vmatpush3.bf16.msra.mxu1 %v8813_v10  ;;  %v10443_v16 = vpop.f32.mrb[118].mxu0 }
 0x336   :  { %8117 = vmatprep.subr.bf16.mxu1 %v9090_v39  ;;  %v4347_v18 = vpack.c.bf16 %v10443_v16, %v10438_v11  ;;  %v8204_v3 = vpop.f32.mrb[119].mxu0 }
 0x337   :  { %v7011_v3 = vld [vmem:[%s11191_s4 + $0x1] sm:$0x1] }
 0x339   :  { %8118 = vmatpush3.bf16.msra.mxu1 %v8814_v6  ;;  %v8860_v6 = vld [vmem:[%s11192_s5 + $0x84] ss:$8 sps:$4 sm:$0xff]  }
 0x33a   :  { %8119 = vmatprep.subr.bf16.mxu1 %v9090_v39 }
 0x33d   :  { %8120 = vmatpush3.bf16.msra.mxu1 %v8815_v20  ;;  %v8858_v20 = vld [vmem:[%s11192_s5 + $0x80] ss:$8 sps:$4 sm:$0xff]  }
 0x33e   :  { %8121 = vmatprep.subr.bf16.mxu1 %v9090_v39 }
 0x341   :  { %8122 = vmatpush3.bf16.msra.mxu1 %v8816_v21  ;;  %v8863_v21 = vld [vmem:[%s11192_s5 + $0x94] ss:$8 sps:$4 sm:$0xff]  }
 0x342   :  { %8123 = vmatprep.subr.bf16.mxu1 %v9090_v39 }
 0x343   :  { %v10460_v23 = vpop.f32.mrb[120].mxu0 }
 0x344   :  { %v8235_v24 = vpop.f32.mrb[121].mxu0 }
 0x345   :  { %8124 = vmatpush3.bf16.msra.mxu1 %v8817_v8  ;;  %v10465_v53 = vpop.f32.mrb[122].mxu0  ;;  %v8861_v8 = vld [vmem:[%s11192_s5 + $0x90] ss:$8 sps:$4 sm:$0xff]   ;;  %v7163_v24 = vld [vmem:[%s11191_s4 + $0x5] sm:$0x1] }
 0x346   :  { %8141 = vmatprep.subr.bf16.mxu1 %v9090_v39  ;;  %v4508_v12 = vpack.c.bf16 %v10465_v53, %v10460_v23  ;;  %v8236_v15 = vpop.f32.mrb[123].mxu0  ;;  %v8866_v23 = vld [vmem:[%s11192_s5 + $0xa4] ss:$8 sps:$4 sm:$0xff]   ;;  %v8869_v53 = vld [vmem:[%s11192_s5 + $0xb4] ss:$8 sps:$4 sm:$0xff]  }
 0x347   :  { %v8872_v15 = vld [vmem:[%s11192_s5 + $0xc4] ss:$8 sps:$4 sm:$0xff]  }
 0x348   :  { %8126 = vmatmul.mubr.bf16.vlgmr.msra.gmra.mrb[124].mxu1 %v3864_v42  ;;  %v8839_v42 = vld [vmem:[%s11190_s3 + $0x1a8] sm:$0xff]  }
 0x349   :  { %8142 = vmatpush3.bf16.msra.mxu1 %v8818_v25  ;;  %8157 = vmatprep.mubr.msk.bf16.mxu1 %vm9091_vm0, %v9090_v39  ;;  %v8864_v25 = vld [vmem:[%s11192_s5 + $0xa0] ss:$8 sps:$4 sm:$0xff]  }
 0x34a   :  { %8143 = vmatprep.subr.bf16.mxu1 %v9090_v39 }
 0x34d   :  { %8144 = vmatpush3.bf16.msra.mxu1 %v8819_v26  ;;  %v7197_v26 = vld [vmem:[%s11191_s4 + $0x6] sm:$0x1] }
 0x34e   :  { %8145 = vmatprep.subr.bf16.mxu1 %v9090_v39 }
 0x351   :  { %8146 = vmatpush3.bf16.msra.mxu1 %v8820_v40  ;;  %v8870_v40 = vld [vmem:[%s11192_s5 + $0xc0] ss:$8 sps:$4 sm:$0xff]  }
 0x352   :  { %8147 = vmatprep.subr.bf16.mxu1 %v9090_v39 }
 0x353   :  { %v10499_v34 = vpop.f32.mrb[124].mxu0 }
 0x354   :  { %v8267_v22 = vpop.f32.mrb[125].mxu0 }
 0x355   :  { %8148 = vmatpush3.bf16.msra.mxu1 %v8821_v27  ;;  %v10505_v36 = vpop.f32.mrb[126].mxu0  ;;  %v8875_v27 = vld [vmem:[%s11192_s5 + $0xd4] ss:$8 sps:$4 sm:$0xff]   ;;  %v8884_v22 = vld [vmem:[%s11192_s5 + $0x4] ss:$8 sps:$4 sm:$0xff]  }
 0x356   :  { %8149 = vmatprep.subr.bf16.mxu1 %v9090_v39  ;;  %v4669_v28 = vpack.c.bf16 %v10505_v36, %v10499_v34  ;;  %v8268_v43 = vpop.f32.mrb[127].mxu0  ;;  %v8881_v34 = vld [vmem:[%s11192_s5 + $0xf4] ss:$8 sps:$4 sm:$0xff]   ;;  %v9092_v36 = vmov 0  }
 0x357   :  { %v8882_v43 = vld [vmem:[%s11192_s5] ss:$8 sps:$4 sm:$0xff]  }
 0x359   :  { %8150 = vmatpush3.bf16.msra.mxu1 %v8822_v29  ;;  %v8873_v29 = vld [vmem:[%s11192_s5 + $0xd0] ss:$8 sps:$4 sm:$0xff]  }
 0x35a   :  { %8151 = vmatprep.subr.bf16.mxu1 %v9090_v39 }
 0x35d   :  { %8152 = vmatpush3.bf16.msra.mxu1 %v8823_v33  ;;  %v8878_v33 = vld [vmem:[%s11192_s5 + $0xe4] ss:$8 sps:$4 sm:$0xff]  }
 0x35e   :  { %8153 = vmatprep.subr.bf16.mxu1 %v9090_v39 }
 0x361   :  { %8154 = vmatpush3.bf16.msra.mxu1 %v8824_v19  ;;  %v8876_v19 = vld [vmem:[%s11192_s5 + $0xe0] ss:$8 sps:$4 sm:$0xff]  }
 0x362   :  { %8155 = vmatprep.subr.bf16.mxu1 %v9090_v39 }
 0x365   :  { %8156 = vmatpush3.bf16.msra.mxu1 %v8825_v2  ;;  %v8879_v2 = vld [vmem:[%s11192_s5 + $0xf0] ss:$8 sps:$4 sm:$0xff]  }
 0x366   :  { %8173 = vmatprep.subr.bf16.mxu1 %v9090_v39 }
 0x368   :  { %8158 = vmatmul.mubr.bf16.vlgmr.msra.gmra.mrb[124].mxu1 %v4025_v47  ;;  %v8848_v47 = vld [vmem:[%s11190_s3 + $0x1f0] sm:$0xff]  }
 0x369   :  { %8174 = vmatpush3.bf16.msra.mxu1 %v8826_v14  ;;  %8189 = vmatprep.mubr.msk.bf16.mxu1 %vm9091_vm0, %v9090_v39 }
 0x36a   :  { %8175 = vmatprep.subr.bf16.mxu1 %v9090_v39 }
 0x36d   :  { %8176 = vmatpush3.bf16.msra.mxu1 %v8827_v56 }
 0x36e   :  { %8177 = vmatprep.subr.bf16.mxu1 %v9090_v39 }
 0x371   :  { %8178 = vmatpush3.bf16.msra.mxu1 %v8828_v5  ;;  %v8887_v5 = vld [vmem:[%s11192_s5 + $0x14] ss:$8 sps:$4 sm:$0xff]  }
 0x372   :  { %8179 = vmatprep.subr.bf16.mxu1 %v9090_v39 }
 0x375   :  { %8180 = vmatpush3.bf16.msra.mxu1 %v8829_v44 }
 0x376   :  { %8181 = vmatprep.subr.bf16.mxu1 %v9090_v39 }
 0x379   :  { %8182 = vmatpush3.bf16.msra.mxu1 %v8830_v30 }
 0x37a   :  { %8183 = vmatprep.subr.bf16.mxu1 %v9090_v39 }
 0x37d   :  { %8184 = vmatpush3.bf16.msra.mxu1 %v8831_v45 }
 0x37e   :  { %8185 = vmatprep.subr.bf16.mxu1 %v9090_v39 }
 0x381   :  { %8186 = vmatpush3.bf16.msra.mxu1 %v8832_v13 }
 0x382   :  { %8187 = vmatprep.subr.bf16.mxu1 %v9090_v39 }
 0x385   :  { %8188 = vmatpush3.bf16.msra.mxu1 %v8833_v17 }
 0x386   :  { %8205 = vmatprep.subr.bf16.mxu1 %v9090_v39 }
 0x388   :  { %8190 = vmatmul.mubr.bf16.vlgmr.msra.gmra.mrb[124].mxu1 %v4186_v9  ;;  %v8857_v9 = vld [vmem:[%s11190_s3 + $0x238] sm:$0xff]  }
 0x389   :  { %8206 = vmatpush3.bf16.msra.mxu1 %v8834_v49  ;;  %8221 = vmatprep.mubr.msk.bf16.mxu1 %vm9091_vm0, %v9090_v39 }
 0x38a   :  { %8207 = vmatprep.subr.bf16.mxu1 %v9090_v39 }
 0x38d   :  { %8208 = vmatpush3.bf16.msra.mxu1 %v8835_v52  ;;  %v8885_v52 = vld [vmem:[%s11192_s5 + $0x10] ss:$8 sps:$4 sm:$0xff]  }
 0x38e   :  { %8209 = vmatprep.subr.bf16.mxu1 %v9090_v39 }
 0x391   :  { %8210 = vmatpush3.bf16.msra.mxu1 %v8836_v54  ;;  %v8890_v54 = vld [vmem:[%s11192_s5 + $0x24] ss:$8 sps:$4 sm:$0xff]  }
 0x392   :  { %8211 = vmatprep.subr.bf16.mxu1 %v9090_v39 }
 0x395   :  { %8212 = vmatpush3.bf16.msra.mxu1 %v8837_v38  ;;  %v8888_v38 = vld [vmem:[%s11192_s5 + $0x20] ss:$8 sps:$4 sm:$0xff]  }
 0x396   :  { %8213 = vmatprep.subr.bf16.mxu1 %v9090_v39 }
 0x399   :  { %8214 = vmatpush3.bf16.msra.mxu1 %v8838_v35  ;;  %v8893_v35 = vld [vmem:[%s11192_s5 + $0x34] ss:$8 sps:$4 sm:$0xff]  }
 0x39a   :  { %8215 = vmatprep.subr.bf16.mxu1 %v9090_v39 }
 0x39d   :  { %8216 = vmatpush3.bf16.msra.mxu1 %v8839_v42  ;;  %v8891_v42 = vld [vmem:[%s11192_s5 + $0x30] ss:$8 sps:$4 sm:$0xff]  }
 0x39e   :  { %8217 = vmatprep.subr.bf16.mxu1 %v9090_v39 }
 0x3a1   :  { %8218 = vmatpush3.bf16.msra.mxu1 %v8840_v58  ;;  %v8896_v58 = vld [vmem:[%s11192_s5 + $0x44] ss:$8 sps:$4 sm:$0xff]  }
 0x3a2   :  { %8219 = vmatprep.subr.bf16.mxu1 %v9090_v39 }
 0x3a5   :  { %8220 = vmatpush3.bf16.msra.mxu1 %v8841_v48  ;;  %v8894_v48 = vld [vmem:[%s11192_s5 + $0x40] ss:$8 sps:$4 sm:$0xff]  }
 0x3a6   :  { %8237 = vmatprep.subr.bf16.mxu1 %v9090_v39 }
 0x3a8   :  { %8222 = vmatmul.mubr.bf16.vlgmr.msra.gmra.mrb[124].mxu1 %v4347_v18  ;;  %v4781_v18 = vld [vmem:[%s11191_s4] sm:$0x1] }
 0x3a9   :  { %8238 = vmatpush3.bf16.msra.mxu1 %v8842_v37  ;;  %8253 = vmatprep.mubr.msk.bf16.mxu1 %vm9091_vm0, %v9090_v39  ;;  %v8899_v37 = vld [vmem:[%s11192_s5 + $0x54] ss:$8 sps:$4 sm:$0xff]  }
 0x3aa   :  { %8239 = vmatprep.subr.bf16.mxu1 %v9090_v39 }
 0x3ad   :  { %8240 = vmatpush3.bf16.msra.mxu1 %v8843_v51  ;;  %v8897_v51 = vld [vmem:[%s11192_s5 + $0x50] ss:$8 sps:$4 sm:$0xff]  }
 0x3ae   :  { %8241 = vmatprep.subr.bf16.mxu1 %v9090_v39 }
 0x3b1   :  { %8242 = vmatpush3.bf16.msra.mxu1 %v8844_v31  ;;  %v8902_v31 = vld [vmem:[%s11192_s5 + $0x64] ss:$8 sps:$4 sm:$0xff]  }
 0x3b2   :  { %8243 = vmatprep.subr.bf16.mxu1 %v9090_v39 }
 0x3b5   :  { %8244 = vmatpush3.bf16.msra.mxu1 %v8845_v46  ;;  %v8900_v46 = vld [vmem:[%s11192_s5 + $0x60] ss:$8 sps:$4 sm:$0xff]  }
 0x3b6   :  { %8245 = vmatprep.subr.bf16.mxu1 %v9090_v39 }
 0x3b9   :  { %8246 = vmatpush3.bf16.msra.mxu1 %v8846_v59  ;;  %v8905_v59 = vld [vmem:[%s11192_s5 + $0x74] ss:$8 sps:$4 sm:$0xff]  }
 0x3ba   :  { %8247 = vmatprep.subr.bf16.mxu1 %v9090_v39 }
 0x3bd   :  { %8248 = vmatpush3.bf16.msra.mxu1 %v8847_v61  ;;  %v8903_v61 = vld [vmem:[%s11192_s5 + $0x70] ss:$8 sps:$4 sm:$0xff]  }
 0x3be   :  { %8249 = vmatprep.subr.bf16.mxu1 %v9090_v39 }
 0x3c1   :  { %8250 = vmatpush3.bf16.msra.mxu1 %v8848_v47 }
 0x3c2   :  { %8251 = vmatprep.subr.bf16.mxu1 %v9090_v39 }
 0x3c5   :  { %8252 = vmatpush3.bf16.msra.mxu1 %v8849_v32  ;;  %v8908_v32 = vld [vmem:[%s11192_s5 + $0x104] ss:$8 sps:$4 sm:$0xff]  }
 0x3c6   :  { %8269 = vmatprep.subr.bf16.mxu1 %v9090_v39 }
 0x3c8   :  { %8254 = vmatmul.mubr.bf16.vlgmr.msra.gmra.mrb[124].mxu1 %v4508_v12  ;;  %v8867_v12 = vld [vmem:[%s11192_s5 + $0xb0] ss:$8 sps:$4 sm:$0xff]  }
 0x3c9   :  { %8270 = vmatpush3.bf16.msra.mxu1 %v8850_v50  ;;  %8285 = vmatprep.mubr.msk.bf16.mxu1 %vm9091_vm0, %v9090_v39  ;;  %v7061_v50 = vld [vmem:[%s11191_s4 + $0x2] sm:$0x1] }
 0x3ca   :  { %8271 = vmatprep.subr.bf16.mxu1 %v9090_v39 }
 0x3cd   :  { %8272 = vmatpush3.bf16.msra.mxu1 %v8851_v60  ;;  %v8906_v60 = vld [vmem:[%s11192_s5 + $0x100] ss:$8 sps:$4 sm:$0xff]  }
 0x3ce   :  { %8273 = vmatprep.subr.bf16.mxu1 %v9090_v39 }
 0x3d1   :  { %8274 = vmatpush3.bf16.msra.mxu1 %v8852_v1  ;;  %v8911_v1 = vld [vmem:[%s11192_s5 + $0x114] ss:$8 sps:$4 sm:$0xff]  }
 0x3d2   :  { %8275 = vmatprep.subr.bf16.mxu1 %v9090_v39 }
 0x3d5   :  { %8276 = vmatpush3.bf16.msra.mxu1 %v8853_v4  ;;  %v8909_v4 = vld [vmem:[%s11192_s5 + $0x110] ss:$8 sps:$4 sm:$0xff]  }
 0x3d6   :  { %8277 = vmatprep.subr.bf16.mxu1 %v9090_v39 }
 0x3d9   :  { %8278 = vmatpush3.bf16.msra.mxu1 %v8854_v55  ;;  %v8914_v55 = vld [vmem:[%s11192_s5 + $0x124] ss:$8 sps:$4 sm:$0xff]  }
 0x3da   :  { %8279 = vmatprep.subr.bf16.mxu1 %v9090_v39 }
 0x3dd   :  { %8280 = vmatpush3.bf16.msra.mxu1 %v8855_v7  ;;  %v8912_v7 = vld [vmem:[%s11192_s5 + $0x120] ss:$8 sps:$4 sm:$0xff]  }
 0x3de   :  { %8281 = vmatprep.subr.bf16.mxu1 %v9090_v39 }
 0x3e1   :  { %8282 = vmatpush3.bf16.msra.mxu1 %v8856_v41  ;;  %v8917_v41 = vld [vmem:[%s11192_s5 + $0x134] ss:$8 sps:$4 sm:$0xff]  }
 0x3e2   :  { %8283 = vmatprep.subr.bf16.mxu1 %v9090_v39 }
 0x3e5   :  { %8284 = vmatpush3.bf16.msra.mxu1 %v8857_v9  ;;  %v8915_v9 = vld [vmem:[%s11192_s5 + $0x130] ss:$8 sps:$4 sm:$0xff]  }
 0x3e6   :  { %8289 = vmatprep.subr.bf16.mxu1 %v9090_v39 }
 0x3e8   :  { %8286 = vmatmul.mubr.bf16.vlgmr.msra.gmra.mrb[124].mxu1 %v4669_v28 }
 0x3e9   :  { %8291 = vmatprep.mubr.msk.bf16.mxu1 %vm9091_vm0, %v9090_v39 }
 0x4bb   :  { %v4769_v57 = vpop.f32.mrb[124].mxu1 }
 0x4bc   :  { %v8287_v62 = vpop.f32.mrb[125].mxu1  ;;  %v4778_v10 = vmax.f32 %v4769_v57, 0.0  ;;  %v8920_v57 = vld [vmem:[%s11192_s5 + $0x144] ss:$8 sps:$4 sm:$0xff]  }
 0x4bd   :  { %v4772_v63 = vpop.f32.mrb[126].mxu1  ;;  %v8918_v62 = vld [vmem:[%s11192_s5 + $0x140] ss:$8 sps:$4 sm:$0xff]  }
 0x4be   :  { %v4779_v11 = vmax.f32 %v4772_v63, 0.0  ;;  %v8288_v0 = vpop.f32.mrb[127].mxu1  ;;  %v8923_v63 = vld [vmem:[%s11192_s5 + $0x154] ss:$8 sps:$4 sm:$0xff]  }
 0x4bf   :  { %v8924_v0 = vld [vmem:[%s11192_s5 + $0x160] ss:$8 sps:$4 sm:$0xff]  }
 0x4c0   :  { %v10666_v16 = vpack.c.bf16 %v4779_v11, %v4778_v10  ;;  %v8921_v10 = vld [vmem:[%s11192_s5 + $0x150] ss:$8 sps:$4 sm:$0xff]   ;;  %v8926_v11 = vld [vmem:[%s11192_s5 + $0x164] ss:$8 sps:$4 sm:$0xff]  }
 0x4c2   :  { %8290 = vmatpush3.bf16.msra.mxu1 %v10666_v16  ;;  %8296 = vmatpush3.bf16.msra.mxu0 %v10666_v16 }
 0x4c3   :  { %8319 = vmatprep.subr.bf16.mxu1 %v9090_v39  ;;  %4986 = vmatprep.subr.bf16.mxu0 %v8860_v6  ;;  %v8929_v6 = vld [vmem:[%s11192_s5 + $0x174] ss:$8 sps:$4 sm:$0xff]  }
 0x4c5   :  { %8292 = vmatmul.mubr.msk.bf16.vlgmr.msra.gmra.mrb[128].mxu1 %vm4782_vm2, %v4781_v18  ;;  %8298 = vmatmul.mubr.msk.bf16.vlgmr.msra.gmra.mrb[128].mxu0 %vm4782_vm2, %v7011_v3  ;;  %v8927_v18 = vld [vmem:[%s11192_s5 + $0x170] ss:$8 sps:$4 sm:$0xff]  }
 0x4c6   :  { %8320 = vmatpush3.bf16.msra.mxu1 %v10666_v16  ;;  %8321 = vmatprep.mubr.msk.bf16.mxu1 %vm9091_vm0, %v9090_v39 }
 0x4c7   :  { %8325 = vmatprep.subr.bf16.mxu1 %v9090_v39  ;;  %4987 = vmatpush1.bf16.msra.mxu0 %v8858_v20 }
 0x4c8   :  { %4988 = vmatprep.subr.bf16.mxu0 %v8863_v21  ;;  %5018 = vmatprep.mubr.bf16.mxu0 %v9092_v36 }
 0x4cb   :  { %4989 = vmatpush1.bf16.msra.mxu0 %v8861_v8  ;;  %v8932_v8 = vld [vmem:[%s11192_s5 + $0x184] ss:$8 sps:$4 sm:$0xff]  }
 0x4cc   :  { %4990 = vmatprep.subr.bf16.mxu0 %v8866_v23 }
 0x4cd   :  { %8322 = vmatmul.mubr.msk.bf16.vlgmr.msra.gmra.mrb[132].mxu1 %vm4782_vm2, %v7163_v24 }
 0x4ce   :  { %8326 = vmatpush3.bf16.msra.mxu1 %v10666_v16  ;;  %8327 = vmatprep.mubr.msk.bf16.mxu1 %vm9091_vm0, %v9090_v39 }
 0x4cf   :  { %8331 = vmatprep.subr.bf16.mxu1 %v9090_v39  ;;  %4991 = vmatpush1.bf16.msra.mxu0 %v8864_v25  ;;  %v7095_v25 = vld [vmem:[%s11191_s4 + $0x3] sm:$0x1] }
 0x4d0   :  { %4992 = vmatprep.subr.bf16.mxu0 %v8869_v53  ;;  %v8930_v53 = vld [vmem:[%s11192_s5 + $0x180] ss:$8 sps:$4 sm:$0xff]  }
 0x4d3   :  { %4993 = vmatpush1.bf16.msra.mxu0 %v8867_v12  ;;  %v8935_v12 = vld [vmem:[%s11192_s5 + $0x194] ss:$8 sps:$4 sm:$0xff]  }
 0x4d4   :  { %4994 = vmatprep.subr.bf16.mxu0 %v8872_v15  ;;  %v8933_v15 = vld [vmem:[%s11192_s5 + $0x190] ss:$8 sps:$4 sm:$0xff]  }
 0x4d5   :  { %8328 = vmatmul.mubr.msk.bf16.vlgmr.msra.gmra.mrb[136].mxu1 %vm4782_vm2, %v7197_v26  ;;  %v8938_v26 = vld [vmem:[%s11192_s5 + $0x1a4] ss:$8 sps:$4 sm:$0xff]  }
 0x4d6   :  { %8332 = vmatpush3.bf16.msra.mxu1 %v10666_v16  ;;  %8333 = vmatprep.mubr.msk.bf16.mxu1 %vm9091_vm0, %v9090_v39 }
 0x4d7   :  { %4995 = vmatpush1.bf16.msra.mxu0 %v8870_v40  ;;  %v8936_v40 = vld [vmem:[%s11192_s5 + $0x1a0] ss:$8 sps:$4 sm:$0xff]  }
 0x4d8   :  { %4996 = vmatprep.subr.bf16.mxu0 %v8875_v27  ;;  %v8941_v27 = vld [vmem:[%s11192_s5 + $0x1b4] ss:$8 sps:$4 sm:$0xff]  }
 0x4db   :  { %4997 = vmatpush1.bf16.msra.mxu0 %v8873_v29  ;;  %v8939_v29 = vld [vmem:[%s11192_s5 + $0x1b0] ss:$8 sps:$4 sm:$0xff]  }
 0x4dc   :  { %4998 = vmatprep.subr.bf16.mxu0 %v8878_v33  ;;  %v8944_v33 = vld [vmem:[%s11192_s5 + $0x1c4] ss:$8 sps:$4 sm:$0xff]  }
 0x4df   :  { %4999 = vmatpush1.bf16.msra.mxu0 %v8876_v19  ;;  %v8942_v19 = vld [vmem:[%s11192_s5 + $0x1c0] ss:$8 sps:$4 sm:$0xff]  }
 0x4e0   :  { %5000 = vmatprep.subr.bf16.mxu0 %v8881_v34  ;;  %v8947_v34 = vld [vmem:[%s11192_s5 + $0x1d4] ss:$8 sps:$4 sm:$0xff]  }
 0x4e3   :  { %5001 = vmatpush1.bf16.msra.mxu0 %v8879_v2  ;;  %v8945_v2 = vld [vmem:[%s11192_s5 + $0x1d0] ss:$8 sps:$4 sm:$0xff]  }
 0x4e4   :  { %5107 = vmatprep.subr.bf16.mxu0 %v8884_v22  ;;  %v8950_v22 = vld [vmem:[%s11192_s5 + $0x1e4] ss:$8 sps:$4 sm:$0xff]  }
 0x598   :  { %v4882_v28 = vpop.f32.mrb[128].mxu0  ;;  %v4820_v14 = vpop.f32.mrb[128].mxu1 }
 0x599   :  { %v4888_v56 = vpack.c.bf16 %v4882_v28, %v4882_v28  ;;  %v8299_v44 = vpop.f32.mrb[129].mxu0  ;;  %v8293_v30 = vpop.f32.mrb[129].mxu1  ;;  %v4826_v47 = vpack.c.bf16 %v4820_v14, %v4820_v14  ;;  %v8948_v28 = vld [vmem:[%s11192_s5 + $0x1e0] ss:$8 sps:$4 sm:$0xff]   ;;  %v8951_v14 = vld [vmem:[%s11192_s5 + $0x1f0] ss:$8 sps:$4 sm:$0xff]  }
 0x59a   :  { %v4885_v45 = vpop.f32.mrb[130].mxu0  ;;  %v4823_v13 = vpop.f32.mrb[130].mxu1 }
 0x59b   :  { %5019 = vmatmul.mubr.bf16.vlgmr.msra.gmra.mrb[132].mxu0 %v4888_v56  ;;  %v8300_v17 = vpop.f32.mrb[131].mxu0  ;;  %v8294_v49 = vpop.f32.mrb[131].mxu1  ;;  %v7231_v56 = vld [vmem:[%s11191_s4 + $0x7] sm:$0x1] }
 0x59c   :  { %5108 = vmatpush1.bf16.msra.mxu0 %v8882_v43  ;;  %5139 = vmatprep.mubr.bf16.mxu0 %v9092_v36  ;;  %v8953_v43 = vld [vmem:[%s11192_s5 + $0x1f4] ss:$8 sps:$4 sm:$0xff]   ;;  %v8956_v45 = vld [vmem:[%s11192_s5 + $0x204] ss:$8 sps:$4 sm:$0xff]  }
 0x59d   :  { %5109 = vmatprep.subr.bf16.mxu0 %v8887_v5  ;;  %8334 = vmatmul.mubr.msk.bf16.vlgmr.msra.gmra.mrb[140].mxu1 %vm4782_vm2, %v7231_v56  ;;  %v7129_v49 = vld [vmem:[%s11191_s4 + $0x4] sm:$0x1]  ;;  %v8995_v56 = vld [vmem:[%s11192_s5 + $0x2d4] ss:$8 sps:$4 sm:$0xff]  }
 0x5a0   :  { %5110 = vmatpush1.bf16.msra.mxu0 %v8885_v52  ;;  %v8954_v52 = vld [vmem:[%s11192_s5 + $0x200] ss:$8 sps:$4 sm:$0xff]  }
 0x5a1   :  { %5111 = vmatprep.subr.bf16.mxu0 %v8890_v54  ;;  %v8959_v54 = vld [vmem:[%s11192_s5 + $0x214] ss:$8 sps:$4 sm:$0xff]  }
 0x5a4   :  { %5112 = vmatpush1.bf16.msra.mxu0 %v8888_v38  ;;  %v8960_v38 = vld [vmem:[%s11192_s5 + $0x220] ss:$8 sps:$4 sm:$0xff]  }
 0x5a5   :  { %5113 = vmatprep.subr.bf16.mxu0 %v8893_v35  ;;  %v8965_v35 = vld [vmem:[%s11192_s5 + $0x234] ss:$8 sps:$4 sm:$0xff]  }
 0x5a8   :  { %5114 = vmatpush1.bf16.msra.mxu0 %v8891_v42  ;;  %v8963_v42 = vld [vmem:[%s11192_s5 + $0x230] ss:$8 sps:$4 sm:$0xff]  }
 0x5a9   :  { %5115 = vmatprep.subr.bf16.mxu0 %v8896_v58  ;;  %v8968_v58 = vld [vmem:[%s11192_s5 + $0x244] ss:$8 sps:$4 sm:$0xff]  }
 0x5ac   :  { %5116 = vmatpush1.bf16.msra.mxu0 %v8894_v48  ;;  %v8966_v48 = vld [vmem:[%s11192_s5 + $0x240] ss:$8 sps:$4 sm:$0xff]  }
 0x5ad   :  { %5117 = vmatprep.subr.bf16.mxu0 %v8899_v37  ;;  %v8971_v37 = vld [vmem:[%s11192_s5 + $0x254] ss:$8 sps:$4 sm:$0xff]  }
 0x5b0   :  { %5118 = vmatpush1.bf16.msra.mxu0 %v8897_v51  ;;  %v8969_v51 = vld [vmem:[%s11192_s5 + $0x250] ss:$8 sps:$4 sm:$0xff]  }
 0x5b1   :  { %5119 = vmatprep.subr.bf16.mxu0 %v8902_v31  ;;  %v8974_v31 = vld [vmem:[%s11192_s5 + $0x264] ss:$8 sps:$4 sm:$0xff]  }
 0x5b4   :  { %5120 = vmatpush1.bf16.msra.mxu0 %v8900_v46  ;;  %v8972_v46 = vld [vmem:[%s11192_s5 + $0x260] ss:$8 sps:$4 sm:$0xff]  }
 0x5b5   :  { %5121 = vmatprep.subr.bf16.mxu0 %v8905_v59  ;;  %v8977_v59 = vld [vmem:[%s11192_s5 + $0x274] ss:$8 sps:$4 sm:$0xff]  }
 0x5b8   :  { %5122 = vmatpush1.bf16.msra.mxu0 %v8903_v61  ;;  %v8975_v61 = vld [vmem:[%s11192_s5 + $0x270] ss:$8 sps:$4 sm:$0xff]  }
 0x5b9   :  { %8301 = vmatprep.subr.bf16.mxu0 %v9090_v39 }
 0x5bb   :  { %5140 = vmatmul.mubr.bf16.vlgmr.msra.gmra.mrb[132].mxu0 %v4826_v47  ;;  %v8980_v47 = vld [vmem:[%s11192_s5 + $0x284] ss:$8 sps:$4 sm:$0xff]  }
 0x5bc   :  { %8302 = vmatpush3.bf16.msra.mxu0 %v10666_v16  ;;  %8303 = vmatprep.mubr.msk.bf16.mxu0 %vm9091_vm0, %v9090_v39 }
 0x5bd   :  { %5291 = vmatprep.subr.bf16.mxu0 %v8908_v32  ;;  %v10971_v32 = vpop.f32.mrb[132].mxu1 }
 0x5c3   :  { %8304 = vmatmul.mubr.msk.bf16.vlgmr.msra.gmra.mrb[136].mxu0 %vm4782_vm2, %v7061_v50  ;;  %v8323_v50 = vpop.f32.mrb[133].mxu1 }
 0x5c4   :  { %5292 = vmatpush1.bf16.msra.mxu0 %v8906_v60  ;;  %5323 = vmatprep.mubr.bf16.mxu0 %v9092_v36  ;;  %v5748_v60 = vpop.f32.mrb[134].mxu1  ;;  %v9026_v50 = vld [vmem:[%s11192_s5 + $0x380] ss:$8 sps:$4 sm:$0xff]  }
 0x5c5   :  { %5293 = vmatprep.subr.bf16.mxu0 %v8911_v1  ;;  %v8324_v1 = vpop.f32.mrb[135].mxu1  ;;  %v9031_v60 = vld [vmem:[%s11192_s5 + $0x394] ss:$8 sps:$4 sm:$0xff]  }
 0x5c6   :  { %v9029_v1 = vld [vmem:[%s11192_s5 + $0x390] ss:$8 sps:$4 sm:$0xff]  }
 0x5c8   :  { %5294 = vmatpush1.bf16.msra.mxu0 %v8909_v4  ;;  %v10973_v4 = vpop.f32.mrb[136].mxu1 }
 0x5c9   :  { %5295 = vmatprep.subr.bf16.mxu0 %v8914_v55  ;;  %v8329_v55 = vpop.f32.mrb[137].mxu1 }
 0x5ca   :  { %v9032_v55 = vld [vmem:[%s11192_s5 + $0x3a0] ss:$8 sps:$4 sm:$0xff]  }
 0x5cc   :  { %5296 = vmatpush1.bf16.msra.mxu0 %v8912_v7  ;;  %v5934_v7 = vpop.f32.mrb[138].mxu1 }
 0x5cd   :  { %5297 = vmatprep.subr.bf16.mxu0 %v8917_v41  ;;  %v8330_v41 = vpop.f32.mrb[139].mxu1  ;;  %v9037_v7 = vld [vmem:[%s11192_s5 + $0x3b4] ss:$8 sps:$4 sm:$0xff]  }
 0x5ce   :  { %v9040_v41 = vld [vmem:[%s11192_s5 + $0x3c4] ss:$8 sps:$4 sm:$0xff]  }
 0x5d0   :  { %5298 = vmatpush1.bf16.msra.mxu0 %v8915_v9 }
 0x5d1   :  { %5299 = vmatprep.subr.bf16.mxu0 %v8920_v57 }
 0x5d4   :  { %5300 = vmatpush1.bf16.msra.mxu0 %v8918_v62 }
 0x5d5   :  { %5301 = vmatprep.subr.bf16.mxu0 %v8923_v63 }
 0x5d8   :  { %5302 = vmatpush1.bf16.msra.mxu0 %v8921_v10  ;;  %v9050_v10 = vld [vmem:[%s11193_s6 + $0x40] sm:$0xff]  }
 0x5d9   :  { %5303 = vmatprep.subr.bf16.mxu0 %v8926_v11  ;;  %v9051_v11 = vld [vmem:[%s11193_s6] sm:$0xff]   ;;  %7955 = vmatprep.subr.bf16.mxu1 %v9050_v10 }
 0x5da   :  { %7956 = vmatpush3.bf16.msra.mxu1 %v9051_v11  ;;  %v9046_v10 = vld [vmem:[%s11192_s5 + $0x3e4] ss:$8 sps:$4 sm:$0xff]   ;;  %v9044_v11 = vld [vmem:[%s11192_s5 + $0x3e0] ss:$8 sps:$4 sm:$0xff]  }
 0x5dc   :  { %5304 = vmatpush1.bf16.msra.mxu0 %v8924_v0  ;;  %v9052_v0 = vld [vmem:[%s11193_s6 + $0x48] sm:$0xff]  }
 0x5dd   :  { %5305 = vmatprep.subr.bf16.mxu0 %v8929_v6  ;;  %v9053_v6 = vld [vmem:[%s11193_s6 + $0x8] sm:$0xff]   ;;  %7957 = vmatprep.subr.bf16.mxu1 %v9052_v0  ;;  %v9049_v0 = vld [vmem:[%s11192_s5 + $0x3f4] ss:$8 sps:$4 sm:$0xff]  }
 0x5de   :  { %7958 = vmatpush3.bf16.msra.mxu1 %v9053_v6  ;;  %v9047_v6 = vld [vmem:[%s11192_s5 + $0x3f0] ss:$8 sps:$4 sm:$0xff]  }
 0x5e0   :  { %5306 = vmatpush1.bf16.msra.mxu0 %v8927_v18  ;;  %v9054_v18 = vld [vmem:[%s11193_s6 + $0x50] sm:$0xff]  }
 0x5e1   :  { %8307 = vmatprep.subr.bf16.mxu0 %v9090_v39  ;;  %7959 = vmatprep.subr.bf16.mxu1 %v9054_v18 }
 0x670   :  { %v10975_v9 = vpop.f32.mrb[140].mxu1 }
 0x671   :  { %v8335_v57 = vpop.f32.mrb[141].mxu1  ;;  %v6123_v18 = vpack.c.bf16 %v10975_v9, %v10975_v9 }
 0x672   :  { %v6120_v62 = vpop.f32.mrb[142].mxu1  ;;  %v9038_v57 = vld [vmem:[%s11192_s5 + $0x3c0] ss:$8 sps:$4 sm:$0xff]  }
 0x673   :  { %v8336_v63 = vpop.f32.mrb[143].mxu1  ;;  %v9043_v62 = vld [vmem:[%s11192_s5 + $0x3d4] ss:$8 sps:$4 sm:$0xff]  }
 0x674   :  { %v9041_v63 = vld [vmem:[%s11192_s5 + $0x3d0] ss:$8 sps:$4 sm:$0xff]  }
 0x696   :  { %v5187_v3 = vpop.f32.mrb[136].mxu0 }
 0x697   :  { %v5193_v20 = vpack.c.bf16 %v5187_v3, %v5187_v3  ;;  %v8305_v21 = vpop.f32.mrb[137].mxu0  ;;  %v9055_v3 = vld [vmem:[%s11193_s6 + $0x10] sm:$0xff]  }
 0x698   :  { %v5190_v23 = vpop.f32.mrb[138].mxu0  ;;  %7960 = vmatpush3.bf16.msra.mxu1 %v9055_v3  ;;  %v9057_v21 = vld [vmem:[%s11193_s6 + $0x18] sm:$0xff]   ;;  %v9063_v3 = vld [vmem:[%s11193_s6 + $0x30] sm:$0xff]  }
 0x699   :  { %5324 = vmatmul.mubr.bf16.vlgmr.msra.gmra.mrb[132].mxu0 %v5193_v20  ;;  %v8306_v24 = vpop.f32.mrb[139].mxu0  ;;  %v9056_v20 = vld [vmem:[%s11193_s6 + $0x58] sm:$0xff]   ;;  %v9059_v23 = vld [vmem:[%s11193_s6 + $0x20] sm:$0xff]  }
 0x69a   :  { %8308 = vmatpush3.bf16.msra.mxu0 %v10666_v16  ;;  %8309 = vmatprep.mubr.msk.bf16.mxu0 %vm9091_vm0, %v9090_v39  ;;  %v9060_v24 = vld [vmem:[%s11193_s6 + $0x68] sm:$0xff]  }
 0x69b   :  { %5477 = vmatprep.subr.bf16.mxu0 %v8932_v8  ;;  %7961 = vmatprep.subr.bf16.mxu1 %v9056_v20  ;;  %v9058_v8 = vld [vmem:[%s11193_s6 + $0x60] sm:$0xff]   ;;  %v9064_v20 = vld [vmem:[%s11193_s6 + $0x78] sm:$0xff]  }
 0x69c   :  { %7962 = vmatpush3.bf16.msra.mxu1 %v9057_v21  ;;  %v9065_v21 = vld [vmem:[%s11193_s6 + $0x38] sm:$0xff]  }
 0x69d   :  { %7963 = vmatprep.subr.bf16.mxu1 %v9058_v8 }
 0x6a0   :  { %7964 = vmatpush3.bf16.msra.mxu1 %v9059_v23 }
 0x6a1   :  { %8310 = vmatmul.mubr.msk.bf16.vlgmr.msra.gmra.mrb[140].mxu0 %vm4782_vm2, %v7095_v25  ;;  %v9061_v25 = vld [vmem:[%s11193_s6 + $0x28] sm:$0xff]   ;;  %7965 = vmatprep.subr.bf16.mxu1 %v9060_v24 }
 0x6a2   :  { %5478 = vmatpush1.bf16.msra.mxu0 %v8930_v53  ;;  %5509 = vmatprep.mubr.bf16.mxu0 %v9092_v36  ;;  %v9062_v53 = vld [vmem:[%s11193_s6 + $0x70] sm:$0xff]  }
 0x6a3   :  { %5479 = vmatprep.subr.bf16.mxu0 %v8935_v12 }
 0x6a4   :  { %7966 = vmatpush3.bf16.msra.mxu1 %v9061_v25 }
 0x6a5   :  { %7967 = vmatprep.subr.bf16.mxu1 %v9062_v53 }
 0x6a6   :  { %5480 = vmatpush1.bf16.msra.mxu0 %v8933_v15  ;;  %v8978_v15 = vld [vmem:[%s11192_s5 + $0x280] ss:$8 sps:$4 sm:$0xff]  }
 0x6a7   :  { %5481 = vmatprep.subr.bf16.mxu0 %v8938_v26 }
 0x6a8   :  { %7968 = vmatpush3.bf16.msra.mxu1 %v9063_v3 }
 0x6a9   :  { %7969 = vmatprep.subr.bf16.mxu1 %v9064_v20 }
 0x6aa   :  { %5482 = vmatpush1.bf16.msra.mxu0 %v8936_v40  ;;  %v8983_v40 = vld [vmem:[%s11192_s5 + $0x294] ss:$8 sps:$4 sm:$0xff]  }
 0x6ab   :  { %5483 = vmatprep.subr.bf16.mxu0 %v8941_v27 }
 0x6ac   :  { %7970 = vmatpush3.bf16.msra.mxu1 %v9065_v21 }
 0x6ae   :  { %5484 = vmatpush1.bf16.msra.mxu0 %v8939_v29 }
 0x6af   :  { %5485 = vmatprep.subr.bf16.mxu0 %v8944_v33 }
 0x6b2   :  { %5486 = vmatpush1.bf16.msra.mxu0 %v8942_v19  ;;  %v8981_v19 = vld [vmem:[%s11192_s5 + $0x290] ss:$8 sps:$4 sm:$0xff]  }
 0x6b3   :  { %5487 = vmatprep.subr.bf16.mxu0 %v8947_v34  ;;  %v8986_v34 = vld [vmem:[%s11192_s5 + $0x2a4] ss:$8 sps:$4 sm:$0xff]  }
 0x6b6   :  { %5488 = vmatpush1.bf16.msra.mxu0 %v8945_v2  ;;  %v8984_v2 = vld [vmem:[%s11192_s5 + $0x2a0] ss:$8 sps:$4 sm:$0xff]  }
 0x6b7   :  { %5489 = vmatprep.subr.bf16.mxu0 %v8950_v22  ;;  %v8989_v22 = vld [vmem:[%s11192_s5 + $0x2b4] ss:$8 sps:$4 sm:$0xff]  }
 0x6ba   :  { %5490 = vmatpush1.bf16.msra.mxu0 %v8948_v28  ;;  %v8987_v28 = vld [vmem:[%s11192_s5 + $0x2b0] ss:$8 sps:$4 sm:$0xff]  }
 0x6bb   :  { %5491 = vmatprep.subr.bf16.mxu0 %v8953_v43  ;;  %v8992_v43 = vld [vmem:[%s11192_s5 + $0x2c4] ss:$8 sps:$4 sm:$0xff]  }
 0x6be   :  { %5492 = vmatpush1.bf16.msra.mxu0 %v8951_v14  ;;  %v8990_v14 = vld [vmem:[%s11192_s5 + $0x2c0] ss:$8 sps:$4 sm:$0xff]  }
 0x6bf   :  { %8313 = vmatprep.subr.bf16.mxu0 %v9090_v39 }
 0x774   :  { %v5373_v5 = vpop.f32.mrb[140].mxu0 }
 0x775   :  { %v5379_v44 = vpack.c.bf16 %v5373_v5, %v5373_v5  ;;  %v8311_v30 = vpop.f32.mrb[141].mxu0  ;;  %v8993_v5 = vld [vmem:[%s11192_s5 + $0x2d0] ss:$8 sps:$4 sm:$0xff]  }
 0x776   :  { %v5376_v13 = vpop.f32.mrb[142].mxu0  ;;  %v8996_v30 = vld [vmem:[%s11192_s5 + $0x2e0] ss:$8 sps:$4 sm:$0xff]  }
 0x777   :  { %5510 = vmatmul.mubr.bf16.vlgmr.msra.gmra.mrb[132].mxu0 %v5379_v44  ;;  %v8312_v17 = vpop.f32.mrb[143].mxu0  ;;  %v8998_v44 = vld [vmem:[%s11192_s5 + $0x2e4] ss:$8 sps:$4 sm:$0xff]   ;;  %v8999_v13 = vld [vmem:[%s11192_s5 + $0x2f0] ss:$8 sps:$4 sm:$0xff]  }
 0x778   :  { %8314 = vmatpush3.bf16.msra.mxu0 %v10666_v16  ;;  %8315 = vmatprep.mubr.msk.bf16.mxu0 %vm9091_vm0, %v9090_v39  ;;  %v8957_v39 = vld [vmem:[%s11192_s5 + $0x210] ss:$8 sps:$4 sm:$0xff]   ;;  %v8962_v16 = vld [vmem:[%s11192_s5 + $0x224] ss:$8 sps:$4 sm:$0xff]  }
 0x779   :  { %5663 = vmatprep.subr.bf16.mxu0 %v8956_v45  ;;  %v9001_v45 = vld [vmem:[%s11192_s5 + $0x2f4] ss:$8 sps:$4 sm:$0xff]   ;;  %v9004_v17 = vld [vmem:[%s11192_s5 + $0x304] ss:$8 sps:$4 sm:$0xff]  }
 0x77f   :  { %8316 = vmatmul.mubr.msk.bf16.vlgmr.msra.gmra.mrb[144].mxu0 %vm4782_vm2, %v7129_v49  ;;  %v5751_v49 = vpack.c.bf16 %v10971_v32, %v10971_v32  ;;  %v5937_v32 = vpack.c.bf16 %v10973_v4, %v10973_v4  ;;  %v9034_v4 = vld [vmem:[%s11192_s5 + $0x3a4] ss:$8 sps:$4 sm:$0xff]  }
 0x780   :  { %5664 = vmatpush1.bf16.msra.mxu0 %v8954_v52  ;;  %5695 = vmatprep.mubr.bf16.mxu0 %v9092_v36  ;;  %v9002_v52 = vld [vmem:[%s11192_s5 + $0x300] ss:$8 sps:$4 sm:$0xff]  }
 0x781   :  { %5665 = vmatprep.subr.bf16.mxu0 %v8959_v54  ;;  %v9007_v54 = vld [vmem:[%s11192_s5 + $0x314] ss:$8 sps:$4 sm:$0xff]  }
 0x784   :  { %5666 = vmatpush1.bf16.msra.mxu0 %v8957_v39  ;;  %v9005_v39 = vld [vmem:[%s11192_s5 + $0x310] ss:$8 sps:$4 sm:$0xff]  }
 0x785   :  { %5667 = vmatprep.subr.bf16.mxu0 %v8962_v16  ;;  %v9010_v16 = vld [vmem:[%s11192_s5 + $0x324] ss:$8 sps:$4 sm:$0xff]  }
 0x788   :  { %5668 = vmatpush1.bf16.msra.mxu0 %v8960_v38  ;;  %v9008_v38 = vld [vmem:[%s11192_s5 + $0x320] ss:$8 sps:$4 sm:$0xff]  }
 0x789   :  { %5669 = vmatprep.subr.bf16.mxu0 %v8965_v35  ;;  %v9013_v35 = vld [vmem:[%s11192_s5 + $0x334] ss:$8 sps:$4 sm:$0xff]  }
 0x78c   :  { %5670 = vmatpush1.bf16.msra.mxu0 %v8963_v42  ;;  %v9011_v42 = vld [vmem:[%s11192_s5 + $0x330] ss:$8 sps:$4 sm:$0xff]  }
 0x78d   :  { %5671 = vmatprep.subr.bf16.mxu0 %v8968_v58  ;;  %v9016_v58 = vld [vmem:[%s11192_s5 + $0x344] ss:$8 sps:$4 sm:$0xff]  }
 0x790   :  { %5672 = vmatpush1.bf16.msra.mxu0 %v8966_v48  ;;  %v9014_v48 = vld [vmem:[%s11192_s5 + $0x340] ss:$8 sps:$4 sm:$0xff]  }
 0x791   :  { %5673 = vmatprep.subr.bf16.mxu0 %v8971_v37  ;;  %v9019_v37 = vld [vmem:[%s11192_s5 + $0x354] ss:$8 sps:$4 sm:$0xff]  }
 0x794   :  { %5674 = vmatpush1.bf16.msra.mxu0 %v8969_v51  ;;  %v9017_v51 = vld [vmem:[%s11192_s5 + $0x350] ss:$8 sps:$4 sm:$0xff]  }
 0x795   :  { %5675 = vmatprep.subr.bf16.mxu0 %v8974_v31  ;;  %v9022_v31 = vld [vmem:[%s11192_s5 + $0x364] ss:$8 sps:$4 sm:$0xff]  }
 0x798   :  { %5676 = vmatpush1.bf16.msra.mxu0 %v8972_v46  ;;  %v9020_v46 = vld [vmem:[%s11192_s5 + $0x360] ss:$8 sps:$4 sm:$0xff]  }
 0x799   :  { %5677 = vmatprep.subr.bf16.mxu0 %v8977_v59  ;;  %v9025_v59 = vld [vmem:[%s11192_s5 + $0x374] ss:$8 sps:$4 sm:$0xff]  }
 0x79c   :  { %5678 = vmatpush1.bf16.msra.mxu0 %v8975_v61  ;;  %v9023_v61 = vld [vmem:[%s11192_s5 + $0x370] ss:$8 sps:$4 sm:$0xff]  }
 0x79d   :  { %5849 = vmatprep.subr.bf16.mxu0 %v8980_v47  ;;  %v9028_v47 = vld [vmem:[%s11192_s5 + $0x384] ss:$8 sps:$4 sm:$0xff]  }
 0x852   :  { %v5559_v12 = vpop.f32.mrb[144].mxu0 }
 0x853   :  { %v5565_v26 = vpack.c.bf16 %v5559_v12, %v5559_v12  ;;  %v8317_v27 = vpop.f32.mrb[145].mxu0 }
 0x854   :  { %v5562_v29 = vpop.f32.mrb[146].mxu0 }
 0x855   :  { %5696 = vmatmul.mubr.bf16.vlgmr.msra.gmra.mrb[132].mxu0 %v5565_v26  ;;  %v8318_v33 = vpop.f32.mrb[147].mxu0 }
 0x856   :  { %5850 = vmatpush1.bf16.msra.mxu0 %v8978_v15  ;;  %5881 = vmatprep.mubr.bf16.mxu0 %v9092_v36 }
 0x857   :  { %5851 = vmatprep.subr.bf16.mxu0 %v8983_v40 }
 0x85a   :  { %5852 = vmatpush1.bf16.msra.mxu0 %v8981_v19 }
 0x85b   :  { %5853 = vmatprep.subr.bf16.mxu0 %v8986_v34 }
 0x85e   :  { %5854 = vmatpush1.bf16.msra.mxu0 %v8984_v2 }
 0x85f   :  { %5855 = vmatprep.subr.bf16.mxu0 %v8989_v22 }
 0x862   :  { %5856 = vmatpush1.bf16.msra.mxu0 %v8987_v28 }
 0x863   :  { %5857 = vmatprep.subr.bf16.mxu0 %v8992_v43 }
 0x866   :  { %5858 = vmatpush1.bf16.msra.mxu0 %v8990_v14 }
 0x867   :  { %5859 = vmatprep.subr.bf16.mxu0 %v8995_v56 }
 0x86a   :  { %5860 = vmatpush1.bf16.msra.mxu0 %v8993_v5 }
 0x86b   :  { %5861 = vmatprep.subr.bf16.mxu0 %v8998_v44 }
 0x86e   :  { %5862 = vmatpush1.bf16.msra.mxu0 %v8996_v30 }
 0x86f   :  { %5863 = vmatprep.subr.bf16.mxu0 %v9001_v45 }
 0x872   :  { %5864 = vmatpush1.bf16.msra.mxu0 %v8999_v13 }
 0x873   :  { %6035 = vmatprep.subr.bf16.mxu0 %v9004_v17 }
 0x875   :  { %5882 = vmatmul.mubr.bf16.vlgmr.msra.gmra.mrb[132].mxu0 %v5751_v49 }
 0x876   :  { %6036 = vmatpush1.bf16.msra.mxu0 %v9002_v52  ;;  %6067 = vmatprep.mubr.bf16.mxu0 %v9092_v36 }
 0x877   :  { %6037 = vmatprep.subr.bf16.mxu0 %v9007_v54 }
 0x87a   :  { %6038 = vmatpush1.bf16.msra.mxu0 %v9005_v39 }
 0x87b   :  { %6039 = vmatprep.subr.bf16.mxu0 %v9010_v16 }
 0x87e   :  { %6040 = vmatpush1.bf16.msra.mxu0 %v9008_v38 }
 0x87f   :  { %6041 = vmatprep.subr.bf16.mxu0 %v9013_v35 }
 0x882   :  { %6042 = vmatpush1.bf16.msra.mxu0 %v9011_v42 }
 0x883   :  { %6043 = vmatprep.subr.bf16.mxu0 %v9016_v58 }
 0x886   :  { %6044 = vmatpush1.bf16.msra.mxu0 %v9014_v48 }
 0x887   :  { %6045 = vmatprep.subr.bf16.mxu0 %v9019_v37 }
 0x88a   :  { %6046 = vmatpush1.bf16.msra.mxu0 %v9017_v51 }
 0x88b   :  { %6047 = vmatprep.subr.bf16.mxu0 %v9022_v31 }
 0x88e   :  { %6048 = vmatpush1.bf16.msra.mxu0 %v9020_v46 }
 0x88f   :  { %6049 = vmatprep.subr.bf16.mxu0 %v9025_v59 }
 0x892   :  { %6050 = vmatpush1.bf16.msra.mxu0 %v9023_v61 }
 0x893   :  { %6221 = vmatprep.subr.bf16.mxu0 %v9028_v47 }
 0x895   :  { %6068 = vmatmul.mubr.bf16.vlgmr.msra.gmra.mrb[132].mxu0 %v5937_v32 }
 0x896   :  { %6222 = vmatpush1.bf16.msra.mxu0 %v9026_v50  ;;  %6253 = vmatprep.mubr.bf16.mxu0 %v9092_v36  ;;  %v9035_v36 = vld [vmem:[%s11192_s5 + $0x3b0] ss:$8 sps:$4 sm:$0xff]   ;;  %s9093_s5 = smov [#allocation2]  }
 0x897   :  { %6223 = vmatprep.subr.bf16.mxu0 %v9031_v60  ;;  %s6444_s3 = sshll.u32 %s9093_s5, 4  ;;  %s6445_s3 = int_to_ptr.vmem [resolvable:$true] %s6444_s3 }
 0x898   :  { %s9066_s6 = scalar_lea.vmem %s6445_s3, 32  ;;  %p9071_p1 = scmp.lt.s32.totalorder %s6445_s3, %s6445_s3 }
 0x899   :  { %p9067_p0 = scmp.ne.s32.totalorder %s6445_s3, %s9066_s6  ;;  %p9072_p2 = scmp.lt.s32.totalorder %s9066_s6, %s9066_s6 }
 0x89a   :  { %6224 = vmatpush1.bf16.msra.mxu0 %v9029_v1 }
 0x89b   :  { %6225 = vmatprep.subr.bf16.mxu0 %v9034_v4  ;;  %p9073_p3 = por %p9072_p2, %p9071_p1 }
 0x89d   :  { %p9074_p4 = pnand %p9073_p3, %p9067_p0 }
 0x89e   :  { %6226 = vmatpush1.bf16.msra.mxu0 %v9032_v55 }
 0x89f   :  { %6227 = vmatprep.subr.bf16.mxu0 %v9037_v7 }
 0x8a2   :  { %6228 = vmatpush1.bf16.msra.mxu0 %v9035_v36 }
 0x8a3   :  { %6229 = vmatprep.subr.bf16.mxu0 %v9040_v41 }
 0x8a6   :  { %6230 = vmatpush1.bf16.msra.mxu0 %v9038_v57 }
 0x8a7   :  { %6231 = vmatprep.subr.bf16.mxu0 %v9043_v62 }
 0x8aa   :  { %6232 = vmatpush1.bf16.msra.mxu0 %v9041_v63 }
 0x8ab   :  { %6233 = vmatprep.subr.bf16.mxu0 %v9046_v10 }
 0x8ae   :  { %6234 = vmatpush1.bf16.msra.mxu0 %v9044_v11 }
 0x8af   :  { %6235 = vmatprep.subr.bf16.mxu0 %v9049_v0 }
 0x8b2   :  { %6236 = vmatpush1.bf16.msra.mxu0 %v9047_v6 }
 0x8b5   :  { %6254 = vmatmul.mubr.bf16.vlgmr.msra.gmra.mrb[132].mxu0 %v6123_v18 }
 0x988   :  { %v6255_v8 = vpop.f32.mrb[132].mxu0 }
 0x989   :  { %v6264_v23 = vmax.f32 %v6255_v8, 0.0  ;;  %v6257_v9 = vpop.f32.mrb[133].mxu0 }
 0x98a   :  { %v6265_v24 = vmax.f32 %v6257_v9, 0.0  ;;  %v6259_v25 = vpop.f32.mrb[134].mxu0 }
 0x98b   :  { %v6260_v53 = vpop.f32.mrb[135].mxu0  ;;  %v6266_v15 = vpack.c.bf16 %v6264_v23, %v6264_v23 }
 0x98c   :  { %v6267_v12 = vpack.c.bf16 %v6265_v24, %v6265_v24 }
 0x98e   :  { %6428 = vmatprep.mubr.bf16.mxu1 %v6267_v12 }
 0x98f   :  { %6429 = vmatmul.mubr.bf16.vlgmr.msra.gmra.mrb[144].mxu1 %v6266_v15 }
 0xa62   :  { %v7971_v26 = vpop.f32.mrb[144].mxu1 }
 0xa63   :  { %v7972_v40 = vpop.f32.mrb[145].mxu1 }
 0xa64   :  { %v7973_v27 = vadd.f32 %v7972_v40, %v7971_v26  ;;  %v7974_v29 = vpop.f32.mrb[146].mxu1 }
 0xa65   :  { %v7975_v33 = vpop.f32.mrb[147].mxu1 }
 0xa66   :  { %v6436_v19 = vmax.f32 %v7973_v27, 0.0 }
 0xa68   :  { %6437 = vst [vmem:[#allocation2] sm:$0x3] %v6436_v19 }
 0xa69   :  { %9077 = shalt.err (!%p9074_p4)
}
 0xa6a   :  { %s9078_s13 = scalar_lea.hbm %s11194_s7, 32 }
 0xa6b   :  { %p9079_p5 = scmp.ne.s32.totalorder %s11194_s7, %s9078_s13  ;;  %p9082_p6 = scmp.lt.u32.totalorder %s9078_s13, %s11194_s7 }
 0xa6d   :  { %p9084_p7 = pnand %p9082_p6, %p9079_p5 }
 0xa6f   :  { %9087 = shalt.err (!%p9084_p7)
}
 0xa70   :  { %6447 = dma.vmem_to_hbm [thread:$0]  %s6445_s3, 32, %s11194_s7, [#allocation3]  }
 0xa71   :  { %9088 = dma.done.wait [#allocation3], 32  }
 0xa72   :  { %9089 = vsyncadd [#allocation3], 4294967264 }
 0xa73   :  { %6451 = vsyncpa [#allocation3], 1 }

</bundles_post_ra>
